<compile_context>
chip_gen: v5e
topology: v5e:2x2
jax: 0.10.0
libtpu: 0.0.40
codegen_flags: <defaults>
</compile_context>

<pallas_src>
import math

import jax
import jax.numpy as jnp
from jax.experimental import pallas as pl
from jax.experimental.pallas import tpu as pltpu

# TODO(synk): TripletConvNet is not defined in model/DeepRank.py; the branch
# architecture above is a faithful stand-in (conv/conv/GAP/linear/normalize).


def _deep_rank_kernel(x_ref, band1_ref, b1_ref, band2_ref, b2_ref,
                      wfc_ref, bfc_ref, out_ref, xpad_ref, hpad_ref):
    """Runs the branches present in this block (1 or 3 of query/pos/neg).

    Folded lane-dense layout: activation rows are [.., W*C_p] with lane index
    w*C_p + c, so every vector load/store is unmasked.

    x_ref:     [nb, B, H, W*Cin_p]        bf16
    band1_ref: [nb, 3, W*Cin_p, W*C1_p]   bf16  banded block-Toeplitz (per ky)
    b1_ref:    [nb, 1, W*C1_p]            f32   bias tiled across W
    band2_ref: [nb, 3, W*C1_p, W*C2_p]    bf16
    b2_ref:    [nb, 1, W*C2_p]            f32
    wfc_ref:   [nb, W*C2_p, E_p]          bf16  (wfc / (H*W)) tiled across W
    bfc_ref:   [nb, 1, E_p]               f32
    out_ref:   [nb, B, E_p]               f32   lane-dense store
    xpad_ref:  VMEM [B, H+2, W*Cin_p]     bf16  vertical-halo scratch (conv1)
    hpad_ref:  VMEM [B, H+2, W*C1_p]      bf16  vertical-halo scratch (conv2)
    """
    nb, B, H, WCin = x_ref.shape
    WC1 = band1_ref.shape[-1]

    # Zero only the 1-row top/bottom halo strips; interiors are fully
    # rewritten per branch below.
    xpad_ref[:, 0:1, :] = jnp.zeros((B, 1, WCin), xpad_ref.dtype)
    xpad_ref[:, H + 1:H + 2, :] = jnp.zeros((B, 1, WCin), xpad_ref.dtype)
    hpad_ref[:, 0:1, :] = jnp.zeros((B, 1, WC1), hpad_ref.dtype)
    hpad_ref[:, H + 1:H + 2, :] = jnp.zeros((B, 1, WC1), hpad_ref.dtype)

    def banded_conv3x3(pad_ref, band, bias):
        # "SAME" 3x3 conv == 3 MXU matmuls (one per vertical tap) against
        # banded block-Toeplitz weights; the horizontal zero padding lives in
        # the band's zero blocks, vertical padding in the scratch halo rows.
        acc = jnp.dot(pad_ref[:, 0:H, :].reshape(B * H, -1), band[0],
                      preferred_element_type=jnp.float32)
        acc = acc + jnp.dot(pad_ref[:, 1:1 + H, :].reshape(B * H, -1), band[1],
                            preferred_element_type=jnp.float32)
        acc = acc + jnp.dot(pad_ref[:, 2:2 + H, :].reshape(B * H, -1), band[2],
                            preferred_element_type=jnp.float32)
        return jnp.maximum(acc + bias, 0.0)      # [B*H, W*Cout_p], f32

    for b in range(nb):                          # static unroll over branches
        # ---- conv1: write bf16 input straight into the halo interior ----
        xpad_ref[:, 1:1 + H, :] = x_ref[b]
        h1 = banded_conv3x3(xpad_ref, band1_ref[b], b1_ref[b])   # [B*H, W*C1p]

        # ---- conv2: h1 goes straight into the conv2 halo interior (bf16) ----
        hpad_ref[:, 1:1 + H, :] = h1.reshape(B, H, WC1).astype(hpad_ref.dtype)
        h2 = banded_conv3x3(hpad_ref, band2_ref[b], b2_ref[b])   # [B*H, W*C2p]

        # ---- GAP over W + FC fused into one matmul (wfc tiled / scaled in
        # the wrapper); the remaining H-sum is a cheap sublane reduction ----
        proj = jnp.dot(h2.astype(jnp.bfloat16), wfc_ref[b],
                       preferred_element_type=jnp.float32)       # [B*H, E_p]
        emb = proj.reshape(B, H, -1).sum(axis=1) + bfc_ref[b]    # [B, E_p]

        # ---- L2 normalize via rsqrt (EUP); padded E lanes are exactly 0 ----
        inv_norm = jax.lax.rsqrt(
            jnp.sum(emb * emb, axis=-1, keepdims=True) + 1e-12)
        out_ref[b] = (emb * inv_norm).astype(out_ref.dtype)


def _pad_last(a, new):
    return jnp.pad(a, [(0, 0)] * (a.ndim - 1) + [(0, new - a.shape[-1])])


def _pad_axis(a, axis, new):
    pad = [(0, 0)] * a.ndim
    pad[axis] = (0, new - a.shape[axis])
    return jnp.pad(a, pad)


def _chan_pad(c, w):
    """Smallest c' >= c such that (w * c') % 128 == 0 (lane-dense fold)."""
    step = 128 // math.gcd(w, 128)
    return int(-(-c // step) * step)


def _band_weights(w_hwio, W):
    """[nb, 3, 3, Cin, Cout] -> [nb, 3(ky), W*Cin, W*Cout] block-Toeplitz bands.

    band[dy][win*Cin + ci, wout*Cout + co] = w[dy, dx, ci, co] with
    dx = win - wout + 1 (zero outside the 3-tap band == "SAME" horizontal pad).
    """
    nb, kh, kw, cin, cout = w_hwio.shape
    shift = jnp.stack([jnp.eye(W, k=1 - dx, dtype=w_hwio.dtype)
                       for dx in range(kw)])               # [kw, win, wout]
    band = jnp.einsum("xab,nyxio->nyaibo", shift, w_hwio)  # [nb,kh,W,Ci,W,Co]
    return band.reshape(nb, kh, W * cin, W * cout)


def _num_tensorcores_per_chip():
    # v7x has 2 TensorCores per chip; v5e/v6e have 1.  Default to 1 (safe).
    try:
        kind = jax.devices()[0].device_kind.lower()
    except Exception:
        return 1
    return 2 if "v7" in kind else 1


@jax.jit
def deep_rank_forward(x, params):
    """x: [B, 3, C, H, W] (PyTorch layout). Returns [3, B, E] (torch.stack)."""
    w1, b1, w2, b2, wfc, bfc = (params[k] for k in
                                ("w1", "b1", "w2", "b2", "wfc", "bfc"))
    B, n_branch, C, H, W = x.shape
    assert n_branch == 3
    C1 = w1.shape[-1]
    C2 = w2.shape[-1]
    E = wfc.shape[-1]

    # Lane-dense folded widths: pad channels so (W * C_p) % 128 == 0.
    c_p = _chan_pad(C, W)
    c1_p = _chan_pad(C1, W)
    c2_p = _chan_pad(C2, W)
    e_p = ((E + 127) // 128) * 128

    # Branch-major, NHWC-folded, channel-padded, bf16 input: [3, B, H, W*Cp].
    # TODO(synk): at production sizes fuse this relayout into the kernel's
    # halo write (or BlockSpec index_map) to avoid the extra HBM pass.
    xb = jnp.transpose(x, (1, 0, 3, 4, 2))                       # [3,B,H,W,C]
    xb = _pad_last(xb, c_p).reshape(3, B, H, W * c_p).astype(jnp.bfloat16)

    # Banded block-Toeplitz conv weights: each 3x3 conv becomes 3 lane-dense
    # MXU matmuls (K = W*Cin_p), no im2col / tap concat in the kernel.
    w1_p = _pad_last(_pad_axis(w1, 3, c_p), c1_p)                # [3,3,3,Cp,C1p]
    w2_p = _pad_last(_pad_axis(w2, 3, c1_p), c2_p)               # [3,3,3,C1p,C2p]
    band1 = _band_weights(w1_p, W).astype(jnp.bfloat16)          # [3,3,W*Cp,W*C1p]
    band2 = _band_weights(w2_p, W).astype(jnp.bfloat16)          # [3,3,W*C1p,W*C2p]

    # Biases tiled across W to match the folded lane layout (lane = w*C + c).
    b1_t = jnp.tile(_pad_last(b1, c1_p), (1, 1, W)).astype(jnp.float32)
    b2_t = jnp.tile(_pad_last(b2, c2_p), (1, 1, W)).astype(jnp.float32)

    # FC weight: fold the 1/(H*W) GAP scale in and tile across W so W-pooling
    # + FC collapse into one matmul; pad E to a full 128-lane (unmasked) store.
    wfc_p = _pad_last(_pad_axis(wfc, 1, c2_p), e_p) * (1.0 / (H * W))
    wfc_t = jnp.tile(wfc_p, (1, W, 1)).astype(jnp.bfloat16)      # [3,W*C2p,Ep]
    bfc_p = _pad_last(bfc, e_p).astype(jnp.float32)              # [3,1,Ep]

    # v7x: split the 3 independent branches over the 2 TensorCores via a
    # ("parallel",) branch grid.  v5e/v6e: single invocation, branches
    # unrolled in-kernel (each extra grid step costs ~0.35 us on 1-TC chips).
    steps = 3 if _num_tensorcores_per_chip() >= 2 else 1
    nb = 3 // steps

    # TODO(synk): for production B/H/W add a batch/row-tile grid axis and an
    # explicit vmem_limit_bytes, re-derived against v7x's 64 MiB VMEM.
    grid_spec = pltpu.PrefetchScalarGridSpec(
        num_scalar_prefetch=0,
        grid=(steps,),
        in_specs=[
            pl.BlockSpec((nb, B, H, W * c_p), lambda i: (i, 0, 0, 0)),
            pl.BlockSpec((nb, 3, W * c_p, W * c1_p), lambda i: (i, 0, 0, 0)),
            pl.BlockSpec((nb, 1, W * c1_p), lambda i: (i, 0, 0)),
            pl.BlockSpec((nb, 3, W * c1_p, W * c2_p), lambda i: (i, 0, 0, 0)),
            pl.BlockSpec((nb, 1, W * c2_p), lambda i: (i, 0, 0)),
            pl.BlockSpec((nb, W * c2_p, e_p), lambda i: (i, 0, 0)),
            pl.BlockSpec((nb, 1, e_p), lambda i: (i, 0, 0)),
        ],
        out_specs=pl.BlockSpec((nb, B, e_p), lambda i: (i, 0, 0)),
        scratch_shapes=[
            pltpu.VMEM((B, H + 2, W * c_p), jnp.bfloat16),
            pltpu.VMEM((B, H + 2, W * c1_p), jnp.bfloat16),
        ],
    )

    out = pl.pallas_call(
        _deep_rank_kernel,
        out_shape=jax.ShapeDtypeStruct((3, B, e_p), jnp.float32),
        grid_spec=grid_spec,
        compiler_params=pltpu.CompilerParams(
            dimension_semantics=("parallel",) if steps > 1 else ("arbitrary",)),
    )(xb, band1, b1_t, band2, b2_t, wfc_t, bfc_p)

    return out[:, :, :E]    # drop lane padding -> [3, B, E]


def deep_rank_reference(x, params):
    """Pure-JAX (f32, XLA conv) reference of the same stand-in architecture."""
    xb = jnp.transpose(x, (1, 0, 3, 4, 2)).astype(jnp.float32)  # [3,B,H,W,C]
    outs = []
    for b in range(3):
        h = jax.lax.conv_general_dilated(
            xb[b], params["w1"][b], (1, 1), "SAME",
            dimension_numbers=("NHWC", "HWIO", "NHWC"))
        h = jax.nn.relu(h + params["b1"][b].reshape(1, 1, 1, -1))
        h = jax.lax.conv_general_dilated(
            h, params["w2"][b], (1, 1), "SAME",
            dimension_numbers=("NHWC", "HWIO", "NHWC"))
        h = jax.nn.relu(h + params["b2"][b].reshape(1, 1, 1, -1))
        gap = h.mean(axis=(1, 2))                               # [B, C2]
        emb = gap @ params["wfc"][b] + params["bfc"][b]         # [B, E]
        outs.append(emb / jnp.linalg.norm(emb, axis=-1, keepdims=True))
    return jnp.stack(outs)


def init_params(key, C=4, C1=8, C2=16, E=32):
    """Three independent branches (q/p/n) stacked along a leading axis of 3."""
    ks = jax.random.split(key, 6)
    return {
        "w1": 0.1 * jax.random.normal(ks[0], (3, 3, 3, C, C1), jnp.float32),
        "b1": 0.1 * jax.random.normal(ks[1], (3, 1, C1), jnp.float32),
        "w2": 0.1 * jax.random.normal(ks[2], (3, 3, 3, C1, C2), jnp.float32),
        "b2": 0.1 * jax.random.normal(ks[3], (3, 1, C2), jnp.float32),
        "wfc": 0.1 * jax.random.normal(ks[4], (3, C2, E), jnp.float32),
        "bfc": 0.1 * jax.random.normal(ks[5], (3, 1, E), jnp.float32),
    }


if __name__ == "__main__":
    key = jax.random.PRNGKey(0)
    k_x, k_p = jax.random.split(key)

    B, C, H, W, E = 2, 4, 16, 16, 32
    x = jax.random.normal(k_x, (B, 3, C, H, W), jnp.float32)
    params = init_params(k_p, C=C, E=E)

    out = deep_rank_forward(x, params)
    out = jax.block_until_ready(out)

    assert out.shape == (3, B, E), out.shape
    assert bool(jnp.all(jnp.isfinite(out)))

    # embeddings are L2-normalized
    norms = jnp.linalg.norm(out, axis=-1)
    assert bool(jnp.all(jnp.abs(norms - 1.0) < 1e-2)), norms

    # matches the pure-JAX f32 reference (kernel uses bf16 matmul operands
    # with f32 accumulation, hence the loose tolerance)
    ref = deep_rank_reference(x, params)
    err = float(jnp.max(jnp.abs(out - ref)))
    assert err < 5e-2, err

    print("KERNEL_OK")
</pallas_src>

<mosaic_0001>
module attributes {stable_mosaic.version = 11 : i64} {
  func.func @_deep_rank_kernel(%arg0: i32, %arg1: memref<3x2x16x128xbf16, #tpu.memory_space<vmem>>, %arg2: memref<3x3x128x128xbf16, #tpu.memory_space<vmem>>, %arg3: memref<3x1x128xf32, #tpu.memory_space<vmem>>, %arg4: memref<3x3x128x256xbf16, #tpu.memory_space<vmem>>, %arg5: memref<3x1x256xf32, #tpu.memory_space<vmem>>, %arg6: memref<3x256x128xbf16, #tpu.memory_space<vmem>>, %arg7: memref<3x1x128xf32, #tpu.memory_space<vmem>>, %arg8: memref<3x2x128xf32, #tpu.memory_space<vmem>>, %arg9: memref<2x18x128xbf16, #tpu.memory_space<vmem>>, %arg10: memref<2x18x128xbf16, #tpu.memory_space<vmem>>) attributes {dimension_semantics = [#tpu.dimension_semantics<arbitrary>], iteration_bounds = array<i64: 1>, scalar_prefetch = 0 : i64, scratch_operands = 2 : i64, tpu.core_type = #tpu.core_type<tc>, window_params = [{transform_indices = @transform_0, window_bounds = array<i64: 3, 2, 16, 128>}, {transform_indices = @transform_1, window_bounds = array<i64: 3, 3, 128, 128>}, {transform_indices = @transform_2, window_bounds = array<i64: 3, 1, 128>}, {transform_indices = @transform_3, window_bounds = array<i64: 3, 3, 128, 256>}, {transform_indices = @transform_4, window_bounds = array<i64: 3, 1, 256>}, {transform_indices = @transform_5, window_bounds = array<i64: 3, 256, 128>}, {transform_indices = @transform_6, window_bounds = array<i64: 3, 1, 128>}, {transform_indices = @transform_7, window_bounds = array<i64: 3, 2, 128>}]} {
    %cst = arith.constant 0.000000e+00 : bf16
    %0 = vector.broadcast %cst : bf16 to vector<2x1x128xbf16>
    %c0 = arith.constant 0 : index
    %c0_0 = arith.constant 0 : index
    %c0_1 = arith.constant 0 : index
    %1 = vector.load %arg9[%c0, %c0_0, %c0_1] : memref<2x18x128xbf16, #tpu.memory_space<vmem>>, vector<2x1x128xbf16>
    tpu.vector_store %arg9[%c0, %c0_0, %c0_1], %0 {strides = array<i32>} : memref<2x18x128xbf16, #tpu.memory_space<vmem>>, vector<2x1x128xbf16>,
    %cst_2 = arith.constant 0.000000e+00 : bf16
    %2 = vector.broadcast %cst_2 : bf16 to vector<2x1x128xbf16>
    %c0_3 = arith.constant 0 : index
    %c17 = arith.constant 17 : index
    %c0_4 = arith.constant 0 : index
    %3 = vector.load %arg9[%c0_3, %c17, %c0_4] : memref<2x18x128xbf16, #tpu.memory_space<vmem>>, vector<2x1x128xbf16>
    tpu.vector_store %arg9[%c0_3, %c17, %c0_4], %2 {strides = array<i32>} : memref<2x18x128xbf16, #tpu.memory_space<vmem>>, vector<2x1x128xbf16>,
    %cst_5 = arith.constant 0.000000e+00 : bf16
    %4 = vector.broadcast %cst_5 : bf16 to vector<2x1x128xbf16>
    %c0_6 = arith.constant 0 : index
    %c0_7 = arith.constant 0 : index
    %c0_8 = arith.constant 0 : index
    %5 = vector.load %arg10[%c0_6, %c0_7, %c0_8] : memref<2x18x128xbf16, #tpu.memory_space<vmem>>, vector<2x1x128xbf16>
    tpu.vector_store %arg10[%c0_6, %c0_7, %c0_8], %4 {strides = array<i32>} : memref<2x18x128xbf16, #tpu.memory_space<vmem>>, vector<2x1x128xbf16>,
    %cst_9 = arith.constant 0.000000e+00 : bf16
    %6 = vector.broadcast %cst_9 : bf16 to vector<2x1x128xbf16>
    %c0_10 = arith.constant 0 : index
    %c17_11 = arith.constant 17 : index
    %c0_12 = arith.constant 0 : index
    %7 = vector.load %arg10[%c0_10, %c17_11, %c0_12] : memref<2x18x128xbf16, #tpu.memory_space<vmem>>, vector<2x1x128xbf16>
    tpu.vector_store %arg10[%c0_10, %c17_11, %c0_12], %6 {strides = array<i32>} : memref<2x18x128xbf16, #tpu.memory_space<vmem>>, vector<2x1x128xbf16>,
    %c0_13 = arith.constant 0 : index
    %c0_14 = arith.constant 0 : index
    %c0_15 = arith.constant 0 : index
    %c0_16 = arith.constant 0 : index
    %8 = vector.load %arg1[%c0_13, %c0_14, %c0_15, %c0_16] : memref<3x2x16x128xbf16, #tpu.memory_space<vmem>>, vector<1x2x16x128xbf16>
    %9 = vector.shape_cast %8 : vector<1x2x16x128xbf16> to vector<2x16x128xbf16>
    %c0_17 = arith.constant 0 : index
    %c1 = arith.constant 1 : index
    %c0_18 = arith.constant 0 : index
    %10 = vector.load %arg9[%c0_17, %c1, %c0_18] : memref<2x18x128xbf16, #tpu.memory_space<vmem>>, vector<2x16x128xbf16>
    tpu.vector_store %arg9[%c0_17, %c1, %c0_18], %9 {strides = array<i32>} : memref<2x18x128xbf16, #tpu.memory_space<vmem>>, vector<2x16x128xbf16>,
    %c0_19 = arith.constant 0 : index
    %c0_20 = arith.constant 0 : index
    %c0_21 = arith.constant 0 : index
    %c0_22 = arith.constant 0 : index
    %11 = vector.load %arg2[%c0_19, %c0_20, %c0_21, %c0_22] : memref<3x3x128x128xbf16, #tpu.memory_space<vmem>>, vector<1x3x128x128xbf16>
    %12 = vector.shape_cast %11 : vector<1x3x128x128xbf16> to vector<3x128x128xbf16>
    %c0_23 = arith.constant 0 : index
    %c0_24 = arith.constant 0 : index
    %c0_25 = arith.constant 0 : index
    %13 = vector.load %arg3[%c0_23, %c0_24, %c0_25] : memref<3x1x128xf32, #tpu.memory_space<vmem>>, vector<1x1x128xf32>
    %14 = vector.shape_cast %13 : vector<1x1x128xf32> to vector<1x128xf32>
    %c0_26 = arith.constant 0 : index
    %c0_27 = arith.constant 0 : index
    %c0_28 = arith.constant 0 : index
    %15 = vector.load %arg9[%c0_26, %c0_27, %c0_28] : memref<2x18x128xbf16, #tpu.memory_space<vmem>>, vector<2x16x128xbf16>
    %16 = vector.shape_cast %15 : vector<2x16x128xbf16> to vector<32x128xbf16>
    %17 = vector.extract_strided_slice %12 {offsets = [0, 0, 0], sizes = [1, 128, 128], strides = [1, 1, 1]} : vector<3x128x128xbf16> to vector<1x128x128xbf16>
    %18 = vector.shape_cast %17 : vector<1x128x128xbf16> to vector<128x128xbf16>
    %cst_29 = arith.constant dense<0.000000e+00> : vector<32x128xf32>
    %19 = tpu.matmul %16, %18, %cst_29 {dimension_numbers = #tpu.dot_dimension_numbers<[1], [0], [0], [1], [0, 0, 1, 1], [], []>} : vector<32x128xbf16>, vector<128x128xbf16>, vector<32x128xf32> -> vector<32x128xf32>
    %c0_30 = arith.constant 0 : index
    %c1_31 = arith.constant 1 : index
    %c0_32 = arith.constant 0 : index
    %20 = vector.load %arg9[%c0_30, %c1_31, %c0_32] : memref<2x18x128xbf16, #tpu.memory_space<vmem>>, vector<2x16x128xbf16>
    %21 = vector.shape_cast %20 : vector<2x16x128xbf16> to vector<32x128xbf16>
    %22 = vector.extract_strided_slice %12 {offsets = [1, 0, 0], sizes = [1, 128, 128], strides = [1, 1, 1]} : vector<3x128x128xbf16> to vector<1x128x128xbf16>
    %23 = vector.shape_cast %22 : vector<1x128x128xbf16> to vector<128x128xbf16>
    %cst_33 = arith.constant dense<0.000000e+00> : vector<32x128xf32>
    %24 = tpu.matmul %21, %23, %cst_33 {dimension_numbers = #tpu.dot_dimension_numbers<[1], [0], [0], [1], [0, 0, 1, 1], [], []>} : vector<32x128xbf16>, vector<128x128xbf16>, vector<32x128xf32> -> vector<32x128xf32>
    %25 = arith.addf %19, %24 : vector<32x128xf32>
    %c0_34 = arith.constant 0 : index
    %c2 = arith.constant 2 : index
    %c0_35 = arith.constant 0 : index
    %26 = vector.load %arg9[%c0_34, %c2, %c0_35] : memref<2x18x128xbf16, #tpu.memory_space<vmem>>, vector<2x16x128xbf16>
    %27 = vector.shape_cast %26 : vector<2x16x128xbf16> to vector<32x128xbf16>
    %28 = vector.extract_strided_slice %12 {offsets = [2, 0, 0], sizes = [1, 128, 128], strides = [1, 1, 1]} : vector<3x128x128xbf16> to vector<1x128x128xbf16>
    %29 = vector.shape_cast %28 : vector<1x128x128xbf16> to vector<128x128xbf16>
    %cst_36 = arith.constant dense<0.000000e+00> : vector<32x128xf32>
    %30 = tpu.matmul %27, %29, %cst_36 {dimension_numbers = #tpu.dot_dimension_numbers<[1], [0], [0], [1], [0, 0, 1, 1], [], []>} : vector<32x128xbf16>, vector<128x128xbf16>, vector<32x128xf32> -> vector<32x128xf32>
    %31 = arith.addf %25, %30 : vector<32x128xf32>
    %32 = vector.broadcast %14 : vector<1x128xf32> to vector<32x128xf32>
    %33 = arith.addf %31, %32 : vector<32x128xf32>
    %cst_37 = arith.constant 0.000000e+00 : f32
    %34 = vector.broadcast %cst_37 : f32 to vector<32x128xf32>
    %35 = arith.maximumf %33, %34 : vector<32x128xf32>
    %36 = vector.shape_cast %35 : vector<32x128xf32> to vector<2x16x128xf32>
    %37 = arith.truncf %36 : vector<2x16x128xf32> to vector<2x16x128xbf16>
    %c0_38 = arith.constant 0 : index
    %c1_39 = arith.constant 1 : index
    %c0_40 = arith.constant 0 : index
    %38 = vector.load %arg10[%c0_38, %c1_39, %c0_40] : memref<2x18x128xbf16, #tpu.memory_space<vmem>>, vector<2x16x128xbf16>
    tpu.vector_store %arg10[%c0_38, %c1_39, %c0_40], %37 {strides = array<i32>} : memref<2x18x128xbf16, #tpu.memory_space<vmem>>, vector<2x16x128xbf16>,
    %c0_41 = arith.constant 0 : index
    %c0_42 = arith.constant 0 : index
    %c0_43 = arith.constant 0 : index
    %c0_44 = arith.constant 0 : index
    %39 = vector.load %arg4[%c0_41, %c0_42, %c0_43, %c0_44] : memref<3x3x128x256xbf16, #tpu.memory_space<vmem>>, vector<1x3x128x256xbf16>
    %40 = vector.shape_cast %39 : vector<1x3x128x256xbf16> to vector<3x128x256xbf16>
    %c0_45 = arith.constant 0 : index
    %c0_46 = arith.constant 0 : index
    %c0_47 = arith.constant 0 : index
    %41 = vector.load %arg5[%c0_45, %c0_46, %c0_47] : memref<3x1x256xf32, #tpu.memory_space<vmem>>, vector<1x1x256xf32>
    %42 = vector.shape_cast %41 : vector<1x1x256xf32> to vector<1x256xf32>
    %c0_48 = arith.constant 0 : index
    %c0_49 = arith.constant 0 : index
    %c0_50 = arith.constant 0 : index
    %43 = vector.load %arg10[%c0_48, %c0_49, %c0_50] : memref<2x18x128xbf16, #tpu.memory_space<vmem>>, vector<2x16x128xbf16>
    %44 = vector.shape_cast %43 : vector<2x16x128xbf16> to vector<32x128xbf16>
    %45 = vector.extract_strided_slice %40 {offsets = [0, 0, 0], sizes = [1, 128, 256], strides = [1, 1, 1]} : vector<3x128x256xbf16> to vector<1x128x256xbf16>
    %46 = vector.shape_cast %45 : vector<1x128x256xbf16> to vector<128x256xbf16>
    %cst_51 = arith.constant dense<0.000000e+00> : vector<32x256xf32>
    %47 = tpu.matmul %44, %46, %cst_51 {dimension_numbers = #tpu.dot_dimension_numbers<[1], [0], [0], [1], [0, 0, 1, 1], [], []>} : vector<32x128xbf16>, vector<128x256xbf16>, vector<32x256xf32> -> vector<32x256xf32>
    %c0_52 = arith.constant 0 : index
    %c1_53 = arith.constant 1 : index
    %c0_54 = arith.constant 0 : index
    %48 = vector.load %arg10[%c0_52, %c1_53, %c0_54] : memref<2x18x128xbf16, #tpu.memory_space<vmem>>, vector<2x16x128xbf16>
    %49 = vector.shape_cast %48 : vector<2x16x128xbf16> to vector<32x128xbf16>
    %50 = vector.extract_strided_slice %40 {offsets = [1, 0, 0], sizes = [1, 128, 256], strides = [1, 1, 1]} : vector<3x128x256xbf16> to vector<1x128x256xbf16>
    %51 = vector.shape_cast %50 : vector<1x128x256xbf16> to vector<128x256xbf16>
    %cst_55 = arith.constant dense<0.000000e+00> : vector<32x256xf32>
    %52 = tpu.matmul %49, %51, %cst_55 {dimension_numbers = #tpu.dot_dimension_numbers<[1], [0], [0], [1], [0, 0, 1, 1], [], []>} : vector<32x128xbf16>, vector<128x256xbf16>, vector<32x256xf32> -> vector<32x256xf32>
    %53 = arith.addf %47, %52 : vector<32x256xf32>
    %c0_56 = arith.constant 0 : index
    %c2_57 = arith.constant 2 : index
    %c0_58 = arith.constant 0 : index
    %54 = vector.load %arg10[%c0_56, %c2_57, %c0_58] : memref<2x18x128xbf16, #tpu.memory_space<vmem>>, vector<2x16x128xbf16>
    %55 = vector.shape_cast %54 : vector<2x16x128xbf16> to vector<32x128xbf16>
    %56 = vector.extract_strided_slice %40 {offsets = [2, 0, 0], sizes = [1, 128, 256], strides = [1, 1, 1]} : vector<3x128x256xbf16> to vector<1x128x256xbf16>
    %57 = vector.shape_cast %56 : vector<1x128x256xbf16> to vector<128x256xbf16>
    %cst_59 = arith.constant dense<0.000000e+00> : vector<32x256xf32>
    %58 = tpu.matmul %55, %57, %cst_59 {dimension_numbers = #tpu.dot_dimension_numbers<[1], [0], [0], [1], [0, 0, 1, 1], [], []>} : vector<32x128xbf16>, vector<128x256xbf16>, vector<32x256xf32> -> vector<32x256xf32>
    %59 = arith.addf %53, %58 : vector<32x256xf32>
    %60 = vector.broadcast %42 : vector<1x256xf32> to vector<32x256xf32>
    %61 = arith.addf %59, %60 : vector<32x256xf32>
    %cst_60 = arith.constant 0.000000e+00 : f32
    %62 = vector.broadcast %cst_60 : f32 to vector<32x256xf32>
    %63 = arith.maximumf %61, %62 : vector<32x256xf32>
    %64 = arith.truncf %63 : vector<32x256xf32> to vector<32x256xbf16>
    %c0_61 = arith.constant 0 : index
    %c0_62 = arith.constant 0 : index
    %c0_63 = arith.constant 0 : index
    %65 = vector.load %arg6[%c0_61, %c0_62, %c0_63] : memref<3x256x128xbf16, #tpu.memory_space<vmem>>, vector<1x256x128xbf16>
    %66 = vector.shape_cast %65 : vector<1x256x128xbf16> to vector<256x128xbf16>
    %cst_64 = arith.constant dense<0.000000e+00> : vector<32x128xf32>
    %67 = tpu.matmul %64, %66, %cst_64 {dimension_numbers = #tpu.dot_dimension_numbers<[1], [0], [0], [1], [0, 0, 1, 1], [], []>} : vector<32x256xbf16>, vector<256x128xbf16>, vector<32x128xf32> -> vector<32x128xf32>
    %68 = vector.shape_cast %67 : vector<32x128xf32> to vector<2x16x128xf32>
    %cst_65 = arith.constant dense<0.000000e+00> : vector<2x128xf32>
    %69 = vector.multi_reduction <add>, %68, %cst_65 [1] : vector<2x16x128xf32> to vector<2x128xf32>
    %c0_66 = arith.constant 0 : index
    %c0_67 = arith.constant 0 : index
    %c0_68 = arith.constant 0 : index
    %70 = vector.load %arg7[%c0_66, %c0_67, %c0_68] : memref<3x1x128xf32, #tpu.memory_space<vmem>>, vector<1x1x128xf32>
    %71 = vector.shape_cast %70 : vector<1x1x128xf32> to vector<1x128xf32>
    %72 = vector.broadcast %71 : vector<1x128xf32> to vector<2x128xf32>
    %73 = arith.addf %69, %72 : vector<2x128xf32>
    %74 = arith.mulf %73, %73 : vector<2x128xf32>
    %cst_69 = arith.constant dense<0.000000e+00> : vector<2xf32>
    %75 = vector.multi_reduction <add>, %74, %cst_69 [1] : vector<2x128xf32> to vector<2xf32>
    %76 = vector.shape_cast %75 : vector<2xf32> to vector<2x1xf32>
    %cst_70 = arith.constant 9.99999996E-13 : f32
    %77 = vector.broadcast %cst_70 : f32 to vector<2x1xf32>
    %78 = arith.addf %76, %77 : vector<2x1xf32>
    %79 = math.rsqrt %78 : vector<2x1xf32>
    %80 = vector.broadcast %79 : vector<2x1xf32> to vector<2x128xf32>
    %81 = arith.mulf %73, %80 : vector<2x128xf32>
    %c0_71 = arith.constant 0 : index
    %c0_72 = arith.constant 0 : index
    %c0_73 = arith.constant 0 : index
    %82 = vector.load %arg8[%c0_71, %c0_72, %c0_73] : memref<3x2x128xf32, #tpu.memory_space<vmem>>, vector<1x2x128xf32>
    %83 = vector.shape_cast %82 : vector<1x2x128xf32> to vector<2x128xf32>
    %84 = vector.shape_cast %81 : vector<2x128xf32> to vector<1x2x128xf32>
    tpu.vector_store %arg8[%c0_71, %c0_72, %c0_73], %84 {strides = array<i32>} : memref<3x2x128xf32, #tpu.memory_space<vmem>>, vector<1x2x128xf32>,
    %c1_74 = arith.constant 1 : index
    %c0_75 = arith.constant 0 : index
    %c0_76 = arith.constant 0 : index
    %c0_77 = arith.constant 0 : index
    %85 = vector.load %arg1[%c1_74, %c0_75, %c0_76, %c0_77] : memref<3x2x16x128xbf16, #tpu.memory_space<vmem>>, vector<1x2x16x128xbf16>
    %86 = vector.shape_cast %85 : vector<1x2x16x128xbf16> to vector<2x16x128xbf16>
    %c0_78 = arith.constant 0 : index
    %c1_79 = arith.constant 1 : index
    %c0_80 = arith.constant 0 : index
    %87 = vector.load %arg9[%c0_78, %c1_79, %c0_80] : memref<2x18x128xbf16, #tpu.memory_space<vmem>>, vector<2x16x128xbf16>
    tpu.vector_store %arg9[%c0_78, %c1_79, %c0_80], %86 {strides = array<i32>} : memref<2x18x128xbf16, #tpu.memory_space<vmem>>, vector<2x16x128xbf16>,
    %c1_81 = arith.constant 1 : index
    %c0_82 = arith.constant 0 : index
    %c0_83 = arith.constant 0 : index
    %c0_84 = arith.constant 0 : index
    %88 = vector.load %arg2[%c1_81, %c0_82, %c0_83, %c0_84] : memref<3x3x128x128xbf16, #tpu.memory_space<vmem>>, vector<1x3x128x128xbf16>
    %89 = vector.shape_cast %88 : vector<1x3x128x128xbf16> to vector<3x128x128xbf16>
    %c1_85 = arith.constant 1 : index
    %c0_86 = arith.constant 0 : index
    %c0_87 = arith.constant 0 : index
    %90 = vector.load %arg3[%c1_85, %c0_86, %c0_87] : memref<3x1x128xf32, #tpu.memory_space<vmem>>, vector<1x1x128xf32>
    %91 = vector.shape_cast %90 : vector<1x1x128xf32> to vector<1x128xf32>
    %c0_88 = arith.constant 0 : index
    %c0_89 = arith.constant 0 : index
    %c0_90 = arith.constant 0 : index
    %92 = vector.load %arg9[%c0_88, %c0_89, %c0_90] : memref<2x18x128xbf16, #tpu.memory_space<vmem>>, vector<2x16x128xbf16>
    %93 = vector.shape_cast %92 : vector<2x16x128xbf16> to vector<32x128xbf16>
    %94 = vector.extract_strided_slice %89 {offsets = [0, 0, 0], sizes = [1, 128, 128], strides = [1, 1, 1]} : vector<3x128x128xbf16> to vector<1x128x128xbf16>
    %95 = vector.shape_cast %94 : vector<1x128x128xbf16> to vector<128x128xbf16>
    %cst_91 = arith.constant dense<0.000000e+00> : vector<32x128xf32>
    %96 = tpu.matmul %93, %95, %cst_91 {dimension_numbers = #tpu.dot_dimension_numbers<[1], [0], [0], [1], [0, 0, 1, 1], [], []>} : vector<32x128xbf16>, vector<128x128xbf16>, vector<32x128xf32> -> vector<32x128xf32>
    %c0_92 = arith.constant 0 : index
    %c1_93 = arith.constant 1 : index
    %c0_94 = arith.constant 0 : index
    %97 = vector.load %arg9[%c0_92, %c1_93, %c0_94] : memref<2x18x128xbf16, #tpu.memory_space<vmem>>, vector<2x16x128xbf16>
    %98 = vector.shape_cast %97 : vector<2x16x128xbf16> to vector<32x128xbf16>
    %99 = vector.extract_strided_slice %89 {offsets = [1, 0, 0], sizes = [1, 128, 128], strides = [1, 1, 1]} : vector<3x128x128xbf16> to vector<1x128x128xbf16>
    %100 = vector.shape_cast %99 : vector<1x128x128xbf16> to vector<128x128xbf16>
    %cst_95 = arith.constant dense<0.000000e+00> : vector<32x128xf32>
    %101 = tpu.matmul %98, %100, %cst_95 {dimension_numbers = #tpu.dot_dimension_numbers<[1], [0], [0], [1], [0, 0, 1, 1], [], []>} : vector<32x128xbf16>, vector<128x128xbf16>, vector<32x128xf32> -> vector<32x128xf32>
    %102 = arith.addf %96, %101 : vector<32x128xf32>
    %c0_96 = arith.constant 0 : index
    %c2_97 = arith.constant 2 : index
    %c0_98 = arith.constant 0 : index
    %103 = vector.load %arg9[%c0_96, %c2_97, %c0_98] : memref<2x18x128xbf16, #tpu.memory_space<vmem>>, vector<2x16x128xbf16>
    %104 = vector.shape_cast %103 : vector<2x16x128xbf16> to vector<32x128xbf16>
    %105 = vector.extract_strided_slice %89 {offsets = [2, 0, 0], sizes = [1, 128, 128], strides = [1, 1, 1]} : vector<3x128x128xbf16> to vector<1x128x128xbf16>
    %106 = vector.shape_cast %105 : vector<1x128x128xbf16> to vector<128x128xbf16>
    %cst_99 = arith.constant dense<0.000000e+00> : vector<32x128xf32>
    %107 = tpu.matmul %104, %106, %cst_99 {dimension_numbers = #tpu.dot_dimension_numbers<[1], [0], [0], [1], [0, 0, 1, 1], [], []>} : vector<32x128xbf16>, vector<128x128xbf16>, vector<32x128xf32> -> vector<32x128xf32>
    %108 = arith.addf %102, %107 : vector<32x128xf32>
    %109 = vector.broadcast %91 : vector<1x128xf32> to vector<32x128xf32>
    %110 = arith.addf %108, %109 : vector<32x128xf32>
    %cst_100 = arith.constant 0.000000e+00 : f32
    %111 = vector.broadcast %cst_100 : f32 to vector<32x128xf32>
    %112 = arith.maximumf %110, %111 : vector<32x128xf32>
    %113 = vector.shape_cast %112 : vector<32x128xf32> to vector<2x16x128xf32>
    %114 = arith.truncf %113 : vector<2x16x128xf32> to vector<2x16x128xbf16>
    %c0_101 = arith.constant 0 : index
    %c1_102 = arith.constant 1 : index
    %c0_103 = arith.constant 0 : index
    %115 = vector.load %arg10[%c0_101, %c1_102, %c0_103] : memref<2x18x128xbf16, #tpu.memory_space<vmem>>, vector<2x16x128xbf16>
    tpu.vector_store %arg10[%c0_101, %c1_102, %c0_103], %114 {strides = array<i32>} : memref<2x18x128xbf16, #tpu.memory_space<vmem>>, vector<2x16x128xbf16>,
    %c1_104 = arith.constant 1 : index
    %c0_105 = arith.constant 0 : index
    %c0_106 = arith.constant 0 : index
    %c0_107 = arith.constant 0 : index
    %116 = vector.load %arg4[%c1_104, %c0_105, %c0_106, %c0_107] : memref<3x3x128x256xbf16, #tpu.memory_space<vmem>>, vector<1x3x128x256xbf16>
    %117 = vector.shape_cast %116 : vector<1x3x128x256xbf16> to vector<3x128x256xbf16>
    %c1_108 = arith.constant 1 : index
    %c0_109 = arith.constant 0 : index
    %c0_110 = arith.constant 0 : index
    %118 = vector.load %arg5[%c1_108, %c0_109, %c0_110] : memref<3x1x256xf32, #tpu.memory_space<vmem>>, vector<1x1x256xf32>
    %119 = vector.shape_cast %118 : vector<1x1x256xf32> to vector<1x256xf32>
    %c0_111 = arith.constant 0 : index
    %c0_112 = arith.constant 0 : index
    %c0_113 = arith.constant 0 : index
    %120 = vector.load %arg10[%c0_111, %c0_112, %c0_113] : memref<2x18x128xbf16, #tpu.memory_space<vmem>>, vector<2x16x128xbf16>
    %121 = vector.shape_cast %120 : vector<2x16x128xbf16> to vector<32x128xbf16>
    %122 = vector.extract_strided_slice %117 {offsets = [0, 0, 0], sizes = [1, 128, 256], strides = [1, 1, 1]} : vector<3x128x256xbf16> to vector<1x128x256xbf16>
    %123 = vector.shape_cast %122 : vector<1x128x256xbf16> to vector<128x256xbf16>
    %cst_114 = arith.constant dense<0.000000e+00> : vector<32x256xf32>
    %124 = tpu.matmul %121, %123, %cst_114 {dimension_numbers = #tpu.dot_dimension_numbers<[1], [0], [0], [1], [0, 0, 1, 1], [], []>} : vector<32x128xbf16>, vector<128x256xbf16>, vector<32x256xf32> -> vector<32x256xf32>
    %c0_115 = arith.constant 0 : index
    %c1_116 = arith.constant 1 : index
    %c0_117 = arith.constant 0 : index
    %125 = vector.load %arg10[%c0_115, %c1_116, %c0_117] : memref<2x18x128xbf16, #tpu.memory_space<vmem>>, vector<2x16x128xbf16>
    %126 = vector.shape_cast %125 : vector<2x16x128xbf16> to vector<32x128xbf16>
    %127 = vector.extract_strided_slice %117 {offsets = [1, 0, 0], sizes = [1, 128, 256], strides = [1, 1, 1]} : vector<3x128x256xbf16> to vector<1x128x256xbf16>
    %128 = vector.shape_cast %127 : vector<1x128x256xbf16> to vector<128x256xbf16>
    %cst_118 = arith.constant dense<0.000000e+00> : vector<32x256xf32>
    %129 = tpu.matmul %126, %128, %cst_118 {dimension_numbers = #tpu.dot_dimension_numbers<[1], [0], [0], [1], [0, 0, 1, 1], [], []>} : vector<32x128xbf16>, vector<128x256xbf16>, vector<32x256xf32> -> vector<32x256xf32>
    %130 = arith.addf %124, %129 : vector<32x256xf32>
    %c0_119 = arith.constant 0 : index
    %c2_120 = arith.constant 2 : index
    %c0_121 = arith.constant 0 : index
    %131 = vector.load %arg10[%c0_119, %c2_120, %c0_121] : memref<2x18x128xbf16, #tpu.memory_space<vmem>>, vector<2x16x128xbf16>
    %132 = vector.shape_cast %131 : vector<2x16x128xbf16> to vector<32x128xbf16>
    %133 = vector.extract_strided_slice %117 {offsets = [2, 0, 0], sizes = [1, 128, 256], strides = [1, 1, 1]} : vector<3x128x256xbf16> to vector<1x128x256xbf16>
    %134 = vector.shape_cast %133 : vector<1x128x256xbf16> to vector<128x256xbf16>
    %cst_122 = arith.constant dense<0.000000e+00> : vector<32x256xf32>
    %135 = tpu.matmul %132, %134, %cst_122 {dimension_numbers = #tpu.dot_dimension_numbers<[1], [0], [0], [1], [0, 0, 1, 1], [], []>} : vector<32x128xbf16>, vector<128x256xbf16>, vector<32x256xf32> -> vector<32x256xf32>
    %136 = arith.addf %130, %135 : vector<32x256xf32>
    %137 = vector.broadcast %119 : vector<1x256xf32> to vector<32x256xf32>
    %138 = arith.addf %136, %137 : vector<32x256xf32>
    %cst_123 = arith.constant 0.000000e+00 : f32
    %139 = vector.broadcast %cst_123 : f32 to vector<32x256xf32>
    %140 = arith.maximumf %138, %139 : vector<32x256xf32>
    %141 = arith.truncf %140 : vector<32x256xf32> to vector<32x256xbf16>
    %c1_124 = arith.constant 1 : index
    %c0_125 = arith.constant 0 : index
    %c0_126 = arith.constant 0 : index
    %142 = vector.load %arg6[%c1_124, %c0_125, %c0_126] : memref<3x256x128xbf16, #tpu.memory_space<vmem>>, vector<1x256x128xbf16>
    %143 = vector.shape_cast %142 : vector<1x256x128xbf16> to vector<256x128xbf16>
    %cst_127 = arith.constant dense<0.000000e+00> : vector<32x128xf32>
    %144 = tpu.matmul %141, %143, %cst_127 {dimension_numbers = #tpu.dot_dimension_numbers<[1], [0], [0], [1], [0, 0, 1, 1], [], []>} : vector<32x256xbf16>, vector<256x128xbf16>, vector<32x128xf32> -> vector<32x128xf32>
    %145 = vector.shape_cast %144 : vector<32x128xf32> to vector<2x16x128xf32>
    %cst_128 = arith.constant dense<0.000000e+00> : vector<2x128xf32>
    %146 = vector.multi_reduction <add>, %145, %cst_128 [1] : vector<2x16x128xf32> to vector<2x128xf32>
    %c1_129 = arith.constant 1 : index
    %c0_130 = arith.constant 0 : index
    %c0_131 = arith.constant 0 : index
    %147 = vector.load %arg7[%c1_129, %c0_130, %c0_131] : memref<3x1x128xf32, #tpu.memory_space<vmem>>, vector<1x1x128xf32>
    %148 = vector.shape_cast %147 : vector<1x1x128xf32> to vector<1x128xf32>
    %149 = vector.broadcast %148 : vector<1x128xf32> to vector<2x128xf32>
    %150 = arith.addf %146, %149 : vector<2x128xf32>
    %151 = arith.mulf %150, %150 : vector<2x128xf32>
    %cst_132 = arith.constant dense<0.000000e+00> : vector<2xf32>
    %152 = vector.multi_reduction <add>, %151, %cst_132 [1] : vector<2x128xf32> to vector<2xf32>
    %153 = vector.shape_cast %152 : vector<2xf32> to vector<2x1xf32>
    %cst_133 = arith.constant 9.99999996E-13 : f32
    %154 = vector.broadcast %cst_133 : f32 to vector<2x1xf32>
    %155 = arith.addf %153, %154 : vector<2x1xf32>
    %156 = math.rsqrt %155 : vector<2x1xf32>
    %157 = vector.broadcast %156 : vector<2x1xf32> to vector<2x128xf32>
    %158 = arith.mulf %150, %157 : vector<2x128xf32>
    %c1_134 = arith.constant 1 : index
    %c0_135 = arith.constant 0 : index
    %c0_136 = arith.constant 0 : index
    %159 = vector.load %arg8[%c1_134, %c0_135, %c0_136] : memref<3x2x128xf32, #tpu.memory_space<vmem>>, vector<1x2x128xf32>
    %160 = vector.shape_cast %159 : vector<1x2x128xf32> to vector<2x128xf32>
    %161 = vector.shape_cast %158 : vector<2x128xf32> to vector<1x2x128xf32>
    tpu.vector_store %arg8[%c1_134, %c0_135, %c0_136], %161 {strides = array<i32>} : memref<3x2x128xf32, #tpu.memory_space<vmem>>, vector<1x2x128xf32>,
    %c2_137 = arith.constant 2 : index
    %c0_138 = arith.constant 0 : index
    %c0_139 = arith.constant 0 : index
    %c0_140 = arith.constant 0 : index
    %162 = vector.load %arg1[%c2_137, %c0_138, %c0_139, %c0_140] : memref<3x2x16x128xbf16, #tpu.memory_space<vmem>>, vector<1x2x16x128xbf16>
    %163 = vector.shape_cast %162 : vector<1x2x16x128xbf16> to vector<2x16x128xbf16>
    %c0_141 = arith.constant 0 : index
    %c1_142 = arith.constant 1 : index
    %c0_143 = arith.constant 0 : index
    %164 = vector.load %arg9[%c0_141, %c1_142, %c0_143] : memref<2x18x128xbf16, #tpu.memory_space<vmem>>, vector<2x16x128xbf16>
    tpu.vector_store %arg9[%c0_141, %c1_142, %c0_143], %163 {strides = array<i32>} : memref<2x18x128xbf16, #tpu.memory_space<vmem>>, vector<2x16x128xbf16>,
    %c2_144 = arith.constant 2 : index
    %c0_145 = arith.constant 0 : index
    %c0_146 = arith.constant 0 : index
    %c0_147 = arith.constant 0 : index
    %165 = vector.load %arg2[%c2_144, %c0_145, %c0_146, %c0_147] : memref<3x3x128x128xbf16, #tpu.memory_space<vmem>>, vector<1x3x128x128xbf16>
    %166 = vector.shape_cast %165 : vector<1x3x128x128xbf16> to vector<3x128x128xbf16>
    %c2_148 = arith.constant 2 : index
    %c0_149 = arith.constant 0 : index
    %c0_150 = arith.constant 0 : index
    %167 = vector.load %arg3[%c2_148, %c0_149, %c0_150] : memref<3x1x128xf32, #tpu.memory_space<vmem>>, vector<1x1x128xf32>
    %168 = vector.shape_cast %167 : vector<1x1x128xf32> to vector<1x128xf32>
    %c0_151 = arith.constant 0 : index
    %c0_152 = arith.constant 0 : index
    %c0_153 = arith.constant 0 : index
    %169 = vector.load %arg9[%c0_151, %c0_152, %c0_153] : memref<2x18x128xbf16, #tpu.memory_space<vmem>>, vector<2x16x128xbf16>
    %170 = vector.shape_cast %169 : vector<2x16x128xbf16> to vector<32x128xbf16>
    %171 = vector.extract_strided_slice %166 {offsets = [0, 0, 0], sizes = [1, 128, 128], strides = [1, 1, 1]} : vector<3x128x128xbf16> to vector<1x128x128xbf16>
    %172 = vector.shape_cast %171 : vector<1x128x128xbf16> to vector<128x128xbf16>
    %cst_154 = arith.constant dense<0.000000e+00> : vector<32x128xf32>
    %173 = tpu.matmul %170, %172, %cst_154 {dimension_numbers = #tpu.dot_dimension_numbers<[1], [0], [0], [1], [0, 0, 1, 1], [], []>} : vector<32x128xbf16>, vector<128x128xbf16>, vector<32x128xf32> -> vector<32x128xf32>
    %c0_155 = arith.constant 0 : index
    %c1_156 = arith.constant 1 : index
    %c0_157 = arith.constant 0 : index
    %174 = vector.load %arg9[%c0_155, %c1_156, %c0_157] : memref<2x18x128xbf16, #tpu.memory_space<vmem>>, vector<2x16x128xbf16>
    %175 = vector.shape_cast %174 : vector<2x16x128xbf16> to vector<32x128xbf16>
    %176 = vector.extract_strided_slice %166 {offsets = [1, 0, 0], sizes = [1, 128, 128], strides = [1, 1, 1]} : vector<3x128x128xbf16> to vector<1x128x128xbf16>
    %177 = vector.shape_cast %176 : vector<1x128x128xbf16> to vector<128x128xbf16>
    %cst_158 = arith.constant dense<0.000000e+00> : vector<32x128xf32>
    %178 = tpu.matmul %175, %177, %cst_158 {dimension_numbers = #tpu.dot_dimension_numbers<[1], [0], [0], [1], [0, 0, 1, 1], [], []>} : vector<32x128xbf16>, vector<128x128xbf16>, vector<32x128xf32> -> vector<32x128xf32>
    %179 = arith.addf %173, %178 : vector<32x128xf32>
    %c0_159 = arith.constant 0 : index
    %c2_160 = arith.constant 2 : index
    %c0_161 = arith.constant 0 : index
    %180 = vector.load %arg9[%c0_159, %c2_160, %c0_161] : memref<2x18x128xbf16, #tpu.memory_space<vmem>>, vector<2x16x128xbf16>
    %181 = vector.shape_cast %180 : vector<2x16x128xbf16> to vector<32x128xbf16>
    %182 = vector.extract_strided_slice %166 {offsets = [2, 0, 0], sizes = [1, 128, 128], strides = [1, 1, 1]} : vector<3x128x128xbf16> to vector<1x128x128xbf16>
    %183 = vector.shape_cast %182 : vector<1x128x128xbf16> to vector<128x128xbf16>
    %cst_162 = arith.constant dense<0.000000e+00> : vector<32x128xf32>
    %184 = tpu.matmul %181, %183, %cst_162 {dimension_numbers = #tpu.dot_dimension_numbers<[1], [0], [0], [1], [0, 0, 1, 1], [], []>} : vector<32x128xbf16>, vector<128x128xbf16>, vector<32x128xf32> -> vector<32x128xf32>
    %185 = arith.addf %179, %184 : vector<32x128xf32>
    %186 = vector.broadcast %168 : vector<1x128xf32> to vector<32x128xf32>
    %187 = arith.addf %185, %186 : vector<32x128xf32>
    %cst_163 = arith.constant 0.000000e+00 : f32
    %188 = vector.broadcast %cst_163 : f32 to vector<32x128xf32>
    %189 = arith.maximumf %187, %188 : vector<32x128xf32>
    %190 = vector.shape_cast %189 : vector<32x128xf32> to vector<2x16x128xf32>
    %191 = arith.truncf %190 : vector<2x16x128xf32> to vector<2x16x128xbf16>
    %c0_164 = arith.constant 0 : index
    %c1_165 = arith.constant 1 : index
    %c0_166 = arith.constant 0 : index
    %192 = vector.load %arg10[%c0_164, %c1_165, %c0_166] : memref<2x18x128xbf16, #tpu.memory_space<vmem>>, vector<2x16x128xbf16>
    tpu.vector_store %arg10[%c0_164, %c1_165, %c0_166], %191 {strides = array<i32>} : memref<2x18x128xbf16, #tpu.memory_space<vmem>>, vector<2x16x128xbf16>,
    %c2_167 = arith.constant 2 : index
    %c0_168 = arith.constant 0 : index
    %c0_169 = arith.constant 0 : index
    %c0_170 = arith.constant 0 : index
    %193 = vector.load %arg4[%c2_167, %c0_168, %c0_169, %c0_170] : memref<3x3x128x256xbf16, #tpu.memory_space<vmem>>, vector<1x3x128x256xbf16>
    %194 = vector.shape_cast %193 : vector<1x3x128x256xbf16> to vector<3x128x256xbf16>
    %c2_171 = arith.constant 2 : index
    %c0_172 = arith.constant 0 : index
    %c0_173 = arith.constant 0 : index
    %195 = vector.load %arg5[%c2_171, %c0_172, %c0_173] : memref<3x1x256xf32, #tpu.memory_space<vmem>>, vector<1x1x256xf32>
    %196 = vector.shape_cast %195 : vector<1x1x256xf32> to vector<1x256xf32>
    %c0_174 = arith.constant 0 : index
    %c0_175 = arith.constant 0 : index
    %c0_176 = arith.constant 0 : index
    %197 = vector.load %arg10[%c0_174, %c0_175, %c0_176] : memref<2x18x128xbf16, #tpu.memory_space<vmem>>, vector<2x16x128xbf16>
    %198 = vector.shape_cast %197 : vector<2x16x128xbf16> to vector<32x128xbf16>
    %199 = vector.extract_strided_slice %194 {offsets = [0, 0, 0], sizes = [1, 128, 256], strides = [1, 1, 1]} : vector<3x128x256xbf16> to vector<1x128x256xbf16>
    %200 = vector.shape_cast %199 : vector<1x128x256xbf16> to vector<128x256xbf16>
    %cst_177 = arith.constant dense<0.000000e+00> : vector<32x256xf32>
    %201 = tpu.matmul %198, %200, %cst_177 {dimension_numbers = #tpu.dot_dimension_numbers<[1], [0], [0], [1], [0, 0, 1, 1], [], []>} : vector<32x128xbf16>, vector<128x256xbf16>, vector<32x256xf32> -> vector<32x256xf32>
    %c0_178 = arith.constant 0 : index
    %c1_179 = arith.constant 1 : index
    %c0_180 = arith.constant 0 : index
    %202 = vector.load %arg10[%c0_178, %c1_179, %c0_180] : memref<2x18x128xbf16, #tpu.memory_space<vmem>>, vector<2x16x128xbf16>
    %203 = vector.shape_cast %202 : vector<2x16x128xbf16> to vector<32x128xbf16>
    %204 = vector.extract_strided_slice %194 {offsets = [1, 0, 0], sizes = [1, 128, 256], strides = [1, 1, 1]} : vector<3x128x256xbf16> to vector<1x128x256xbf16>
    %205 = vector.shape_cast %204 : vector<1x128x256xbf16> to vector<128x256xbf16>
    %cst_181 = arith.constant dense<0.000000e+00> : vector<32x256xf32>
    %206 = tpu.matmul %203, %205, %cst_181 {dimension_numbers = #tpu.dot_dimension_numbers<[1], [0], [0], [1], [0, 0, 1, 1], [], []>} : vector<32x128xbf16>, vector<128x256xbf16>, vector<32x256xf32> -> vector<32x256xf32>
    %207 = arith.addf %201, %206 : vector<32x256xf32>
    %c0_182 = arith.constant 0 : index
    %c2_183 = arith.constant 2 : index
    %c0_184 = arith.constant 0 : index
    %208 = vector.load %arg10[%c0_182, %c2_183, %c0_184] : memref<2x18x128xbf16, #tpu.memory_space<vmem>>, vector<2x16x128xbf16>
    %209 = vector.shape_cast %208 : vector<2x16x128xbf16> to vector<32x128xbf16>
    %210 = vector.extract_strided_slice %194 {offsets = [2, 0, 0], sizes = [1, 128, 256], strides = [1, 1, 1]} : vector<3x128x256xbf16> to vector<1x128x256xbf16>
    %211 = vector.shape_cast %210 : vector<1x128x256xbf16> to vector<128x256xbf16>
    %cst_185 = arith.constant dense<0.000000e+00> : vector<32x256xf32>
    %212 = tpu.matmul %209, %211, %cst_185 {dimension_numbers = #tpu.dot_dimension_numbers<[1], [0], [0], [1], [0, 0, 1, 1], [], []>} : vector<32x128xbf16>, vector<128x256xbf16>, vector<32x256xf32> -> vector<32x256xf32>
    %213 = arith.addf %207, %212 : vector<32x256xf32>
    %214 = vector.broadcast %196 : vector<1x256xf32> to vector<32x256xf32>
    %215 = arith.addf %213, %214 : vector<32x256xf32>
    %cst_186 = arith.constant 0.000000e+00 : f32
    %216 = vector.broadcast %cst_186 : f32 to vector<32x256xf32>
    %217 = arith.maximumf %215, %216 : vector<32x256xf32>
    %218 = arith.truncf %217 : vector<32x256xf32> to vector<32x256xbf16>
    %c2_187 = arith.constant 2 : index
    %c0_188 = arith.constant 0 : index
    %c0_189 = arith.constant 0 : index
    %219 = vector.load %arg6[%c2_187, %c0_188, %c0_189] : memref<3x256x128xbf16, #tpu.memory_space<vmem>>, vector<1x256x128xbf16>
    %220 = vector.shape_cast %219 : vector<1x256x128xbf16> to vector<256x128xbf16>
    %cst_190 = arith.constant dense<0.000000e+00> : vector<32x128xf32>
    %221 = tpu.matmul %218, %220, %cst_190 {dimension_numbers = #tpu.dot_dimension_numbers<[1], [0], [0], [1], [0, 0, 1, 1], [], []>} : vector<32x256xbf16>, vector<256x128xbf16>, vector<32x128xf32> -> vector<32x128xf32>
    %222 = vector.shape_cast %221 : vector<32x128xf32> to vector<2x16x128xf32>
    %cst_191 = arith.constant dense<0.000000e+00> : vector<2x128xf32>
    %223 = vector.multi_reduction <add>, %222, %cst_191 [1] : vector<2x16x128xf32> to vector<2x128xf32>
    %c2_192 = arith.constant 2 : index
    %c0_193 = arith.constant 0 : index
    %c0_194 = arith.constant 0 : index
    %224 = vector.load %arg7[%c2_192, %c0_193, %c0_194] : memref<3x1x128xf32, #tpu.memory_space<vmem>>, vector<1x1x128xf32>
    %225 = vector.shape_cast %224 : vector<1x1x128xf32> to vector<1x128xf32>
    %226 = vector.broadcast %225 : vector<1x128xf32> to vector<2x128xf32>
    %227 = arith.addf %223, %226 : vector<2x128xf32>
    %228 = arith.mulf %227, %227 : vector<2x128xf32>
    %cst_195 = arith.constant dense<0.000000e+00> : vector<2xf32>
    %229 = vector.multi_reduction <add>, %228, %cst_195 [1] : vector<2x128xf32> to vector<2xf32>
    %230 = vector.shape_cast %229 : vector<2xf32> to vector<2x1xf32>
    %cst_196 = arith.constant 9.99999996E-13 : f32
    %231 = vector.broadcast %cst_196 : f32 to vector<2x1xf32>
    %232 = arith.addf %230, %231 : vector<2x1xf32>
    %233 = math.rsqrt %232 : vector<2x1xf32>
    %234 = vector.broadcast %233 : vector<2x1xf32> to vector<2x128xf32>
    %235 = arith.mulf %227, %234 : vector<2x128xf32>
    %c2_197 = arith.constant 2 : index
    %c0_198 = arith.constant 0 : index
    %c0_199 = arith.constant 0 : index
    %236 = vector.load %arg8[%c2_197, %c0_198, %c0_199] : memref<3x2x128xf32, #tpu.memory_space<vmem>>, vector<1x2x128xf32>
    %237 = vector.shape_cast %236 : vector<1x2x128xf32> to vector<2x128xf32>
    %238 = vector.shape_cast %235 : vector<2x128xf32> to vector<1x2x128xf32>
    tpu.vector_store %arg8[%c2_197, %c0_198, %c0_199], %238 {strides = array<i32>} : memref<3x2x128xf32, #tpu.memory_space<vmem>>, vector<1x2x128xf32>,
    return
  }
  func.func @transform_0(%arg0: i32) -> (i32, i32, i32, i32) {
    %c0_i32 = arith.constant 0 : i32
    %c0_i32_0 = arith.constant 0 : i32
    %c0_i32_1 = arith.constant 0 : i32
    %c0_i32_2 = arith.constant 0 : i32
    return %arg0, %c0_i32, %c0_i32_0, %c0_i32_1 : i32, i32, i32, i32
  }
  func.func @transform_1(%arg0: i32) -> (i32, i32, i32, i32) {
    %c0_i32 = arith.constant 0 : i32
    %c0_i32_0 = arith.constant 0 : i32
    %c0_i32_1 = arith.constant 0 : i32
    %c0_i32_2 = arith.constant 0 : i32
    return %arg0, %c0_i32, %c0_i32_0, %c0_i32_1 : i32, i32, i32, i32
  }
  func.func @transform_2(%arg0: i32) -> (i32, i32, i32) {
    %c0_i32 = arith.constant 0 : i32
    %c0_i32_0 = arith.constant 0 : i32
    %c0_i32_1 = arith.constant 0 : i32
    return %arg0, %c0_i32, %c0_i32_0 : i32, i32, i32
  }
  func.func @transform_3(%arg0: i32) -> (i32, i32, i32, i32) {
    %c0_i32 = arith.constant 0 : i32
    %c0_i32_0 = arith.constant 0 : i32
    %c0_i32_1 = arith.constant 0 : i32
    %c0_i32_2 = arith.constant 0 : i32
    return %arg0, %c0_i32, %c0_i32_0, %c0_i32_1 : i32, i32, i32, i32
  }
  func.func @transform_4(%arg0: i32) -> (i32, i32, i32) {
    %c0_i32 = arith.constant 0 : i32
    %c0_i32_0 = arith.constant 0 : i32
    %c0_i32_1 = arith.constant 0 : i32
    return %arg0, %c0_i32, %c0_i32_0 : i32, i32, i32
  }
  func.func @transform_5(%arg0: i32) -> (i32, i32, i32) {
    %c0_i32 = arith.constant 0 : i32
    %c0_i32_0 = arith.constant 0 : i32
    %c0_i32_1 = arith.constant 0 : i32
    return %arg0, %c0_i32, %c0_i32_0 : i32, i32, i32
  }
  func.func @transform_6(%arg0: i32) -> (i32, i32, i32) {
    %c0_i32 = arith.constant 0 : i32
    %c0_i32_0 = arith.constant 0 : i32
    %c0_i32_1 = arith.constant 0 : i32
    return %arg0, %c0_i32, %c0_i32_0 : i32, i32, i32
  }
  func.func @transform_7(%arg0: i32) -> (i32, i32, i32) {
    %c0_i32 = arith.constant 0 : i32
    %c0_i32_0 = arith.constant 0 : i32
    %c0_i32_1 = arith.constant 0 : i32
    return %arg0, %c0_i32, %c0_i32_0 : i32, i32, i32
  }
}

</mosaic_0001>

<bundles_post_ra>
// kernel: deep_rank_forward.1
= control target key start
LH: loop header
LB: loop body
LE: loop exit
PB: predicated region body
PF: predicated region fallthrough
CT: control target
= control target key end

     0   :  { %vm28_vm0 = vcmask 1040384   ;;  %vm29_vm1 = vsmask.f32 256  ;;  %vm37_vm2 = vsmask.f32 7938  ;;  %vm103_vm6 = vcmask 1043456   ;;  %s7289_s0 = inlined_call_operand.vmem [shape: bf16[3,2,16,128], index: 0, kind: input, shape index: {}]   ;;  %s7290_s1 = inlined_call_operand.vmem [shape: bf16[3,3,128,128], index: 1, kind: input, shape index: {}]   ;;  %s7291_s2 = inlined_call_operand.vmem [shape: f32[3,1,128], index: 2, kind: input, shape index: {}]   ;;  %s7292_s3 = inlined_call_operand.vmem [shape: bf16[3,3,128,256], index: 3, kind: input, shape index: {}]   ;;  %s7293_s4 = inlined_call_operand.vmem [shape: f32[3,1,256], index: 4, kind: input, shape index: {}]   ;;  %s7294_s5 = inlined_call_operand.vmem [shape: bf16[3,256,128], index: 5, kind: input, shape index: {}]   ;;  %s7295_s6 = inlined_call_operand.vmem [shape: f32[3,1,128], index: 6, kind: input, shape index: {}]   ;;  %s7296_s7 = inlined_call_operand.hbm [shape: f32[3,2,128], index: 7, kind: output, shape index: {}]  }
   0x1   :  { %v5224_v0 = vld [vmem:[%s7290_s1 + $0x78] sm:$0xff]  ;;  %v5223_v3 = vld [vmem:[%s7290_s1 + $0x70] sm:$0xff]  ;;  %v5222_v6 = vld [vmem:[%s7290_s1 + $0x68] sm:$0xff]  ;;  %vm61_vm4 = vsmask.f32 4368  ;;  %vm385_vm9 = vcmask 1042432  }
   0x2   :  { %v5216_v1 = vld [vmem:[%s7290_s1 + $0x38] sm:$0xff]  ;;  %281 = vmatpush.bf16.msra.mxu0 %v5224_v0  ;;  %v5215_v4 = vld [vmem:[%s7290_s1 + $0x30] sm:$0xff]  ;;  %v5214_v7 = vld [vmem:[%s7290_s1 + $0x28] sm:$0xff]  ;;  %vm174_vm10 = vsmask.f32 3328 }
   0x3   :  { %v5232_v2 = vld [vmem:[%s7290_s1 + $0xb8] sm:$0xff]  ;;  %360 = vmatpush.bf16.msra.mxu1 %v5216_v1  ;;  %v5231_v5 = vld [vmem:[%s7290_s1 + $0xb0] sm:$0xff]  ;;  %v5230_v8 = vld [vmem:[%s7290_s1 + $0xa8] sm:$0xff]  ;;  %vm175_vm11 = vsmask.f32 7440 }
   0x4   :  { %458 = vmatpush.bf16.msra.mxu2 %v5232_v2  ;;  %v5221_v9 = vld [vmem:[%s7290_s1 + $0x60] sm:$0xff]  ;;  %vm5612_vm3 = vmand %vm28_vm0, %vm29_vm1  ;;  %v39_v13 = vld [vmem:[#allocation2 + $0x8] sm:$0x1] }
   0x5   :  { %v5213_v10 = vld [vmem:[%s7290_s1 + $0x20] sm:$0xff]  ;;  %vm5620_vm5 = vmand %vm28_vm0, %vm37_vm2  ;;  %v5638_v24 = vld [vmem:[%s7289_s0 + $0x10] sm:$0xf] }
   0x6   :  { %282 = vmatpush.bf16.msra.mxu0 %v5223_v3  ;;  %v31_v12 = vld [vmem:[#allocation2] sm:$0x1]  ;;  %v58_v17 = vld [vmem:[%s7289_s0 + $0x4] sm:$0xf]  ;;  %v40_v18 = vsel %vm5620_vm5, 0, %v39_v13  ;;  %v5220_v25 = vld [vmem:[%s7290_s1 + $0x58] sm:$0xff] }
   0x7   :  { %361 = vmatpush.bf16.msra.mxu1 %v5215_v4  ;;  %v32_v14 = vsel %vm5612_vm3, 0, %v31_v12  ;;  %v57_v16 = vld [vmem:[%s7289_s0] sm:$0xf]  ;;  %v72_v21 = vshrl.u32 %v58_v17, 16  ;;  %41 = vst [vmem:[#allocation2 + $0x8] sm:$0x1] %v40_v18  ;;  %vm5655_vm7 = vmor %vm29_vm1, %vm61_vm4 }
   0x8   :  { %459 = vmatpush.bf16.msra.mxu2 %v5231_v5  ;;  %33 = vst [vmem:[#allocation2] sm:$0x1] %v32_v14  ;;  %v64_v19 = vshrl.u32 %v57_v16, 16  ;;  %v67_v20 = vshll.u32 %v57_v16, 16  ;;  %v5229_v22 = vld [vmem:[%s7290_s1 + $0xa0] sm:$0xff]  ;;  %v75_v23 = vshll.u32 %v58_v17, 16  ;;  %vm5667_vm8 = vmand %vm103_vm6, %vm37_vm2 }
   0x9   :  { %v5212_v26 = vld [vmem:[%s7290_s1 + $0x18] sm:$0xff]  ;;  %v74_v28 = vrot.slane %v72_v21, 7  ;;  %v4196_v29 = vld [vmem:[%s7289_s0 + $0x14] sm:$0xf]  ;;  %v1315_v30 = vshrl.u32 %v5638_v24, 16  ;;  %v1318_v61 = vshll.u32 %v5638_v24, 16 }
   0xa   :  { %283 = vmatpush.bf16.msra.mxu0 %v5222_v6  ;;  %v66_v27 = vrot.slane %v64_v19, 7  ;;  %v5228_v31 = vld [vmem:[%s7290_s1 + $0x98] sm:$0xff]  ;;  %v1323_v33 = vshrl.u32 %v4196_v29, 16  ;;  %v1326_v34 = vshll.u32 %v4196_v29, 16  ;;  %v34_v35 = vld [vmem:[#allocation2 + $0xc] sm:$0x1] }
   0xb   :  { %362 = vmatpush.bf16.msra.mxu1 %v5214_v7  ;;  %v42_v36 = vld [vmem:[#allocation2 + $0x14] sm:$0x1]  ;;  %v77_v39 = vor.u32 %v75_v23, %v74_v28  ;;  %v79_v40 = vrot.slane %v74_v28, 4  ;;  %v59_v41 = vld [vmem:[%s7289_s0 + $0x8] sm:$0xf]  ;;  %v1317_v44 = vrot.slane %v1315_v30, 7 }
   0xc   :  { %460 = vmatpush.bf16.msra.mxu2 %v5230_v8  ;;  %v69_v37 = vor.u32 %v67_v20, %v66_v27  ;;  %v70_v38 = vrot.slane %v66_v27, 4  ;;  %v60_v42 = vld [vmem:[%s7289_s0 + $0xc] sm:$0xf]  ;;  %v5671_v45 = vrot.slane %v1323_v33, 7  ;;  %v35_v46 = vsel %vm5612_vm3, 0, %v34_v35  ;;  %v5219_v48 = vld [vmem:[%s7290_s1 + $0x50] sm:$0xff] }
   0xd   :  { %v43_v47 = vsel %vm5620_vm5, 0, %v42_v36  ;;  %36 = vst [vmem:[#allocation2 + $0xc] sm:$0x1] %v35_v46  ;;  %v81_v50 = vshrl.u32 %v59_v41, 16  ;;  %v84_v51 = vshll.u32 %v59_v41, 16  ;;  %v89_v52 = vshrl.u32 %v60_v42, 16 }
   0xe   :  { %284 = vmatpush.bf16.msra.mxu0 %v5221_v9  ;;  %v78_v49 = vsel %vm5655_vm7, %v70_v38, %v77_v39  ;;  %v5211_v53 = vld [vmem:[%s7290_s1 + $0x10] sm:$0xff]  ;;  %v109_v57 = vld [vmem:[#allocation2 + $0x8] sm:$0x1]  ;;  %44 = vst [vmem:[#allocation2 + $0x14] sm:$0x1] %v43_v47  ;;  %v92_v62 = vshll.u32 %v60_v42, 16  ;;  %v1328_v0 = vor.u32 %v1326_v34, %v5671_v45 }
   0xf   :  { %363 = vmatpush.bf16.msra.mxu1 %v5213_v10  ;;  %v5227_v54 = vld [vmem:[%s7290_s1 + $0x90] sm:$0xff]  ;;  %v105_v55 = vld [vmem:[#allocation2] sm:$0xf]  ;;  %108 = vst [vmem:[#allocation2 + $0x4] sm:$0xf] %v78_v49  ;;  %v83_v58 = vrot.slane %v81_v50, 7  ;;  %v110_v60 = vsel %vm5612_vm3, %v79_v40, %v109_v57 }
  0x10   :  { %461 = vmatpush.bf16.msra.mxu2 %v5229_v22  ;;  %v106_v56 = vsel %vm5667_vm8, %v69_v37, %v105_v55  ;;  %v5690_v59 = vrot.slane %v89_v52, 7  ;;  %111 = vst [vmem:[#allocation2 + $0x8] sm:$0x1] %v110_v60  ;;  %v1321_v63 = vrot.slane %v1317_v44, 4  ;;  %v5218_v4 = vld [vmem:[%s7290_s1 + $0x48] sm:$0xff] }
  0x11   :  { %107 = vst [vmem:[#allocation2] sm:$0xf] %v106_v56  ;;  %v86_v1 = vor.u32 %v84_v51, %v83_v58  ;;  %v87_v2 = vrot.slane %v83_v58, 4  ;;  %v5210_v5 = vld [vmem:[%s7290_s1 + $0x8] sm:$0xff] }
  0x12   :  { %285 = vmatpush.bf16.msra.mxu0 %v5220_v25  ;;  %v94_v3 = vor.u32 %v92_v62, %v5690_v59 }
  0x13   :  { %364 = vmatpush.bf16.msra.mxu1 %v5212_v26 }
  0x14   :  { %462 = vmatpush.bf16.msra.mxu2 %v5228_v31 }
  0x16   :  { %286 = vmatpush.bf16.msra.mxu0 %v5219_v48 }
  0x17   :  { %365 = vmatpush.bf16.msra.mxu1 %v5211_v53 }
  0x18   :  { %12 = vsyncpa [#allocation5], 0  ;;  %463 = vmatpush.bf16.msra.mxu2 %v5227_v54  ;;  %v5226_v6 = vld [vmem:[%s7290_s1 + $0x88] sm:$0xff]  ;;  %v1330_v7 = vrot.slane %v5671_v45, 4  ;;  %vm386_vm12 = vcmask 1046532   ;;  %v95_v8 = vsel %vm5655_vm7, %v87_v2, %v94_v3  ;;  %v96_v9 = vrot.slane %v5690_v59, 4 }
  0x19   :  { %v112_v10 = vld [vmem:[#allocation2 + $0xc] sm:$0xf]  ;;  %v5217_v12 = vld [vmem:[%s7290_s1 + $0x40] sm:$0xff]  ;;  %v1320_v16 = vor.u32 %v1318_v61, %v1317_v44  ;;  %v1329_v17 = vsel %vm5655_vm7, %v1321_v63, %v1328_v0  ;;  %115 = vst [vmem:[#allocation2 + $0x10] sm:$0xf] %v95_v8  ;;  %vm5736_vm13 = vmor %vm385_vm9, %vm386_vm12  ;;  %vm1279_vm15 = vcmask 1041409  }
  0x1a   :  { %v5209_v13 = vld [vmem:[%s7290_s1] sm:$0xff]  ;;  %v113_v18 = vsel %vm5667_vm8, %v86_v1, %v112_v10  ;;  %v5723_v19 = vld [vmem:[%s7289_s0 + $0x18] sm:$0xf]  ;;  %287 = vmatpush.bf16.msra.mxu0 %v5218_v4  ;;  %v172_v29 = vld [vmem:[#allocation2 + $0x8] sm:$0x1]  ;;  %vm1282_vm0 = vcmask 1041408  }
  0x1b   :  { %v169_v14 = vld [vmem:[#allocation2 + $0x4] sm:$0xf]  ;;  %114 = vst [vmem:[#allocation2 + $0xc] sm:$0xf] %v113_v18  ;;  %v1332_v24 = vshrl.u32 %v5723_v19, 16  ;;  %366 = vmatpush.bf16.msra.mxu1 %v5210_v5  ;;  %v1335_v28 = vshll.u32 %v5723_v19, 16  ;;  %vm5742_vm14 = vmor %vm174_vm10, %vm175_vm11 }
  0x1c   :  { %v5225_v20 = vld [vmem:[%s7290_s1 + $0x80] sm:$0xff]  ;;  %v187_v21 = vshll.u32 %v169_v14, 16  ;;  %v191_v22 = vshrl.u32 %v169_v14, 16  ;;  %v390_v23 = vrot.slane %v169_v14, 5  ;;  %464 = vmatpush.bf16.msra.mxu2 %v5226_v6  ;;  %v197_v35 = vshll.u32 %v172_v29, 16  ;;  %s5535_s17 = smov 32  }
  0x1d   :  { %v168_v25 = vld [vmem:[#allocation2] sm:$0xf]  ;;  %v1358_v37 = vld [vmem:[#allocation2 + $0x8] sm:$0x1]  ;;  %v116_v46 = vld [vmem:[#allocation2 + $0x14] sm:$0x1] }
  0x1e   :  { %v5233_v26 = vld [vmem:[#allocation2] sm:$0xff]  ;;  %v178_v30 = vshrl.u32 %v168_v25, 16  ;;  %v181_v31 = vshll.u32 %v168_v25, 16  ;;  %v189_v33 = vrot.slane %v187_v21, 5  ;;  %v193_v34 = vrot.slane %v191_v22, 4  ;;  %288 = vmatpush.bf16.msra.mxu0 %v5217_v12  ;;  %s5536_s18 = smov 2  }
  0x1f   :  { %v1354_v27 = vld [vmem:[#allocation2] sm:$0xf]  ;;  %1357 = vst [vmem:[#allocation2 + $0x4] sm:$0xf] %v1329_v17  ;;  %v392_v38 = vrot.slane %v390_v23, 4  ;;  %v1359_v42 = vsel %vm5612_vm3, %v1330_v7, %v1358_v37  ;;  %367 = vmatpush.bf16.msra.mxu1 %v5209_v13  ;;  %v199_v48 = vrot.slane %v197_v35, 5  ;;  %v117_v51 = vsel %vm5612_vm3, %v96_v9, %v116_v46 }
  0x20   :  { %v1355_v36 = vsel %vm5667_vm8, %v1320_v16, %v1354_v27  ;;  %v180_v39 = vrot.slane %v178_v30, 4  ;;  %v183_v40 = vrot.slane %v181_v31, 5  ;;  %v194_v41 = vor.u32 %v193_v34, %v189_v33  ;;  %v379_v44 = vld [vmem:[#allocation2] sm:$0xe]  ;;  %1360 = vst [vmem:[#allocation2 + $0x8] sm:$0x1] %v1359_v42  ;;  %465 = vmatpush.bf16.msra.mxu2 %v5225_v20 }
  0x21   :  { %v3895_v49 = vrot.slane %v379_v44, 9  ;;  %v393_v50 = vrot.slane %v172_v29, 5  ;;  %1356 = vst [vmem:[#allocation2] sm:$0xf] %v1355_v36  ;;  %v171_v54 = vld [vmem:[#allocation2 + $0x10] sm:$0xf] }
  0x22   :  { %v184_v52 = vor.u32 %v183_v40, %v180_v39  ;;  %v195_v53 = vrot.slane %v194_v41, 4  ;;  %v1334_v55 = vrot.slane %v1332_v24, 7  ;;  %118 = vst [vmem:[#allocation2 + $0x14] sm:$0x1] %v117_v51  ;;  %v170_v58 = vld [vmem:[#allocation2 + $0xc] sm:$0xf]  ;;  %368 = vmatmul.bf16.vlgmr.msra.gmra.mxu1 %v5233_v26 }
  0x23   :  { %v391_v56 = vsel %vm5736_vm13, %v3895_v49, %v390_v23  ;;  %v394_v57 = vsel %vm5736_vm13, %v392_v38, %v393_v50  ;;  %v211_v59 = vshll.u32 %v171_v54, 16  ;;  %v215_v60 = vshrl.u32 %v171_v54, 16  ;;  %v4198_v1 = vld [vmem:[%s7289_s0 + $0x1c] sm:$0xf]  ;;  %v1361_v6 = vld [vmem:[#allocation2 + $0xc] sm:$0xf] }
  0x24   :  { %v185_v61 = vrot.slane %v184_v52, 4  ;;  %v200_v62 = vsel %vm5742_vm14, %v195_v53, %v199_v48  ;;  %v402_v63 = vunpack.c.l.b16 %v391_v56  ;;  %v403_v0 = vunpack.c.l.b16 %v394_v57  ;;  %v380_v12 = vld [vmem:[#allocation2 + $0xc] sm:$0xe]  ;;  %v4059_v56 = vld [vmem:[%s7292_s3 + $0x70] sm:$0xf] }
  0x25   :  { %v226_v2 = vunpack.c.l.b16 %v200_v62  ;;  %v202_v3 = vshrl.u32 %v170_v58, 16  ;;  %v205_v4 = vshll.u32 %v170_v58, 16  ;;  %v213_v5 = vrot.slane %v211_v59, 5  ;;  %v5250_v57 = vld [vmem:[%s7292_s3 + $0x74] sm:$0xf0] }
  0x26   :  { %v190_v7 = vsel %vm5742_vm14, %v185_v61, %v189_v33  ;;  %v406_v8 = vpack.c.b16 %v403_v0, %v402_v63  ;;  %v217_v9 = vrot.slane %v215_v60, 4  ;;  %v1337_v10 = vor.u32 %v1335_v28, %v1334_v55  ;;  %v5249_v58 = vld [vmem:[%s7292_s3 + $0x74] sm:$0xf]  ;;  %v4061_v60 = vld [vmem:[%s7292_s3 + $0x78] sm:$0xf0] }
  0x27   :  { %v225_v13 = vunpack.c.l.b16 %v190_v7  ;;  %v204_v14 = vrot.slane %v202_v3, 4  ;;  %v207_v16 = vrot.slane %v205_v4, 5  ;;  %v1340_v18 = vshrl.u32 %v4198_v1, 16  ;;  %v4051_v62 = vld [vmem:[%s7292_s3 + $0x60] sm:$0xf] }
  0x28   :  { %466 = vmatmul.bf16.vlgmr.msra.gmra.mxu2 %v406_v8  ;;  %v218_v17 = vor.u32 %v217_v9, %v213_v5  ;;  %v1343_v19 = vshll.u32 %v4198_v1, 16  ;;  %v1362_v20 = vsel %vm5667_vm8, %v1337_v10, %v1361_v6  ;;  %v3896_v23 = vrot.slane %v380_v12, 9  ;;  %v5248_v63 = vld [vmem:[%s7292_s3 + $0x64] sm:$0xf0]  ;;  %v5247_v0 = vld [vmem:[%s7292_s3 + $0x64] sm:$0xf] }
  0x29   :  { %v229_v21 = vpack.c.b16 %v226_v2, %v225_v13  ;;  %v208_v22 = vor.u32 %v207_v16, %v204_v14  ;;  %v397_v24 = vrot.slane %v171_v54, 5  ;;  %1363 = vst [vmem:[#allocation2 + $0xc] sm:$0xf] %v1362_v20  ;;  %v173_v25 = vld [vmem:[#allocation2 + $0x14] sm:$0x1]  ;;  %v1338_v26 = vrot.slane %v1334_v55, 4 }
  0x2a   :  { %v1342_v27 = vrot.slane %v1340_v18, 7  ;;  %v219_v28 = vrot.slane %v218_v17, 4  ;;  %v221_v29 = vshll.u32 %v173_v25, 16  ;;  %v1365_v30 = vld [vmem:[#allocation2 + $0x14] sm:$0x1]  ;;  %v400_v36 = vrot.slane %v173_v25, 5 }
  0x2b   :  { %289 = vmatmul.bf16.vlgmr.msra.gmra.mxu0 %v229_v21  ;;  %v399_v31 = vrot.slane %v397_v24, 4  ;;  %v209_v33 = vrot.slane %v208_v22, 4  ;;  %v398_v38 = vsel %vm5736_vm13, %v3896_v23, %v397_v24  ;;  %v45_v54 = vld [vmem:[#allocation3] sm:$0x1]  ;;  %v4060_v59 = vor.u32 %v5250_v57, %v4059_v56  ;;  %v4053_v2 = vld [vmem:[%s7292_s3 + $0x68] sm:$0xf0] }
  0x2c   :  { %v1345_v34 = vor.u32 %v1343_v19, %v1342_v27  ;;  %v1347_v35 = vrot.slane %v1342_v27, 4  ;;  %v223_v37 = vrot.slane %v221_v29, 5  ;;  %v404_v48 = vunpack.c.l.b16 %v398_v38  ;;  %v4043_v4 = vld [vmem:[%s7292_s3 + $0x50] sm:$0xf]  ;;  %v5245_v6 = vld [vmem:[%s7292_s3 + $0x54] sm:$0xf] }
  0x2d   :  { %v401_v42 = vsel %vm5736_vm13, %v399_v31, %v400_v36  ;;  %v214_v44 = vsel %vm5742_vm14, %v209_v33, %v213_v5  ;;  %v46_v55 = vsel %vm5612_vm3, 0, %v45_v54  ;;  %v4064_v61 = vor.u32 %v5249_v58, %v4061_v60  ;;  %871 = vmatpush.bf16.msrb.mxu1 %v4060_v59  ;;  %v5246_v5 = vld [vmem:[%s7292_s3 + $0x54] sm:$0xf0]  ;;  %v4045_v8 = vld [vmem:[%s7292_s3 + $0x58] sm:$0xf0] }
  0x2e   :  { %v1346_v40 = vsel %vm5655_vm7, %v1338_v26, %v1345_v34  ;;  %v1366_v41 = vsel %vm5612_vm3, %v1347_v35, %v1365_v30  ;;  %v224_v46 = vsel %vm5742_vm14, %v219_v28, %v223_v37  ;;  %v405_v49 = vunpack.c.l.b16 %v401_v42  ;;  %47 = vst [vmem:[#allocation3] sm:$0x1] %v46_v55  ;;  %v3987_v10 = vld [vmem:[%s7292_s3 + $0xf0] sm:$0xf]  ;;  %v5266_v12 = vld [vmem:[%s7292_s3 + $0xf4] sm:$0xf0] }
  0x2f   :  { %1367 = vst [vmem:[#allocation2 + $0x14] sm:$0x1] %v1366_v41  ;;  %v227_v50 = vunpack.c.l.b16 %v214_v44  ;;  %v228_v51 = vunpack.c.l.b16 %v224_v46  ;;  %890 = vmatpush.bf16.msrb.mxu2 %v4064_v61  ;;  %v4052_v1 = vor.u32 %v5248_v63, %v4051_v62  ;;  %v4056_v3 = vor.u32 %v5247_v0, %v4053_v2  ;;  %v5265_v13 = vld [vmem:[%s7292_s3 + $0xf4] sm:$0xf]  ;;  %v3989_v16 = vld [vmem:[%s7292_s3 + $0xf8] sm:$0xf0] }
  0x30   :  { %v5234_v39 = vld [vmem:[#allocation2 + $0xc] sm:$0xff]  ;;  %v407_v52 = vpack.c.b16 %v405_v49, %v404_v48  ;;  %v4044_v7 = vor.u32 %v5246_v5, %v4043_v4  ;;  %v4048_v9 = vor.u32 %v5245_v6, %v4045_v8  ;;  %v3988_v14 = vor.u32 %v5266_v12, %v3987_v10  ;;  %v4035_v17 = vld [vmem:[%s7292_s3 + $0x40] sm:$0xf]  ;;  %v5244_v18 = vld [vmem:[%s7292_s3 + $0x44] sm:$0xf0] }
  0x31   :  { %1364 = vst [vmem:[#allocation2 + $0x10] sm:$0xf] %v1346_v40  ;;  %v230_v53 = vpack.c.b16 %v228_v51, %v227_v50  ;;  %872 = vmatpush.bf16.msrb.mxu1 %v4052_v1  ;;  %v51_v19 = vld [vmem:[#allocation3 + $0x8] sm:$0x1]  ;;  %v3992_v20 = vor.u32 %v5265_v13, %v3989_v16  ;;  %v4036_v21 = vor.u32 %v5244_v18, %v4035_v17  ;;  %v5243_v22 = vld [vmem:[%s7292_s3 + $0x44] sm:$0xf] }
  0x32   :  { %373 = vmatmul.bf16.gmra.mxu1 %v5234_v39  ;;  %v4037_v23 = vld [vmem:[%s7292_s3 + $0x48] sm:$0xf0]  ;;  %v52_v24 = vsel %vm5620_vm5, 0, %v51_v19  ;;  %741 = vmatpush.bf16.msra.mxu3 %v3988_v14  ;;  %v3979_v26 = vld [vmem:[%s7292_s3 + $0xe0] sm:$0xf] }
  0x33   :  { %891 = vmatpush.bf16.msrb.mxu2 %v4056_v3  ;;  %v4040_v25 = vor.u32 %v5243_v22, %v4037_v23  ;;  %53 = vst [vmem:[#allocation3 + $0x8] sm:$0x1] %v52_v24  ;;  %760 = vmatpush.bf16.msrb.mxu0 %v3992_v20  ;;  %v5264_v27 = vld [vmem:[%s7292_s3 + $0xe4] sm:$0xf0]  ;;  %v5263_v29 = vld [vmem:[%s7292_s3 + $0xe4] sm:$0xf] }
  0x34   :  { %v3980_v28 = vor.u32 %v5264_v27, %v3979_v26  ;;  %v3981_v30 = vld [vmem:[%s7292_s3 + $0xe8] sm:$0xf0]  ;;  %v4027_v31 = vld [vmem:[%s7292_s3 + $0x30] sm:$0xf]  ;;  %v5242_v34 = vld [vmem:[%s7292_s3 + $0x34] sm:$0xf0] }
  0x35   :  { %873 = vmatpush.bf16.msrb.mxu1 %v4044_v7  ;;  %v3984_v33 = vor.u32 %v5263_v29, %v3981_v30  ;;  %v5241_v35 = vld [vmem:[%s7292_s3 + $0x34] sm:$0xf]  ;;  %v4029_v36 = vld [vmem:[%s7292_s3 + $0x38] sm:$0xf0]  ;;  %v4028_v37 = vor.u32 %v5242_v34, %v4027_v31  ;;  %v3971_v40 = vld [vmem:[%s7292_s3 + $0xd0] sm:$0xf] }
  0x36   :  { %742 = vmatpush.bf16.msra.mxu3 %v3980_v28  ;;  %v4032_v38 = vor.u32 %v5241_v35, %v4029_v36  ;;  %v5262_v41 = vld [vmem:[%s7292_s3 + $0xd4] sm:$0xf0]  ;;  %v5261_v42 = vld [vmem:[%s7292_s3 + $0xd4] sm:$0xf]  ;;  %v3973_v46 = vld [vmem:[%s7292_s3 + $0xd8] sm:$0xf0] }
  0x37   :  { %892 = vmatpush.bf16.msrb.mxu2 %v4048_v9  ;;  %761 = vmatpush.bf16.msrb.mxu0 %v3984_v33  ;;  %v3972_v44 = vor.u32 %v5262_v41, %v3971_v40  ;;  %v4019_v48 = vld [vmem:[%s7292_s3 + $0x20] sm:$0xf]  ;;  %v5240_v49 = vld [vmem:[%s7292_s3 + $0x24] sm:$0xf0]  ;;  %v48_v50 = vld [vmem:[#allocation3 + $0xc] sm:$0x1]  ;;  %v3976_v51 = vor.u32 %v5261_v42, %v3973_v46 }
  0x38   :  { %471 = vmatmul.bf16.gmra.mxu2 %v407_v52  ;;  %v4020_v52 = vor.u32 %v5240_v49, %v4019_v48  ;;  %v4021_v54 = vld [vmem:[%s7292_s3 + $0x28] sm:$0xf0]  ;;  %v49_v55 = vsel %vm5612_vm3, 0, %v48_v50  ;;  %v3963_v57 = vld [vmem:[%s7292_s3 + $0xc0] sm:$0xf] }
  0x39   :  { %874 = vmatpush.bf16.msrb.mxu1 %v4036_v21  ;;  %50 = vst [vmem:[#allocation3 + $0xc] sm:$0x1] %v49_v55  ;;  %v5260_v58 = vld [vmem:[%s7292_s3 + $0xc4] sm:$0xf0]  ;;  %v5259_v60 = vld [vmem:[%s7292_s3 + $0xc4] sm:$0xf] }
  0x3a   :  { %743 = vmatpush.bf16.msra.mxu3 %v3972_v44  ;;  %v3964_v59 = vor.u32 %v5260_v58, %v3963_v57  ;;  %v3965_v61 = vld [vmem:[%s7292_s3 + $0xc8] sm:$0xf0]  ;;  %v4011_v62 = vld [vmem:[%s7292_s3 + $0x10] sm:$0xf]  ;;  %v5238_v0 = vld [vmem:[%s7292_s3 + $0x14] sm:$0xf0] }
  0x3b   :  { %294 = vmatmul.bf16.gmra.mxu0 %v230_v53  ;;  %893 = vmatpush.bf16.msrb.mxu2 %v4040_v25  ;;  %v5239_v53 = vld [vmem:[%s7292_s3 + $0x24] sm:$0xf]  ;;  %v3968_v63 = vor.u32 %v5259_v60, %v3965_v61  ;;  %v5237_v1 = vld [vmem:[%s7292_s3 + $0x14] sm:$0xf]  ;;  %v4013_v2 = vld [vmem:[%s7292_s3 + $0x18] sm:$0xf0]  ;;  %v4012_v5 = vor.u32 %v5238_v0, %v4011_v62 }
  0x3c   :  { %v4024_v56 = vor.u32 %v5239_v53, %v4021_v54  ;;  %762 = vmatpush.bf16.msrb.mxu0 %v3976_v51  ;;  %v5914_v4 = vld [vmem:[%s7291_s2] ss:$0 sm:$0xff]  ;;  %v4016_v6 = vor.u32 %v5237_v1, %v4013_v2  ;;  %v3955_v8 = vld [vmem:[%s7292_s3 + $0xb0] sm:$0xf]  ;;  %v5258_v9 = vld [vmem:[%s7292_s3 + $0xb4] sm:$0xf0] }
  0x3d   :  { %875 = vmatpush.bf16.msrb.mxu1 %v4028_v37  ;;  %v5257_v10 = vld [vmem:[%s7292_s3 + $0xb4] sm:$0xf]  ;;  %v3956_v12 = vor.u32 %v5258_v9, %v3955_v8  ;;  %v3957_v13 = vld [vmem:[%s7292_s3 + $0xb8] sm:$0xf0]  ;;  %v4003_v14 = vld [vmem:[%s7292_s3] sm:$0xf] }
  0x3e   :  { %744 = vmatpush.bf16.msra.mxu3 %v3964_v59  ;;  %v5236_v16 = vld [vmem:[%s7292_s3 + $0x4] sm:$0xf0]  ;;  %v54_v19 = vld [vmem:[#allocation3 + $0x14] sm:$0x1]  ;;  %v3960_v20 = vor.u32 %v5257_v10, %v3957_v13  ;;  %v5235_v22 = vld [vmem:[%s7292_s3 + $0x4] sm:$0xf] }
  0x3f   :  { %894 = vmatpush.bf16.msrb.mxu2 %v4032_v38  ;;  %v4004_v21 = vor.u32 %v5236_v16, %v4003_v14  ;;  %v4005_v23 = vld [vmem:[%s7292_s3 + $0x8] sm:$0xf0]  ;;  %v55_v25 = vsel %vm5620_vm5, 0, %v54_v19  ;;  %v3947_v27 = vld [vmem:[%s7292_s3 + $0xa0] sm:$0xf] }
  0x40   :  { %763 = vmatpush.bf16.msrb.mxu0 %v3968_v63  ;;  %v4008_v26 = vor.u32 %v5235_v22, %v4005_v23  ;;  %56 = vst [vmem:[#allocation3 + $0x14] sm:$0x1] %v55_v25  ;;  %v5256_v28 = vld [vmem:[%s7292_s3 + $0xa4] sm:$0xf0]  ;;  %v5255_v15 = vld [vmem:[%s7292_s3 + $0xa4] sm:$0xf] }
  0x41   :  { %876 = vmatpush.bf16.msrb.mxu1 %v4020_v52  ;;  %v3948_v30 = vor.u32 %v5256_v28, %v3947_v27  ;;  %v3949_v31 = vld [vmem:[%s7292_s3 + $0xa8] sm:$0xf0]  ;;  %v3939_v36 = vld [vmem:[%s7292_s3 + $0x90] sm:$0xf]  ;;  %v5254_v37 = vld [vmem:[%s7292_s3 + $0x94] sm:$0xf0] }
  0x42   :  { %745 = vmatpush.bf16.msra.mxu3 %v3956_v12  ;;  %v3952_v33 = vor.u32 %v5255_v15, %v3949_v31  ;;  %v5253_v38 = vld [vmem:[%s7292_s3 + $0x94] sm:$0xf]  ;;  %v3940_v41 = vor.u32 %v5254_v37, %v3939_v36  ;;  %v3941_v42 = vld [vmem:[%s7292_s3 + $0x98] sm:$0xf0]  ;;  %v3931_v51 = vld [vmem:[%s7292_s3 + $0x80] sm:$0xf] }
  0x43   :  { %895 = vmatpush.bf16.msrb.mxu2 %v4024_v56  ;;  %v3944_v46 = vor.u32 %v5253_v38, %v3941_v42  ;;  %v5252_v53 = vld [vmem:[%s7292_s3 + $0x84] sm:$0xf0]  ;;  %v5251_v54 = vld [vmem:[%s7292_s3 + $0x84] sm:$0xf]  ;;  %v3933_v55 = vld [vmem:[%s7292_s3 + $0x88] sm:$0xf0] }
  0x44   :  { %764 = vmatpush.bf16.msrb.mxu0 %v3960_v20  ;;  %v3932_v58 = vor.u32 %v5252_v53, %v3931_v51  ;;  %v3936_v59 = vor.u32 %v5251_v54, %v3933_v55  ;;  %v536_v60 = vld [vmem:[#allocation3] sm:$0xf]  ;;  %v4125_v0 = vld [vmem:[%s7292_s3 + $0x170] sm:$0xf]  ;;  %v5280_v12 = vld [vmem:[%s7292_s3 + $0x164] sm:$0xf0] }
  0x45   :  { %877 = vmatpush.bf16.msrb.mxu1 %v4012_v5  ;;  %v5282_v1 = vld [vmem:[%s7292_s3 + $0x174] sm:$0xf0]  ;;  %v5281_v5 = vld [vmem:[%s7292_s3 + $0x174] sm:$0xf]  ;;  %v4119_v19 = vld [vmem:[%s7292_s3 + $0x168] sm:$0xf0] }
  0x46   :  { %746 = vmatpush.bf16.msra.mxu3 %v3948_v30  ;;  %v5278_v22 = vld [vmem:[%s7292_s3 + $0x154] sm:$0xf0]  ;;  %v5277_v23 = vld [vmem:[%s7292_s3 + $0x154] sm:$0xf]  ;;  %v4111_v27 = vld [vmem:[%s7292_s3 + $0x158] sm:$0xf0] }
  0x47   :  { %896 = vmatpush.bf16.msrb.mxu2 %v4016_v6  ;;  %v4127_v6 = vld [vmem:[%s7292_s3 + $0x178] sm:$0xf0]  ;;  %v4114_v36 = vor.u32 %v5277_v23, %v4111_v27  ;;  %v4101_v37 = vld [vmem:[%s7292_s3 + $0x140] sm:$0xf]  ;;  %v5276_v38 = vld [vmem:[%s7292_s3 + $0x144] sm:$0xf0] }
  0x48   :  { %765 = vmatpush.bf16.msrb.mxu0 %v3952_v33  ;;  %v4130_v10 = vor.u32 %v5281_v5, %v4127_v6  ;;  %v5452_v11 = vld [vmem:[%s7292_s3 + $0x404] sm:$0xf0] }
  0x49   :  { %878 = vmatpush.bf16.msrb.mxu1 %v4004_v21  ;;  %v4109_v21 = vld [vmem:[%s7292_s3 + $0x150] sm:$0xf] }
  0x4a   :  { %747 = vmatpush.bf16.msra.mxu3 %v3940_v41  ;;  %v4110_v15 = vor.u32 %v5278_v22, %v4109_v21 }
  0x4b   :  { %897 = vmatpush.bf16.msrb.mxu2 %v4008_v26 }
  0x4c   :  { %766 = vmatpush.bf16.msrb.mxu0 %v3944_v46 }
  0x4e   :  { %748 = vmatpush.bf16.msra.mxu3 %v3932_v58 }
  0x50   :  { %767 = vmatpush.bf16.msrb.mxu0 %v3936_v59  ;;  %v543_v59 = vld [vmem:[#allocation3 + $0xc] sm:$0xf] }
  0x54   :  { %1036 = vmatpush.bf16.msra.mxu0 %v4130_v10  ;;  %v4085_v10 = vld [vmem:[%s7292_s3 + $0x120] sm:$0xf] }
  0x9f   :  { %v369_v39 = vpop.f32.mrf.mxu1 }
  0xa7   :  { %v371_v18 = vpop.f32.mrf.mxu1 }
  0xa8   :  { %v290_v3 = vpop.f32.mrf.mxu0 }
  0xa9   :  { %v370_v7 = vadd.f32 %v369_v39, %v290_v3  ;;  %v4126_v3 = vor.u32 %v5282_v1, %v4125_v0  ;;  %v4093_v0 = vld [vmem:[%s7292_s3 + $0x130] sm:$0xf]  ;;  %v5274_v1 = vld [vmem:[%s7292_s3 + $0x134] sm:$0xf0] }
  0xab   :  { %v467_v17 = vpop.f32.mrf.mxu2  ;;  %1017 = vmatpush.bf16.msrb.mxu3 %v4126_v3  ;;  %v4095_v3 = vld [vmem:[%s7292_s3 + $0x138] sm:$0xf0] }
  0xac   :  { %v477_v24 = vadd.f32 %v467_v17, %v370_v7  ;;  %v4117_v7 = vld [vmem:[%s7292_s3 + $0x160] sm:$0xf] }
  0xad   :  { %v4118_v14 = vor.u32 %v5280_v12, %v4117_v7 }
  0xae   :  { %v484_v29 = vadd.f32 %v5914_v4, %v477_v24 }
  0xaf   :  { %v374_v52 = vpop.f32.mrf.mxu1  ;;  %1018 = vmatpush.bf16.msrb.mxu3 %v4118_v14 }
  0xb0   :  { %v488_v34 = vmax.f32 %v484_v29, 0.0  ;;  %v292_v35 = vpop.f32.mrf.mxu0  ;;  %v540_v29 = vld [vmem:[#allocation3 + $0x8] sm:$0x1] }
  0xb1   :  { %v372_v40 = vadd.f32 %v371_v18, %v292_v35  ;;  %v5279_v18 = vld [vmem:[%s7292_s3 + $0x164] sm:$0xf] }
  0xb2   :  { %v492_v39 = vpack.c.bf16 %v488_v34, %v488_v34  ;;  %v4122_v20 = vor.u32 %v5279_v18, %v4119_v19  ;;  %v5272_v19 = vld [vmem:[%s7292_s3 + $0x124] sm:$0xf0] }
  0xb3   :  { %v469_v44 = vpop.f32.mrf.mxu2  ;;  %1019 = vmatpush.bf16.msrb.mxu3 %v4110_v15  ;;  %v4086_v23 = vor.u32 %v5272_v19, %v4085_v10 }
  0xb4   :  { %v497_v48 = vshrl.u32 %v492_v39, 16  ;;  %v500_v49 = vshll.u32 %v492_v39, 16  ;;  %v478_v50 = vadd.f32 %v469_v44, %v372_v40  ;;  %1037 = vmatpush.bf16.msra.mxu0 %v4122_v20  ;;  %v5275_v39 = vld [vmem:[%s7292_s3 + $0x144] sm:$0xf]  ;;  %v4103_v40 = vld [vmem:[%s7292_s3 + $0x148] sm:$0xf0] }
  0xb5   :  { %v4106_v55 = vor.u32 %v5275_v39, %v4103_v40  ;;  %v547_v20 = vld [vmem:[#allocation3 + $0x14] sm:$0x1]  ;;  %v4069_v39 = vld [vmem:[%s7292_s3 + $0x100] sm:$0xf]  ;;  %v5268_v40 = vld [vmem:[%s7292_s3 + $0x104] sm:$0xf0] }
  0xb6   :  { %v499_v56 = vrot.slane %v497_v48, 7  ;;  %v485_v57 = vadd.f32 %v5914_v4, %v478_v50 }
  0xb7   :  { %v376_v30 = vpop.f32.mrf.mxu1 }
  0xb8   :  { %v502_v61 = vor.u32 %v500_v49, %v499_v56  ;;  %v489_v62 = vmax.f32 %v485_v57, 0.0  ;;  %v295_v63 = vpop.f32.mrf.mxu0  ;;  %v503_v28 = vrot.slane %v499_v56, 4  ;;  %1038 = vmatpush.bf16.msra.mxu0 %v4114_v36 }
  0xb9   :  { %v375_v2 = vadd.f32 %v374_v52, %v295_v63  ;;  %v4102_v52 = vor.u32 %v5276_v38, %v4101_v37 }
  0xba   :  { %v537_v8 = vsel %vm5667_vm8, %v502_v61, %v536_v60  ;;  %v493_v9 = vpack.c.bf16 %v489_v62, %v489_v62 }
  0xbb   :  { %538 = vst [vmem:[#allocation3] sm:$0xf] %v537_v8  ;;  %v472_v13 = vpop.f32.mrf.mxu2  ;;  %1020 = vmatpush.bf16.msrb.mxu3 %v4102_v52  ;;  %v4071_v52 = vld [vmem:[%s7292_s3 + $0x108] sm:$0xf0] }
  0xbc   :  { %v505_v16 = vshrl.u32 %v493_v9, 16  ;;  %v479_v17 = vadd.f32 %v472_v13, %v375_v2  ;;  %v508_v25 = vshll.u32 %v493_v9, 16  ;;  %1039 = vmatpush.bf16.msra.mxu0 %v4106_v55  ;;  %v4094_v2 = vor.u32 %v5274_v1, %v4093_v0 }
  0xbe   :  { %v507_v24 = vrot.slane %v505_v16, 7  ;;  %v486_v26 = vadd.f32 %v5914_v4, %v479_v17 }
  0xbf   :  { %1021 = vmatpush.bf16.msrb.mxu3 %v4094_v2 }
  0xc0   :  { %v510_v31 = vor.u32 %v508_v25, %v507_v24  ;;  %v512_v33 = vrot.slane %v507_v24, 4  ;;  %v490_v34 = vmax.f32 %v486_v26, 0.0  ;;  %v297_v35 = vpop.f32.mrf.mxu0  ;;  %v5271_v24 = vld [vmem:[%s7292_s3 + $0x124] sm:$0xf]  ;;  %v4087_v25 = vld [vmem:[%s7292_s3 + $0x128] sm:$0xf0] }
  0xc1   :  { %v377_v46 = vadd.f32 %v376_v30, %v297_v35  ;;  %v5270_v30 = vld [vmem:[%s7292_s3 + $0x114] sm:$0xf0]  ;;  %v4079_v35 = vld [vmem:[%s7292_s3 + $0x118] sm:$0xf0] }
  0xc2   :  { %v511_v41 = vsel %vm5655_vm7, %v503_v28, %v510_v31  ;;  %v541_v42 = vsel %vm5612_vm3, %v512_v33, %v540_v29  ;;  %v494_v44 = vpack.c.bf16 %v490_v34, %v490_v34  ;;  %v599_v48 = vld [vmem:[#allocation3] sm:$0xf]  ;;  %v4090_v28 = vor.u32 %v5271_v24, %v4087_v25  ;;  %v4077_v29 = vld [vmem:[%s7292_s3 + $0x110] sm:$0xf]  ;;  %v5269_v34 = vld [vmem:[%s7292_s3 + $0x114] sm:$0xf] }
  0xc3   :  { %539 = vst [vmem:[#allocation3 + $0x4] sm:$0xf] %v511_v41  ;;  %v474_v49 = vpop.f32.mrf.mxu2  ;;  %v606_v50 = vshrl.u32 %v599_v48, 16  ;;  %v609_v51 = vshll.u32 %v599_v48, 16  ;;  %1022 = vmatpush.bf16.msrb.mxu3 %v4086_v23  ;;  %v4078_v33 = vor.u32 %v5270_v30, %v4077_v29  ;;  %v909_v23 = vld [vmem:[#allocation3] sm:$0xe] }
  0xc4   :  { %542 = vst [vmem:[#allocation3 + $0x8] sm:$0x1] %v541_v42  ;;  %v514_v53 = vshrl.u32 %v494_v44, 16  ;;  %v480_v54 = vadd.f32 %v474_v49, %v377_v46  ;;  %v517_v57 = vshll.u32 %v494_v44, 16  ;;  %v4082_v46 = vor.u32 %v5269_v34, %v4079_v35 }
  0xc5   :  { %v608_v60 = vrot.slane %v606_v50, 4  ;;  %v611_v61 = vrot.slane %v609_v51, 5  ;;  %v5267_v51 = vld [vmem:[%s7292_s3 + $0x104] sm:$0xf]  ;;  %v4065_v25 = vrot.slane %v909_v23, 9 }
  0xc6   :  { %v516_v56 = vrot.slane %v514_v53, 7  ;;  %v487_v58 = vadd.f32 %v5914_v4, %v480_v54  ;;  %v5273_v4 = vld [vmem:[%s7292_s3 + $0x134] sm:$0xf] }
  0xc7   :  { %v4098_v9 = vor.u32 %v5273_v4, %v4095_v3  ;;  %v612_v13 = vor.u32 %v611_v61, %v608_v60  ;;  %1023 = vmatpush.bf16.msrb.mxu3 %v4078_v33 }
  0xc8   :  { %v519_v62 = vor.u32 %v517_v57, %v516_v56  ;;  %v491_v63 = vmax.f32 %v487_v58, 0.0  ;;  %v520_v36 = vrot.slane %v516_v56, 4  ;;  %v4070_v56 = vor.u32 %v5268_v40, %v4069_v39  ;;  %v5300_v39 = vld [vmem:[%s7294_s5 + $0x78] sm:$0xff]  ;;  %v5299_v40 = vld [vmem:[%s7294_s5 + $0x70] sm:$0xff] }
  0xc9   :  { %1040 = vmatpush.bf16.msra.mxu0 %v4098_v9  ;;  %v613_v15 = vrot.slane %v612_v13, 4  ;;  %1235 = vmatpush.bf16.msra.mxu2 %v5300_v39 }
  0xca   :  { %v544_v5 = vsel %vm5667_vm8, %v519_v62, %v543_v59  ;;  %v495_v6 = vpack.c.bf16 %v491_v63, %v491_v63  ;;  %v5283_v7 = vld [vmem:[#allocation3] sm:$0xff]  ;;  %v4074_v59 = vor.u32 %v5267_v51, %v4071_v52  ;;  %v5289_v51 = vld [vmem:[%s7294_s5 + $0x20] sm:$0xff] }
  0xcb   :  { %v6050_v8 = vld [vmem:[#allocation3 + $0x4] sm:$0xf]  ;;  %545 = vst [vmem:[#allocation3 + $0xc] sm:$0xf] %v544_v5  ;;  %v6055_v12 = vld [vmem:[#allocation3 + $0x8] sm:$0x1]  ;;  %879 = vmatmul.bf16.vlgmr.msrb.gmra.mxu1 %v5283_v7  ;;  %898 = vmatmul.bf16.vlgmr.msrb.gmra.mxu2 %v5283_v7 }
  0xcc   :  { %v615_v14 = vshll.u32 %v6050_v8, 16  ;;  %v619_v16 = vshrl.u32 %v6050_v8, 16  ;;  %v522_v17 = vshrl.u32 %v495_v6, 16  ;;  %v625_v18 = vshll.u32 %v6055_v12, 16  ;;  %1024 = vmatpush.bf16.msrb.mxu3 %v4070_v56  ;;  %v5316_v56 = vld [vmem:[%s7290_s1 + $0x138] sm:$0xff] }
  0xcd   :  { %v525_v27 = vshll.u32 %v495_v6, 16  ;;  %1041 = vmatpush.bf16.msra.mxu0 %v4090_v28  ;;  %v920_v24 = vrot.slane %v6055_v12, 5  ;;  %1236 = vmatpush.bf16.msra.mxu2 %v5299_v40 }
  0xce   :  { %v617_v21 = vrot.slane %v615_v14, 5  ;;  %v621_v22 = vrot.slane %v619_v16, 4  ;;  %v524_v26 = vrot.slane %v522_v17, 7  ;;  %v627_v44 = vrot.slane %v625_v18, 5 }
  0xd0   :  { %v622_v31 = vor.u32 %v621_v22, %v617_v21  ;;  %v527_v37 = vor.u32 %v525_v27, %v524_v26  ;;  %v529_v38 = vrot.slane %v524_v26, 4  ;;  %v618_v41 = vsel %vm5742_vm14, %v613_v15, %v617_v21 }
  0xd1   :  { %v653_v57 = vunpack.c.l.b16 %v618_v41  ;;  %1042 = vmatpush.bf16.msra.mxu0 %v4082_v46  ;;  %v917_v21 = vrot.slane %v6050_v8, 5  ;;  %v5292_v41 = vld [vmem:[%s7294_s5 + $0x38] sm:$0xff]  ;;  %v5297_v46 = vld [vmem:[%s7294_s5 + $0x60] sm:$0xff] }
  0xd2   :  { %v623_v42 = vrot.slane %v622_v31, 4  ;;  %v528_v48 = vsel %vm5655_vm7, %v520_v36, %v527_v37  ;;  %v548_v49 = vsel %vm5612_vm3, %v529_v38, %v547_v20  ;;  %v601_v50 = vld [vmem:[#allocation3 + $0xc] sm:$0xf]  ;;  %1216 = vmatpush.bf16.msra.mxu1 %v5292_v41 }
  0xd3   :  { %546 = vst [vmem:[#allocation3 + $0x10] sm:$0xf] %v528_v48  ;;  %v630_v54 = vshrl.u32 %v601_v50, 16  ;;  %v633_v55 = vshll.u32 %v601_v50, 16  ;;  %v919_v22 = vrot.slane %v917_v21, 4  ;;  %v918_v27 = vsel %vm5736_vm13, %v4065_v25, %v917_v21  ;;  %v5290_v48 = vld [vmem:[%s7294_s5 + $0x28] sm:$0xff] }
  0xd4   :  { %v628_v53 = vsel %vm5742_vm14, %v623_v42, %v627_v44  ;;  %549 = vst [vmem:[#allocation3 + $0x14] sm:$0x1] %v548_v49  ;;  %v929_v29 = vunpack.c.l.b16 %v918_v27  ;;  %v910_v31 = vld [vmem:[#allocation3 + $0xc] sm:$0xe]  ;;  %v5298_v42 = vld [vmem:[%s7294_s5 + $0x68] sm:$0xff]  ;;  %v5291_v44 = vld [vmem:[%s7294_s5 + $0x30] sm:$0xff] }
  0xd5   :  { %v654_v58 = vunpack.c.l.b16 %v628_v53  ;;  %v632_v61 = vrot.slane %v630_v54, 4  ;;  %v635_v62 = vrot.slane %v633_v55, 5  ;;  %1043 = vmatpush.bf16.msra.mxu0 %v4074_v59  ;;  %v921_v26 = vsel %vm5736_vm13, %v919_v22, %v920_v24  ;;  %1237 = vmatpush.bf16.msra.mxu2 %v5298_v42  ;;  %v5296_v50 = vld [vmem:[%s7294_s5 + $0x58] sm:$0xff]  ;;  %v5295_v54 = vld [vmem:[%s7294_s5 + $0x50] sm:$0xff]  ;;  %v6213_v21 = vld [vmem:[#allocation2 + $0x4] sm:$0xf] }
  0xd6   :  { %v930_v28 = vunpack.c.l.b16 %v921_v26  ;;  %v4066_v34 = vrot.slane %v910_v31, 9  ;;  %1217 = vmatpush.bf16.msra.mxu1 %v5291_v44  ;;  %v5288_v55 = vld [vmem:[%s7294_s5 + $0x18] sm:$0xff]  ;;  %v5287_v59 = vld [vmem:[%s7294_s5 + $0x10] sm:$0xff]  ;;  %v598_v22 = vld [vmem:[%s7293_s4] sm:$0x3]  ;;  %v1435_v26 = vshll.u32 %v6213_v21, 16 }
  0xd7   :  { %v657_v60 = vpack.c.b16 %v654_v58, %v653_v57  ;;  %v636_v2 = vor.u32 %v635_v62, %v632_v61  ;;  %v5294_v58 = vld [vmem:[%s7294_s5 + $0x48] sm:$0xff]  ;;  %v5293_v62 = vld [vmem:[%s7294_s5 + $0x40] sm:$0xff]  ;;  %v1439_v27 = vshrl.u32 %v6213_v21, 16 }
  0xd8   :  { %v933_v30 = vpack.c.b16 %v930_v28, %v929_v29  ;;  %v5304_v29 = vld [vmem:[%s7290_s1 + $0xd8] sm:$0xff]  ;;  %v5321_v42 = vld [vmem:[%s7290_s1 + $0x160] sm:$0xff] }
  0xd9   :  { %749 = vmatmul.bf16.vlgmr.msra.gmra.mxu3 %v657_v60  ;;  %768 = vmatmul.bf16.vlgmr.msrb.gmra.mxu0 %v657_v60  ;;  %v637_v9 = vrot.slane %v636_v2, 4  ;;  %v5315_v60 = vld [vmem:[%s7290_s1 + $0x130] sm:$0xff] }
  0xda   :  { %v5284_v63 = vld [vmem:[#allocation3 + $0xc] sm:$0xff]  ;;  %1238 = vmatpush.bf16.msra.mxu2 %v5297_v46  ;;  %1218 = vmatpush.bf16.msra.mxu1 %v5290_v48  ;;  %v5307_v2 = vld [vmem:[%s7290_s1 + $0xf0] sm:$0xff]  ;;  %v6241_v48 = vperm.slane %v598_v22, 0 }
  0xdb   :  { %v602_v0 = vld [vmem:[#allocation3 + $0x10] sm:$0xf]  ;;  %v604_v1 = vld [vmem:[#allocation3 + $0x14] sm:$0x1]  ;;  %884 = vmatmul.bf16.gmra.mxu1 %v5284_v63  ;;  %903 = vmatmul.bf16.gmra.mxu2 %v5284_v63  ;;  %v5308_v63 = vld [vmem:[%s7290_s1 + $0xf8] sm:$0xff] }
  0xdc   :  { %v639_v4 = vshll.u32 %v602_v0, 16  ;;  %v643_v3 = vshrl.u32 %v602_v0, 16  ;;  %v649_v7 = vshll.u32 %v604_v1, 16  ;;  %v924_v15 = vrot.slane %v602_v0, 5  ;;  %1529 = vmatpush.bf16.msra.mxu3 %v5316_v56  ;;  %1608 = vmatpush.bf16.msrb.mxu0 %v5308_v63  ;;  %v5286_v0 = vld [vmem:[%s7294_s5 + $0x8] sm:$0xff] }
  0xdd   :  { %v927_v33 = vrot.slane %v604_v1, 5  ;;  %v5314_v1 = vld [vmem:[%s7290_s1 + $0x128] sm:$0xff] }
  0xde   :  { %v641_v5 = vrot.slane %v639_v4, 5  ;;  %v645_v6 = vrot.slane %v643_v3, 4  ;;  %v651_v16 = vrot.slane %v649_v7, 5  ;;  %v926_v8 = vrot.slane %v924_v15, 4  ;;  %1239 = vmatpush.bf16.msra.mxu2 %v5296_v50  ;;  %1219 = vmatpush.bf16.msra.mxu1 %v5289_v51  ;;  %v5285_v3 = vld [vmem:[%s7294_s5] sm:$0xff] }
  0xdf   :  { %v925_v35 = vsel %vm5736_vm13, %v4066_v34, %v924_v15  ;;  %v1437_v34 = vrot.slane %v1435_v26, 5 }
  0xe0   :  { %v646_v10 = vor.u32 %v645_v6, %v641_v5  ;;  %v642_v13 = vsel %vm5742_vm14, %v637_v9, %v641_v5  ;;  %v928_v12 = vsel %vm5736_vm13, %v926_v8, %v927_v33  ;;  %v931_v37 = vunpack.c.l.b16 %v925_v35  ;;  %1530 = vmatpush.bf16.msra.mxu3 %v5315_v60  ;;  %v5313_v5 = vld [vmem:[%s7290_s1 + $0x120] sm:$0xff]  ;;  %1609 = vmatpush.bf16.msrb.mxu0 %v5307_v2  ;;  %v5306_v9 = vld [vmem:[%s7290_s1 + $0xe8] sm:$0xff] }
  0xe1   :  { %v655_v18 = vunpack.c.l.b16 %v642_v13  ;;  %v932_v36 = vunpack.c.l.b16 %v928_v12  ;;  %v5312_v13 = vld [vmem:[%s7290_s1 + $0x118] sm:$0xff]  ;;  %v5310_v8 = vld [vmem:[%s7290_s1 + $0x108] sm:$0xff]  ;;  %v6229_v35 = vperm.slane %v598_v22, 1 }
  0xe2   :  { %v647_v14 = vrot.slane %v646_v10, 4  ;;  %1240 = vmatpush.bf16.msra.mxu2 %v5295_v54  ;;  %1220 = vmatpush.bf16.msra.mxu1 %v5288_v55  ;;  %v5324_v10 = vld [vmem:[%s7290_s1 + $0x178] sm:$0xff]  ;;  %v2606_v22 = vld [vmem:[#allocation2 + $0x8] sm:$0x1] }
  0xe3   :  { %v934_v38 = vpack.c.b16 %v932_v36, %v931_v37  ;;  %v6231_v36 = vld [vmem:[#allocation2 + $0x8] sm:$0x1]  ;;  %v1441_v37 = vrot.slane %v1439_v27, 4 }
  0xe4   :  { %v652_v17 = vsel %vm5742_vm14, %v647_v14, %v651_v16  ;;  %1531 = vmatpush.bf16.msra.mxu3 %v5314_v1  ;;  %1610 = vmatpush.bf16.msrb.mxu0 %v5306_v9  ;;  %v5305_v14 = vld [vmem:[%s7290_s1 + $0xe0] sm:$0xff]  ;;  %v5323_v16 = vld [vmem:[%s7290_s1 + $0x170] sm:$0xff]  ;;  %v1445_v40 = vshll.u32 %v6231_v36, 16 }
  0xe5   :  { %v656_v19 = vunpack.c.l.b16 %v652_v17  ;;  %v1442_v44 = vor.u32 %v1441_v37, %v1437_v34  ;;  %v4702_v9 = vld [vmem:[%s7289_s0 + $0x20] sm:$0xf] }
  0xe6   :  { %1241 = vmatpush.bf16.msra.mxu2 %v5294_v58  ;;  %1221 = vmatpush.bf16.msra.mxu1 %v5287_v59  ;;  %v1447_v51 = vrot.slane %v1445_v40, 5  ;;  %v4703_v58 = vld [vmem:[%s7289_s0 + $0x24] sm:$0xf] }
  0xe7   :  { %v658_v20 = vpack.c.b16 %v656_v19, %v655_v18  ;;  %v5311_v19 = vld [vmem:[%s7290_s1 + $0x110] sm:$0xff]  ;;  %v1443_v56 = vrot.slane %v1442_v44, 4  ;;  %v5325_v40 = vld [vmem:[#allocation2] sm:$0xff] }
  0xe8   :  { %1532 = vmatpush.bf16.msra.mxu3 %v5313_v5  ;;  %1611 = vmatpush.bf16.msrb.mxu0 %v5305_v14  ;;  %v2563_v14 = vshrl.u32 %v4702_v9, 16 }
  0xe9   :  { %754 = vmatmul.bf16.gmra.mxu3 %v658_v20  ;;  %773 = vmatmul.bf16.gmra.mxu0 %v658_v20  ;;  %v1419_v20 = vld [vmem:[#allocation2] sm:$0xf] }
  0xea   :  { %1242 = vmatpush.bf16.msra.mxu2 %v5293_v62  ;;  %1222 = vmatpush.bf16.msra.mxu1 %v5286_v0  ;;  %v1426_v24 = vshrl.u32 %v1419_v20, 16  ;;  %v1429_v25 = vshll.u32 %v1419_v20, 16  ;;  %v5302_v62 = vld [vmem:[%s7290_s1 + $0xc8] sm:$0xff]  ;;  %v2571_v0 = vshrl.u32 %v4703_v58, 16 }
  0xec   :  { %1533 = vmatpush.bf16.msra.mxu3 %v5312_v13  ;;  %v1428_v31 = vrot.slane %v1426_v24, 4  ;;  %v1431_v33 = vrot.slane %v1429_v25, 5  ;;  %1612 = vmatpush.bf16.msrb.mxu0 %v5304_v29  ;;  %v2573_v13 = vrot.slane %v2571_v0, 7  ;;  %v5319_v29 = vld [vmem:[%s7290_s1 + $0x150] sm:$0xff]  ;;  %v6293_v0 = vld [vmem:[#allocation2] sm:$0xe] }
  0xee   :  { %1223 = vmatpush.bf16.msra.mxu1 %v5285_v3  ;;  %v1432_v39 = vor.u32 %v1431_v33, %v1428_v31  ;;  %v1448_v3 = vsel %vm5742_vm14, %v1443_v56, %v1447_v51  ;;  %v2578_v27 = vrot.slane %v2573_v13, 4  ;;  %v6275_v33 = vld [vmem:[#allocation2 + $0x14] sm:$0x1] }
  0xf0   :  { %1534 = vmatpush.bf16.msra.mxu3 %v5311_v19  ;;  %v1433_v50 = vrot.slane %v1432_v39, 4  ;;  %v2607_v39 = vsel %vm5612_vm3, %v2578_v27, %v2606_v22  ;;  %v2613_v22 = vld [vmem:[#allocation2 + $0x14] sm:$0x1] }
  0xf1   :  { %2608 = vst [vmem:[#allocation2 + $0x8] sm:$0x1] %v2607_v39 }
  0xf2   :  { %1703 = vmatpush.bf16.msrb.mxu1 %v5324_v10  ;;  %v1438_v63 = vsel %vm5742_vm14, %v1433_v50, %v1437_v34  ;;  %v1474_v10 = vunpack.c.l.b16 %v1448_v3 }
  0xf3   :  { %v1473_v5 = vunpack.c.l.b16 %v1438_v63 }
  0xf4   :  { %1535 = vmatpush.bf16.msra.mxu3 %v5310_v8  ;;  %v2602_v8 = vld [vmem:[#allocation2] sm:$0xf] }
  0xf5   :  { %v1477_v26 = vpack.c.b16 %v1474_v10, %v1473_v5 }
  0xf6   :  { %1704 = vmatpush.bf16.msrb.mxu1 %v5323_v16  ;;  %v2566_v16 = vshll.u32 %v4702_v9, 16 }
  0xf9   :  { %1025 = vmatmul.bf16.vlgmr.msrb.gmra.mxu3 %v933_v30  ;;  %1044 = vmatmul.bf16.vlgmr.msra.gmra.mxu0 %v933_v30  ;;  %v5322_v30 = vld [vmem:[%s7290_s1 + $0x168] sm:$0xff] }
  0xfa   :  { %1705 = vmatpush.bf16.msrb.mxu1 %v5322_v30  ;;  %v2565_v30 = vrot.slane %v2563_v14, 7 }
  0xfe   :  { %1706 = vmatpush.bf16.msrb.mxu1 %v5321_v42  ;;  %v2569_v42 = vrot.slane %v2565_v30, 4 }
 0x109   :  { %1030 = vmatmul.bf16.gmra.mxu3 %v934_v38  ;;  %1049 = vmatmul.bf16.gmra.mxu0 %v934_v38  ;;  %v5303_v38 = vld [vmem:[%s7290_s1 + $0xd0] sm:$0xff] }
 0x10a   :  { %1613 = vmatpush.bf16.msrb.mxu0 %v5303_v38 }
 0x10e   :  { %1614 = vmatpush.bf16.msrb.mxu0 %v5302_v62  ;;  %v5318_v62 = vld [vmem:[%s7290_s1 + $0x148] sm:$0xff] }
 0x148   :  { %v880_v17 = vpop.f32.mrf.mxu1 }
 0x14e   :  { %v899_v6 = vpop.f32.mrf.mxu2 }
 0x150   :  { %v882_v59 = vpop.f32.mrf.mxu1 }
 0x156   :  { %v769_v49 = vpop.f32.mrf.mxu0  ;;  %v901_v15 = vpop.f32.mrf.mxu2 }
 0x157   :  { %v900_v28 = vadd.f32 %v899_v6, %v769_v49  ;;  %v5309_v49 = vld [vmem:[%s7290_s1 + $0x100] sm:$0xff]  ;;  %v5320_v6 = vld [vmem:[%s7290_s1 + $0x158] sm:$0xff] }
 0x158   :  { %1536 = vmatpush.bf16.msra.mxu3 %v5309_v49  ;;  %1707 = vmatpush.bf16.msrb.mxu1 %v5320_v6 }
 0x15b   :  { %1537 = vmatmul.bf16.vlgmr.msra.gmra.mxu3 %v1477_v26 }
 0x15c   :  { %v6142_v52 = vpop.f32.mrf.mxu3  ;;  %1708 = vmatpush.bf16.msrb.mxu1 %v5319_v29  ;;  %v4704_v29 = vld [vmem:[%s7289_s0 + $0x28] sm:$0xf] }
 0x15d   :  { %v881_v41 = vadd.f32 %v880_v17, %v6142_v52 }
 0x15e   :  { %v6144_v53 = vpop.f32.mrf.mxu0  ;;  %v904_v25 = vpop.f32.mrf.mxu2 }
 0x15f   :  { %v902_v54 = vadd.f32 %v901_v15, %v6144_v53  ;;  %v2574_v53 = vshll.u32 %v4703_v58, 16 }
 0x160   :  { %1709 = vmatpush.bf16.msrb.mxu1 %v5318_v62  ;;  %v1628_v62 = vld [vmem:[#allocation2 + $0xc] sm:$0xe] }
 0x161   :  { %v2576_v15 = vor.u32 %v2574_v53, %v2573_v13  ;;  %v885_v53 = vpop.f32.mrf.mxu1 }
 0x164   :  { %v6155_v57 = vpop.f32.mrf.mxu3 }
 0x165   :  { %v883_v1 = vadd.f32 %v882_v59, %v6155_v57  ;;  %v1421_v57 = vld [vmem:[#allocation2 + $0xc] sm:$0xf]  ;;  %v1469_v59 = vshll.u32 %v6275_v33, 16 }
 0x166   :  { %v6166_v61 = vpop.f32.mrf.mxu0  ;;  %v1450_v24 = vshrl.u32 %v1421_v57, 16 }
 0x167   :  { %v905_v5 = vadd.f32 %v904_v25, %v6166_v61 }
 0x168   :  { %v1452_v34 = vrot.slane %v1450_v24, 4  ;;  %v906_v24 = vpop.f32.mrf.mxu2 }
 0x16c   :  { %v6183_v4 = vpop.f32.mrf.mxu3 }
 0x16e   :  { %v6191_v7 = vpop.f32.mrf.mxu0 }
 0x16f   :  { %v907_v27 = vadd.f32 %v906_v24, %v6191_v7 }
 0x174   :  { %v6208_v18 = vpop.f32.mrf.mxu3 }
 0x176   :  { %v1045_v23 = vpop.f32.mrf.mxu0 }
 0x177   :  { %v1056_v12 = vadd.f32 %v1045_v23, %v900_v28  ;;  %v6267_v23 = vld [vmem:[#allocation2 + $0x10] sm:$0xf]  ;;  %v5301_v28 = vld [vmem:[%s7290_s1 + $0xc0] sm:$0xff] }
 0x178   :  { %v1459_v37 = vshll.u32 %v6267_v23, 16  ;;  %v1463_v44 = vshrl.u32 %v6267_v23, 16  ;;  %1615 = vmatpush.bf16.msrb.mxu0 %v5301_v28 }
 0x179   :  { %v1069_v52 = vadd.f32 %v6229_v35, %v1056_v12  ;;  %v1453_v12 = vshll.u32 %v1421_v57, 16 }
 0x17a   :  { %v1461_v51 = vrot.slane %v1459_v37, 5  ;;  %v1465_v58 = vrot.slane %v1463_v44, 4  ;;  %v2609_v44 = vld [vmem:[#allocation2 + $0xc] sm:$0xf] }
 0x17b   :  { %v1077_v17 = vmax.f32 %v1069_v52, 0.0  ;;  %v1455_v50 = vrot.slane %v1453_v12, 5  ;;  %1616 = vmatmul.bf16.vlgmr.msrb.gmra.mxu0 %v5325_v40  ;;  %v886_v12 = vadd.f32 %v885_v53, %v6183_v4 }
 0x17c   :  { %v1026_v46 = vpop.f32.mrf.mxu3 }
 0x17d   :  { %v1055_v55 = vadd.f32 %v1026_v46, %v881_v41  ;;  %v2568_v41 = vor.u32 %v2566_v16, %v2565_v30  ;;  %v1456_v63 = vor.u32 %v1455_v50, %v1452_v34  ;;  %v2583_v34 = vshll.u32 %v4704_v29, 16 }
 0x17e   :  { %v1047_v60 = vpop.f32.mrf.mxu0 }
 0x17f   :  { %v1058_v2 = vadd.f32 %v1047_v60, %v902_v54  ;;  %v1068_v19 = vadd.f32 %v6241_v48, %v1055_v55  ;;  %v4705_v54 = vld [vmem:[%s7289_s0 + $0x2c] sm:$0xf]  ;;  %v2577_v55 = vsel %vm5655_vm7, %v2569_v42, %v2576_v15  ;;  %v2603_v56 = vsel %vm5667_vm8, %v2568_v41, %v2602_v8 }
 0x180   :  { %2605 = vst [vmem:[#allocation2 + $0x4] sm:$0xf] %v2577_v55  ;;  %v2588_v3 = vshrl.u32 %v4705_v54, 16  ;;  %v1457_v10 = vrot.slane %v1456_v63, 4  ;;  %v2591_v30 = vshll.u32 %v4705_v54, 16  ;;  %v5326_v55 = vld [vmem:[#allocation2 + $0xc] sm:$0xff] }
 0x181   :  { %v1071_v20 = vadd.f32 %v6229_v35, %v1058_v2  ;;  %v1471_v2 = vrot.slane %v1469_v59, 5  ;;  %2604 = vst [vmem:[#allocation2] sm:$0xf] %v2603_v56  ;;  %v1076_v6 = vmax.f32 %v1068_v19, 0.0 }
 0x182   :  { %v2590_v14 = vrot.slane %v2588_v3, 7  ;;  %v4320_v3 = vrot.slane %v6293_v0, 9 }
 0x183   :  { %v1079_v31 = vmax.f32 %v1071_v20, 0.0  ;;  %v1462_v20 = vsel %vm5742_vm14, %v1457_v10, %v1461_v51 }
 0x184   :  { %v1028_v38 = vpop.f32.mrf.mxu3  ;;  %v1475_v19 = vunpack.c.l.b16 %v1462_v20  ;;  %v2595_v25 = vrot.slane %v2590_v14, 4  ;;  %v2593_v40 = vor.u32 %v2591_v30, %v2590_v14 }
 0x185   :  { %v1085_v46 = vpack.c.bf16 %v1079_v31, %v1077_v17  ;;  %v1057_v49 = vadd.f32 %v1028_v38, %v883_v1  ;;  %v1466_v1 = vor.u32 %v1465_v58, %v1461_v51  ;;  %v5317_v17 = vld [vmem:[%s7290_s1 + $0x140] sm:$0xff]  ;;  %v2580_v31 = vshrl.u32 %v4704_v29, 16 }
 0x186   :  { %v1050_v52 = vpop.f32.mrf.mxu0  ;;  %v2614_v8 = vsel %vm5612_vm3, %v2595_v25, %v2613_v22  ;;  %1710 = vmatpush.bf16.msrb.mxu1 %v5317_v17  ;;  %v1645_v17 = vrot.slane %v6275_v33, 5  ;;  %v5342_v33 = vld [vmem:[%s7292_s3 + $0x1f4] sm:$0xf0] }
 0x187   :  { %v1070_v60 = vadd.f32 %v6241_v48, %v1057_v49  ;;  %1243 = vmatmul.bf16.vlgmr.msra.gmra.mxu2 %v1085_v46  ;;  %v1467_v13 = vrot.slane %v1466_v1, 4  ;;  %v1060_v57 = vadd.f32 %v1050_v52, %v905_v5  ;;  %2615 = vst [vmem:[#allocation2 + $0x14] sm:$0x1] %v2614_v8  ;;  %v2582_v39 = vrot.slane %v2580_v31, 7  ;;  %v887_v46 = vpop.f32.mrf.mxu1  ;;  %v4525_v31 = vld [vmem:[%s7292_s3 + $0x1e0] sm:$0xf] }
 0x188   :  { %v888_v51 = vadd.f32 %v887_v46, %v6208_v18  ;;  %v1635_v1 = vrot.slane %v6213_v21, 5  ;;  %v4321_v21 = vrot.slane %v1628_v62, 9 }
 0x189   :  { %v1078_v9 = vmax.f32 %v1070_v60, 0.0  ;;  %v1472_v61 = vsel %vm5742_vm14, %v1467_v13, %v1471_v2  ;;  %v1073_v37 = vadd.f32 %v6229_v35, %v1060_v57  ;;  %v2585_v49 = vor.u32 %v2583_v34, %v2582_v39  ;;  %v5340_v34 = vld [vmem:[%s7292_s3 + $0x1e4] sm:$0xf0] }
 0x18a   :  { %v1476_v28 = vunpack.c.l.b16 %v1472_v61  ;;  %v2586_v50 = vrot.slane %v2582_v39, 4  ;;  %v1637_v5 = vrot.slane %v1635_v1, 4 }
 0x18b   :  { %v1084_v16 = vpack.c.bf16 %v1078_v9, %v1076_v6  ;;  %v1081_v54 = vmax.f32 %v1073_v37, 0.0  ;;  %v2610_v58 = vsel %vm5667_vm8, %v2585_v49, %v2609_v44  ;;  %1621 = vmatmul.bf16.gmra.mxu0 %v5326_v55  ;;  %v1638_v6 = vrot.slane %v6231_v36, 5  ;;  %v5337_v44 = vld [vmem:[%s7292_s3 + $0x1d4] sm:$0xf]  ;;  %v5358_v55 = vld [vmem:[%s7292_s3 + $0x274] sm:$0xf0] }
 0x18c   :  { %v1031_v26 = vpop.f32.mrf.mxu3  ;;  %v1478_v7 = vpack.c.b16 %v1476_v28, %v1475_v19  ;;  %v2594_v56 = vsel %vm5655_vm7, %v2586_v50, %v2593_v40  ;;  %2611 = vst [vmem:[#allocation2 + $0xc] sm:$0xf] %v2610_v58  ;;  %v1636_v9 = vsel %vm5736_vm13, %v4320_v3, %v1635_v1  ;;  %v5341_v19 = vld [vmem:[%s7292_s3 + $0x1f4] sm:$0xf]  ;;  %v4526_v37 = vor.u32 %v5340_v34, %v4525_v31  ;;  %v5335_v1 = vld [vmem:[%s7292_s3 + $0x1c4] sm:$0xf] }
 0x18d   :  { %1224 = vmatmul.bf16.vlgmr.msra.gmra.mxu1 %v1084_v16  ;;  %v1059_v41 = vadd.f32 %v1031_v26, %v886_v12  ;;  %2612 = vst [vmem:[#allocation2 + $0x10] sm:$0xf] %v2594_v56  ;;  %v1639_v10 = vsel %vm5736_vm13, %v1637_v5, %v1638_v6  ;;  %v1642_v16 = vrot.slane %v6267_v23, 5  ;;  %v4533_v23 = vld [vmem:[%s7292_s3 + $0x1f0] sm:$0xf] }
 0x18e   :  { %v1052_v15 = vpop.f32.mrf.mxu0  ;;  %1542 = vmatmul.bf16.gmra.mxu3 %v1478_v7  ;;  %v1648_v13 = vunpack.c.l.b16 %v1639_v10  ;;  %v4534_v25 = vor.u32 %v5342_v33, %v4533_v23  ;;  %v5339_v12 = vld [vmem:[%s7292_s3 + $0x1e4] sm:$0xf]  ;;  %v5357_v56 = vld [vmem:[%s7292_s3 + $0x274] sm:$0xf]  ;;  %v4453_v6 = vld [vmem:[%s7292_s3 + $0x260] sm:$0xf] }
 0x18f   :  { %v1062_v38 = vadd.f32 %v1052_v15, %v907_v27  ;;  %v1072_v59 = vadd.f32 %v6241_v48, %v1059_v41  ;;  %v1644_v57 = vrot.slane %v1642_v16, 4  ;;  %v1643_v0 = vsel %vm5736_vm13, %v4321_v21, %v1642_v16  ;;  %v4535_v27 = vld [vmem:[%s7292_s3 + $0x1f8] sm:$0xf0]  ;;  %v4517_v41 = vld [vmem:[%s7292_s3 + $0x1d0] sm:$0xf] }
 0x190   :  { %v1649_v20 = vunpack.c.l.b16 %v1643_v0  ;;  %v4538_v28 = vor.u32 %v5341_v19, %v4535_v27  ;;  %2118 = vmatpush.bf16.msra.mxu0 %v4534_v25  ;;  %v4455_v16 = vld [vmem:[%s7292_s3 + $0x268] sm:$0xf0]  ;;  %v4501_v21 = vld [vmem:[%s7292_s3 + $0x1b0] sm:$0xf]  ;;  %v5354_v19 = vld [vmem:[%s7292_s3 + $0x254] sm:$0xf0] }
 0x191   :  { %v1075_v42 = vadd.f32 %v6229_v35, %v1062_v38  ;;  %v1080_v63 = vmax.f32 %v1072_v59, 0.0  ;;  %v1646_v36 = vsel %vm5736_vm13, %v1644_v57, %v1645_v17  ;;  %v4527_v38 = vld [vmem:[%s7292_s3 + $0x1e8] sm:$0xf0]  ;;  %v4463_v59 = vld [vmem:[%s7292_s3 + $0x278] sm:$0xf0] }
 0x192   :  { %v1650_v22 = vunpack.c.l.b16 %v1646_v36  ;;  %2137 = vmatpush.bf16.msra.mxu1 %v4538_v28  ;;  %v4530_v39 = vor.u32 %v5339_v12, %v4527_v38  ;;  %v5334_v36 = vld [vmem:[%s7292_s3 + $0x1b4] sm:$0xf0]  ;;  %v4445_v33 = vld [vmem:[%s7292_s3 + $0x250] sm:$0xf]  ;;  %v5353_v25 = vld [vmem:[%s7292_s3 + $0x254] sm:$0xf] }
 0x193   :  { %v1083_v52 = vmax.f32 %v1075_v42, 0.0  ;;  %v5338_v42 = vld [vmem:[%s7292_s3 + $0x1d4] sm:$0xf0]  ;;  %v4446_v27 = vor.u32 %v5354_v19, %v4445_v33  ;;  %v4447_v28 = vld [vmem:[%s7292_s3 + $0x258] sm:$0xf0] }
 0x194   :  { %v1033_v4 = vpop.f32.mrf.mxu3  ;;  %v1652_v24 = vpack.c.b16 %v1650_v22, %v1649_v20  ;;  %2119 = vmatpush.bf16.msra.mxu0 %v4526_v37  ;;  %v4518_v50 = vor.u32 %v5338_v42, %v4517_v41  ;;  %v5333_v20 = vld [vmem:[%s7292_s3 + $0x1b4] sm:$0xf]  ;;  %v4503_v22 = vld [vmem:[%s7292_s3 + $0x1b8] sm:$0xf0]  ;;  %v4450_v31 = vor.u32 %v5353_v25, %v4447_v28  ;;  %v5331_v12 = vld [vmem:[%s7292_s3 + $0x1a4] sm:$0xf] }
 0x195   :  { %v1061_v35 = vadd.f32 %v1033_v4, %v888_v51  ;;  %v1087_v60 = vpack.c.bf16 %v1083_v52, %v1081_v54  ;;  %v4519_v51 = vld [vmem:[%s7292_s3 + $0x1d8] sm:$0xf0]  ;;  %v4461_v4 = vld [vmem:[%s7292_s3 + $0x270] sm:$0xf]  ;;  %v4495_v37 = vld [vmem:[%s7292_s3 + $0x1a8] sm:$0xf0] }
 0x196   :  { %2138 = vmatpush.bf16.msra.mxu1 %v4530_v39  ;;  %v4522_v54 = vor.u32 %v5337_v44, %v4519_v51  ;;  %v4462_v58 = vor.u32 %v5358_v55, %v4461_v4  ;;  %v4498_v39 = vor.u32 %v5331_v12, %v4495_v37  ;;  %v4437_v44 = vld [vmem:[%s7292_s3 + $0x240] sm:$0xf]  ;;  %v5330_v4 = vld [vmem:[%s7292_s3 + $0x194] sm:$0xf0]  ;;  %v4423_v19 = vld [vmem:[%s7292_s3 + $0x228] sm:$0xf0] }
 0x197   :  { %v1074_v18 = vadd.f32 %v6241_v48, %v1061_v35  ;;  %1248 = vmatmul.bf16.gmra.mxu2 %v1087_v60  ;;  %v1647_v48 = vunpack.c.l.b16 %v1636_v9  ;;  %v4509_v35 = vld [vmem:[%s7292_s3 + $0x1c0] sm:$0xf]  ;;  %v5336_v60 = vld [vmem:[%s7292_s3 + $0x1c4] sm:$0xf0]  ;;  %v5345_v37 = vld [vmem:[%s7292_s3 + $0x214] sm:$0xf] }
 0x198   :  { %2120 = vmatpush.bf16.msra.mxu0 %v4518_v50  ;;  %1988 = vmatpush.bf16.msrb.mxu2 %v4462_v58  ;;  %v5356_v9 = vld [vmem:[%s7292_s3 + $0x264] sm:$0xf0] }
 0x199   :  { %v1082_v53 = vmax.f32 %v1074_v18, 0.0  ;;  %v1651_v14 = vpack.c.b16 %v1648_v13, %v1647_v48  ;;  %v4454_v13 = vor.u32 %v5356_v9, %v4453_v6  ;;  %v4431_v9 = vld [vmem:[%s7292_s3 + $0x238] sm:$0xf0] }
 0x19a   :  { %2139 = vmatpush.bf16.msra.mxu1 %v4522_v54  ;;  %v4439_v54 = vld [vmem:[%s7292_s3 + $0x248] sm:$0xf0] }
 0x19b   :  { %v1086_v2 = vpack.c.bf16 %v1082_v53, %v1080_v63  ;;  %v4466_v63 = vor.u32 %v5357_v56, %v4463_v59  ;;  %v4510_v53 = vor.u32 %v5336_v60, %v4509_v35  ;;  %v5329_v35 = vld [vmem:[%s7292_s3 + $0x194] sm:$0xf]  ;;  %v4487_v60 = vld [vmem:[%s7292_s3 + $0x198] sm:$0xf0] }
 0x19c   :  { %1989 = vmatpush.bf16.msrb.mxu2 %v4454_v13 }
 0x19d   :  { %1229 = vmatmul.bf16.gmra.mxu1 %v1086_v2  ;;  %v4511_v2 = vld [vmem:[%s7292_s3 + $0x1c8] sm:$0xf0]  ;;  %2007 = vmatpush.bf16.msrb.mxu3 %v4466_v63 }
 0x19e   :  { %v4514_v5 = vor.u32 %v5335_v1, %v4511_v2  ;;  %2121 = vmatpush.bf16.msra.mxu0 %v4510_v53  ;;  %v5498_v53 = vld [vmem:[%s7295_s6] ss:$0 sm:$0xff]  ;;  %v4429_v1 = vld [vmem:[%s7292_s3 + $0x230] sm:$0xf]  ;;  %v5350_v2 = vld [vmem:[%s7292_s3 + $0x234] sm:$0xf0] }
 0x19f   :  { %v4430_v6 = vor.u32 %v5350_v2, %v4429_v1 }
 0x1a0   :  { %2140 = vmatpush.bf16.msra.mxu1 %v4514_v5  ;;  %1990 = vmatpush.bf16.msrb.mxu2 %v4446_v27 }
 0x1ad   :  { %1711 = vmatmul.bf16.vlgmr.msrb.gmra.mxu1 %v1651_v14  ;;  %v5355_v14 = vld [vmem:[%s7292_s3 + $0x264] sm:$0xf] }
 0x1ae   :  { %v4458_v0 = vor.u32 %v5355_v14, %v4455_v16 }
 0x1b0   :  { %2008 = vmatpush.bf16.msrb.mxu3 %v4458_v0 }
 0x1b4   :  { %2009 = vmatpush.bf16.msrb.mxu3 %v4450_v31  ;;  %v5346_v31 = vld [vmem:[%s7292_s3 + $0x214] sm:$0xf0] }
 0x1bd   :  { %1716 = vmatmul.bf16.gmra.mxu1 %v1652_v24 }
 0x1de   :  { %v1538_v62 = vpop.f32.mrf.mxu3 }
 0x1e6   :  { %v1540_v41 = vpop.f32.mrf.mxu3 }
 0x1f8   :  { %v1617_v18 = vpop.f32.mrf.mxu0 }
 0x200   :  { %v1619_v42 = vpop.f32.mrf.mxu0 }
 0x208   :  { %v1622_v28 = vpop.f32.mrf.mxu0 }
 0x20a   :  { %v1225_v26 = vpop.f32.mrf.mxu1  ;;  %v1244_v61 = vpop.f32.mrf.mxu2 }
 0x20b   :  { %v1245_v15 = vadd.f32 %v1244_v61, %v1225_v26  ;;  %v4502_v26 = vor.u32 %v5334_v36, %v4501_v21  ;;  %v4506_v61 = vor.u32 %v5333_v20, %v4503_v22  ;;  %v1620_v20 = vadd.f32 %v1619_v42, %v1540_v41 }
 0x20d   :  { %2122 = vmatpush.bf16.msra.mxu0 %v4502_v26  ;;  %2141 = vmatpush.bf16.msra.mxu1 %v4506_v61  ;;  %v5348_v26 = vld [vmem:[%s7292_s3 + $0x224] sm:$0xf0]  ;;  %v5347_v61 = vld [vmem:[%s7292_s3 + $0x224] sm:$0xf] }
 0x211   :  { %2142 = vmatpush.bf16.msra.mxu1 %v4498_v39  ;;  %v1543_v27 = vpop.f32.mrf.mxu3 }
 0x212   :  { %v1227_v29 = vpop.f32.mrf.mxu1  ;;  %v1246_v30 = vpop.f32.mrf.mxu2 }
 0x213   :  { %v1247_v8 = vadd.f32 %v1246_v30, %v1227_v29  ;;  %v4493_v29 = vld [vmem:[%s7292_s3 + $0x1a0] sm:$0xf]  ;;  %v5332_v30 = vld [vmem:[%s7292_s3 + $0x1a4] sm:$0xf0] }
 0x214   :  { %v4494_v34 = vor.u32 %v5332_v30, %v4493_v29 }
 0x215   :  { %v1254_v7 = vadd.f32 %v1247_v8, %v1245_v15  ;;  %v1618_v15 = vadd.f32 %v1617_v18, %v1538_v62  ;;  %v4490_v62 = vor.u32 %v5329_v35, %v4487_v60  ;;  %v5374_v60 = vld [vmem:[%s7292_s3 + $0x2f4] sm:$0xf0] }
 0x216   :  { %2123 = vmatpush.bf16.msra.mxu0 %v4494_v34  ;;  %v4426_v34 = vor.u32 %v5347_v61, %v4423_v19  ;;  %v5370_v61 = vld [vmem:[%s7292_s3 + $0x2d4] sm:$0xf0] }
 0x217   :  { %v1255_v40 = vrot.slane %v1254_v7, 4  ;;  %2143 = vmatpush.bf16.msra.mxu1 %v4490_v62  ;;  %v5373_v62 = vld [vmem:[%s7292_s3 + $0x2f4] sm:$0xf] }
 0x219   :  { %v1256_v52 = vadd.f32 %v1255_v40, %v1254_v7  ;;  %v6443_v7 = vld [vmem:[%s7291_s2 + $0x1] ss:$0 sm:$0xff] }
 0x21a   :  { %v1230_v46 = vpop.f32.mrf.mxu1  ;;  %v1249_v49 = vpop.f32.mrf.mxu2 }
 0x21b   :  { %v1257_v3 = vrot.slane %v1256_v52, 2  ;;  %v1250_v57 = vadd.f32 %v1249_v49, %v1230_v46  ;;  %v5352_v46 = vld [vmem:[%s7292_s3 + $0x244] sm:$0xf0]  ;;  %v5351_v49 = vld [vmem:[%s7292_s3 + $0x244] sm:$0xf] }
 0x21c   :  { %v4438_v51 = vor.u32 %v5352_v46, %v4437_v44  ;;  %v4442_v58 = vor.u32 %v5351_v49, %v4439_v54  ;;  %v4405_v44 = vld [vmem:[%s7292_s3 + $0x200] sm:$0xf]  ;;  %v5344_v46 = vld [vmem:[%s7292_s3 + $0x204] sm:$0xf0]  ;;  %v1781_v49 = vld [vmem:[#allocation3] sm:$0xf] }
 0x21d   :  { %v1258_v24 = vadd.f32 %v1257_v3, %v1256_v52  ;;  %v4485_v52 = vld [vmem:[%s7292_s3 + $0x190] sm:$0xf]  ;;  %v5349_v3 = vld [vmem:[%s7292_s3 + $0x234] sm:$0xf]  ;;  %v5343_v54 = vld [vmem:[%s7292_s3 + $0x204] sm:$0xf]  ;;  %v4406_v35 = vor.u32 %v5344_v46, %v4405_v44 }
 0x21e   :  { %v4486_v59 = vor.u32 %v5330_v4, %v4485_v52  ;;  %1991 = vmatpush.bf16.msrb.mxu2 %v4438_v51  ;;  %2010 = vmatpush.bf16.msrb.mxu3 %v4442_v58  ;;  %v4434_v16 = vor.u32 %v5349_v3, %v4431_v9  ;;  %v4407_v58 = vld [vmem:[%s7292_s3 + $0x208] sm:$0xf0]  ;;  %v4591_v3 = vld [vmem:[%s7292_s3 + $0x2e0] sm:$0xf]  ;;  %v5368_v44 = vld [vmem:[%s7292_s3 + $0x2c4] sm:$0xf0] }
 0x21f   :  { %v1259_v38 = vrot.slane %v1258_v24, 1  ;;  %v4410_v9 = vor.u32 %v5343_v54, %v4407_v58 }
 0x220   :  { %2124 = vmatpush.bf16.msra.mxu0 %v4486_v59  ;;  %v4599_v59 = vld [vmem:[%s7292_s3 + $0x2f0] sm:$0xf] }
 0x221   :  { %v1260_v5 = vadd.f32 %v1259_v38, %v1258_v24  ;;  %v4421_v24 = vld [vmem:[%s7292_s3 + $0x220] sm:$0xf]  ;;  %v4415_v38 = vld [vmem:[%s7292_s3 + $0x218] sm:$0xf0]  ;;  %v4600_v2 = vor.u32 %v5374_v60, %v4599_v59 }
 0x222   :  { %v1232_v10 = vpop.f32.mrf.mxu1  ;;  %v1251_v48 = vpop.f32.mrf.mxu2  ;;  %1992 = vmatpush.bf16.msrb.mxu2 %v4430_v6  ;;  %2011 = vmatpush.bf16.msrb.mxu3 %v4434_v16  ;;  %v4422_v33 = vor.u32 %v5348_v26, %v4421_v24  ;;  %v4418_v51 = vor.u32 %v5345_v37, %v4415_v38  ;;  %v5371_v16 = vld [vmem:[%s7292_s3 + $0x2e4] sm:$0xf]  ;;  %v4583_v26 = vld [vmem:[%s7292_s3 + $0x2d0] sm:$0xf] }
 0x223   :  { %v1252_v17 = vadd.f32 %v1251_v48, %v1232_v10  ;;  %v4477_v10 = vld [vmem:[%s7292_s3 + $0x180] sm:$0xf]  ;;  %v5328_v48 = vld [vmem:[%s7292_s3 + $0x184] sm:$0xf0]  ;;  %v6509_v30 = vadd.f32 %v5498_v53, %v1260_v5  ;;  %v4584_v38 = vor.u32 %v5370_v61, %v4583_v26  ;;  %v5363_v61 = vld [vmem:[%s7292_s3 + $0x2a4] sm:$0xf] }
 0x224   :  { %v4478_v21 = vor.u32 %v5328_v48, %v4477_v10  ;;  %v5372_v10 = vld [vmem:[%s7292_s3 + $0x2e4] sm:$0xf0] }
 0x225   :  { %v1261_v23 = vadd.f32 %v1252_v17, %v1250_v57  ;;  %v5327_v57 = vld [vmem:[%s7292_s3 + $0x184] sm:$0xf]  ;;  %v4479_v17 = vld [vmem:[%s7292_s3 + $0x188] sm:$0xf0] }
 0x226   :  { %v4482_v0 = vor.u32 %v5327_v57, %v4479_v17  ;;  %2125 = vmatpush.bf16.msra.mxu0 %v4478_v21  ;;  %1993 = vmatpush.bf16.msrb.mxu2 %v4422_v33  ;;  %v4593_v21 = vld [vmem:[%s7292_s3 + $0x2e8] sm:$0xf0] }
 0x227   :  { %v1262_v8 = vrot.slane %v1261_v23, 4  ;;  %2012 = vmatpush.bf16.msrb.mxu3 %v4426_v34 }
 0x228   :  { %2144 = vmatpush.bf16.msra.mxu1 %v4482_v0  ;;  %v1545_v0 = vpop.f32.mrf.mxu3 }
 0x229   :  { %v1263_v40 = vadd.f32 %v1262_v8, %v1261_v23  ;;  %v4413_v8 = vld [vmem:[%s7292_s3 + $0x210] sm:$0xf] }
 0x22a   :  { %v1712_v50 = vpop.f32.mrf.mxu1  ;;  %v4414_v12 = vor.u32 %v5346_v31, %v4413_v8  ;;  %v4585_v8 = vld [vmem:[%s7292_s3 + $0x2d8] sm:$0xf0] }
 0x22b   :  { %v1264_v55 = vrot.slane %v1263_v40, 2  ;;  %v1722_v56 = vadd.f32 %v1712_v50, %v1618_v15  ;;  %v1623_v50 = vadd.f32 %v1622_v28, %v1543_v27  ;;  %2013 = vmatpush.bf16.msrb.mxu3 %v4418_v51  ;;  %v1785_v27 = vld [vmem:[#allocation3 + $0x8] sm:$0x1] }
 0x22c   :  { %1994 = vmatpush.bf16.msrb.mxu2 %v4414_v12 }
 0x22d   :  { %v1265_v18 = vadd.f32 %v1264_v55, %v1263_v40  ;;  %v1729_v63 = vadd.f32 %v6443_v7, %v1722_v56  ;;  %v1274_v55 = vmul.f32 %v6509_v30, %v6509_v30 }
 0x22f   :  { %v1266_v13 = vrot.slane %v1265_v18, 1  ;;  %v1733_v14 = vmax.f32 %v1729_v63, 0.0  ;;  %2014 = vmatpush.bf16.msrb.mxu3 %v4410_v9 }
 0x230   :  { %1995 = vmatpush.bf16.msrb.mxu2 %v4406_v35 }
 0x231   :  { %v1267_v36 = vadd.f32 %v1266_v13, %v1265_v18  ;;  %v1737_v22 = vpack.c.bf16 %v1733_v14, %v1733_v14  ;;  %v4601_v18 = vld [vmem:[%s7292_s3 + $0x2f8] sm:$0xf0] }
 0x232   :  { %v1714_v23 = vpop.f32.mrf.mxu1  ;;  %v4604_v14 = vor.u32 %v5373_v62, %v4601_v18  ;;  %v4567_v62 = vld [vmem:[%s7292_s3 + $0x2b0] sm:$0xf]  ;;  %v1788_v18 = vld [vmem:[#allocation3 + $0xc] sm:$0xf] }
 0x233   :  { %v1742_v25 = vshrl.u32 %v1737_v22, 16  ;;  %v1723_v29 = vadd.f32 %v1714_v23, %v1620_v20  ;;  %v6511_v15 = vadd.f32 %v5498_v53, %v1267_v36  ;;  %v1745_v40 = vshll.u32 %v1737_v22, 16  ;;  %v1624_v36 = vpop.f32.mrf.mxu0 }
 0x234   :  { %2264 = vmatpush.bf16.msra.mxu2 %v4600_v2  ;;  %v4592_v22 = vor.u32 %v5372_v10, %v4591_v3  ;;  %2283 = vmatpush.bf16.msra.mxu3 %v4604_v14  ;;  %v1625_v28 = vadd.f32 %v1624_v36, %v1545_v0  ;;  %v4559_v10 = vld [vmem:[%s7292_s3 + $0x2a0] sm:$0xf] }
 0x235   :  { %v6525_v39 = vrot.slane %v1742_v25, 7  ;;  %v1730_v41 = vadd.f32 %v6443_v7, %v1723_v29  ;;  %v1275_v42 = vmul.f32 %v6511_v15, %v6511_v15  ;;  %v4596_v25 = vor.u32 %v5371_v16, %v4593_v21  ;;  %v5369_v29 = vld [vmem:[%s7292_s3 + $0x2d4] sm:$0xf] }
 0x237   :  { %v1747_v52 = vor.u32 %v1745_v40, %v6525_v39  ;;  %v1734_v4 = vmax.f32 %v1730_v41, 0.0  ;;  %v1278_v56 = vrot.slane %v1275_v42, 7  ;;  %v1748_v24 = vrot.slane %v6525_v39, 4  ;;  %v4575_v39 = vld [vmem:[%s7292_s3 + $0x2c0] sm:$0xf] }
 0x238   :  { %2265 = vmatpush.bf16.msra.mxu2 %v4592_v22  ;;  %2284 = vmatpush.bf16.msra.mxu3 %v4596_v25  ;;  %v4551_v25 = vld [vmem:[%s7292_s3 + $0x290] sm:$0xf] }
 0x239   :  { %v1782_v63 = vsel %vm5667_vm8, %v1747_v52, %v1781_v49  ;;  %v1738_v53 = vpack.c.bf16 %v1734_v4, %v1734_v4  ;;  %v1280_v1 = vsel %vm1279_vm15, %v1278_v56, %v1274_v55  ;;  %v4576_v4 = vor.u32 %v5368_v44, %v4575_v39  ;;  %v5367_v55 = vld [vmem:[%s7292_s3 + $0x2c4] sm:$0xf]  ;;  %v4577_v56 = vld [vmem:[%s7292_s3 + $0x2c8] sm:$0xf0]  ;;  %v5361_v39 = vld [vmem:[%s7292_s3 + $0x294] sm:$0xf] }
 0x23a   :  { %1783 = vst [vmem:[#allocation3] sm:$0xf] %v1782_v63  ;;  %v1717_v5 = vpop.f32.mrf.mxu1  ;;  %v1283_v6 = vsel %vm1282_vm0, %v1280_v1, 0.0  ;;  %v4580_v63 = vor.u32 %v5367_v55, %v4577_v56  ;;  %v4569_v1 = vld [vmem:[%s7292_s3 + $0x2b8] sm:$0xf0] }
 0x23b   :  { %v1750_v48 = vshrl.u32 %v1738_v53, 16  ;;  %v1724_v13 = vadd.f32 %v1717_v5, %v1623_v50  ;;  %1284 = vadd.xlane.f32.xlu0 %v1283_v6  ;;  %v1753_v17 = vshll.u32 %v1738_v53, 16  ;;  %v4588_v50 = vor.u32 %v5369_v29, %v4585_v8  ;;  %v5365_v53 = vld [vmem:[%s7292_s3 + $0x2b4] sm:$0xf] }
 0x23c   :  { %2266 = vmatpush.bf16.msra.mxu2 %v4584_v38 }
 0x23d   :  { %v1752_v57 = vrot.slane %v1750_v48, 7  ;;  %v1731_v20 = vadd.f32 %v6443_v7, %v1724_v13  ;;  %2285 = vmatpush.bf16.msra.mxu3 %v4588_v50 }
 0x23f   :  { %v1755_v23 = vor.u32 %v1753_v17, %v1752_v57  ;;  %v1757_v33 = vrot.slane %v1752_v57, 4  ;;  %v1735_v19 = vmax.f32 %v1731_v20, 0.0  ;;  %v5364_v57 = vld [vmem:[%s7292_s3 + $0x2a4] sm:$0xf0]  ;;  %v4572_v20 = vor.u32 %v5365_v53, %v4569_v1 }
 0x240   :  { %2267 = vmatpush.bf16.msra.mxu2 %v4576_v4  ;;  %v4560_v26 = vor.u32 %v5364_v57, %v4559_v10 }
 0x241   :  { %v1756_v31 = vsel %vm5655_vm7, %v1748_v24, %v1755_v23  ;;  %v1786_v34 = vsel %vm5612_vm3, %v1757_v33, %v1785_v27  ;;  %v1739_v12 = vpack.c.bf16 %v1735_v19, %v1735_v19  ;;  %v1846_v37 = vld [vmem:[#allocation3] sm:$0xf]  ;;  %2286 = vmatpush.bf16.msra.mxu3 %v4580_v63  ;;  %v4561_v23 = vld [vmem:[%s7292_s3 + $0x2a8] sm:$0xf0] }
 0x242   :  { %1784 = vst [vmem:[#allocation3 + $0x4] sm:$0xf] %v1756_v31  ;;  %v1719_v40 = vpop.f32.mrf.mxu1  ;;  %v1853_v41 = vshrl.u32 %v1846_v37, 16  ;;  %v1856_v42 = vshll.u32 %v1846_v37, 16  ;;  %v5362_v27 = vld [vmem:[%s7292_s3 + $0x294] sm:$0xf0]  ;;  %v4564_v38 = vor.u32 %v5363_v61, %v4561_v23 }
 0x243   :  { %1787 = vst [vmem:[#allocation3 + $0x8] sm:$0x1] %v1786_v34  ;;  %v1759_v46 = vshrl.u32 %v1739_v12, 16  ;;  %v1725_v49 = vadd.f32 %v1719_v40, %v1625_v28  ;;  %v1762_v54 = vshll.u32 %v1739_v12, 16  ;;  %v1792_v31 = vld [vmem:[#allocation3 + $0x14] sm:$0x1]  ;;  %v4552_v44 = vor.u32 %v5362_v27, %v4551_v25 }
 0x244   :  { %v1855_v58 = vrot.slane %v1853_v41, 4  ;;  %v1858_v59 = vrot.slane %v1856_v42, 5  ;;  %v2156_v61 = vld [vmem:[#allocation3] sm:$0xe] }
 0x245   :  { %v1761_v51 = vrot.slane %v1759_v46, 7  ;;  %v1732_v52 = vadd.f32 %v6443_v7, %v1725_v49  ;;  %v5366_v7 = vld [vmem:[%s7292_s3 + $0x2b4] sm:$0xf0]  ;;  %2287 = vmatpush.bf16.msra.mxu3 %v4572_v20  ;;  %v4553_v46 = vld [vmem:[%s7292_s3 + $0x298] sm:$0xf0] }
 0x246   :  { %v4568_v9 = vor.u32 %v5366_v7, %v4567_v62  ;;  %v1859_v13 = vor.u32 %v1858_v59, %v1855_v58  ;;  %v4543_v49 = vld [vmem:[%s7292_s3 + $0x280] sm:$0xf]  ;;  %v4556_v56 = vor.u32 %v5361_v39, %v4553_v46 }
 0x247   :  { %v1764_v35 = vor.u32 %v1762_v54, %v1761_v51  ;;  %v1736_v60 = vmax.f32 %v1732_v52, 0.0  ;;  %v1765_v28 = vrot.slane %v1761_v51, 4  ;;  %v5360_v52 = vld [vmem:[%s7292_s3 + $0x284] sm:$0xf0] }
 0x248   :  { %2268 = vmatpush.bf16.msra.mxu2 %v4568_v9  ;;  %v1860_v33 = vrot.slane %v1859_v13, 4  ;;  %v4544_v59 = vor.u32 %v5360_v52, %v4543_v49 }
 0x249   :  { %v1789_v2 = vsel %vm5667_vm8, %v1764_v35, %v1788_v18  ;;  %v1740_v3 = vpack.c.bf16 %v1736_v60, %v1736_v60  ;;  %v5375_v5 = vld [vmem:[#allocation3] sm:$0xff]  ;;  %2288 = vmatpush.bf16.msra.mxu3 %v4564_v38  ;;  %v5359_v35 = vld [vmem:[%s7292_s3 + $0x284] sm:$0xf]  ;;  %v4545_v60 = vld [vmem:[%s7292_s3 + $0x288] sm:$0xf0] }
 0x24a   :  { %v6618_v6 = vld [vmem:[#allocation3 + $0x4] sm:$0xf]  ;;  %1790 = vst [vmem:[#allocation3 + $0xc] sm:$0xf] %v1789_v2  ;;  %v6623_v48 = vld [vmem:[#allocation3 + $0x8] sm:$0x1]  ;;  %2126 = vmatmul.bf16.vlgmr.msra.gmra.mxu0 %v5375_v5  ;;  %2145 = vmatmul.bf16.vlgmr.msra.gmra.mxu1 %v5375_v5  ;;  %v4548_v18 = vor.u32 %v5359_v35, %v4545_v60 }
 0x24b   :  { %v1862_v14 = vshll.u32 %v6618_v6, 16  ;;  %v1866_v16 = vshrl.u32 %v6618_v6, 16  ;;  %v1767_v21 = vshrl.u32 %v1740_v3, 16  ;;  %v1872_v36 = vshll.u32 %v6623_v48, 16  ;;  %v5384_v35 = vld [vmem:[%s7294_s5 + $0xb8] sm:$0xff] }
 0x24c   :  { %v1770_v24 = vshll.u32 %v1740_v3, 16  ;;  %2269 = vmatpush.bf16.msra.mxu2 %v4560_v26  ;;  %v2167_v23 = vrot.slane %v6623_v48, 5  ;;  %v5392_v60 = vld [vmem:[%s7294_s5 + $0xf8] sm:$0xff]  ;;  %2464 = vmatpush.bf16.msrb.mxu0 %v5384_v35 }
 0x24d   :  { %v1864_v17 = vrot.slane %v1862_v14, 5  ;;  %v1868_v0 = vrot.slane %v1866_v16, 4  ;;  %v1769_v22 = vrot.slane %v1767_v21, 7  ;;  %v1874_v37 = vrot.slane %v1872_v36, 5  ;;  %2289 = vmatpush.bf16.msra.mxu3 %v4556_v56  ;;  %2483 = vmatpush.bf16.msrb.mxu1 %v5392_v60 }
 0x24f   :  { %v1869_v19 = vor.u32 %v1868_v0, %v1864_v17  ;;  %v1772_v29 = vor.u32 %v1770_v24, %v1769_v22  ;;  %v1774_v8 = vrot.slane %v1769_v22, 4  ;;  %v1865_v34 = vsel %vm5742_vm14, %v1860_v33, %v1864_v17 }
 0x250   :  { %v1900_v4 = vunpack.c.l.b16 %v1865_v34  ;;  %2270 = vmatpush.bf16.msra.mxu2 %v4552_v44  ;;  %v2164_v24 = vrot.slane %v6618_v6, 5  ;;  %v4539_v33 = vrot.slane %v2156_v61, 9  ;;  %v5385_v61 = vld [vmem:[%s7294_s5 + $0xc0] sm:$0xff] }
 0x251   :  { %v1870_v12 = vrot.slane %v1869_v19, 4  ;;  %v1773_v40 = vsel %vm5655_vm7, %v1765_v28, %v1772_v29  ;;  %v1793_v41 = vsel %vm5612_vm3, %v1774_v8, %v1792_v31  ;;  %v1848_v42 = vld [vmem:[#allocation3 + $0xc] sm:$0xf]  ;;  %2290 = vmatpush.bf16.msra.mxu3 %v4548_v18 }
 0x252   :  { %1791 = vst [vmem:[#allocation3 + $0x10] sm:$0xf] %v1773_v40  ;;  %v1877_v51 = vshrl.u32 %v1848_v42, 16  ;;  %v1880_v54 = vshll.u32 %v1848_v42, 16  ;;  %v2166_v26 = vrot.slane %v2164_v24, 4  ;;  %v2165_v25 = vsel %vm5736_vm13, %v4539_v33, %v2164_v24  ;;  %v5381_v18 = vld [vmem:[%s7294_s5 + $0xa0] sm:$0xff] }
 0x253   :  { %v1875_v50 = vsel %vm5742_vm14, %v1870_v12, %v1874_v37  ;;  %1794 = vst [vmem:[#allocation3 + $0x14] sm:$0x1] %v1793_v41  ;;  %v2176_v28 = vunpack.c.l.b16 %v2165_v25  ;;  %v2157_v31 = vld [vmem:[#allocation3 + $0xc] sm:$0xe]  ;;  %v5398_v24 = vld [vmem:[%s7290_s1 + $0x1a8] sm:$0xff]  ;;  %v5404_v25 = vld [vmem:[%s7290_s1 + $0x1d8] sm:$0xff] }
 0x254   :  { %v1901_v55 = vunpack.c.l.b16 %v1875_v50  ;;  %v1879_v62 = vrot.slane %v1877_v51, 4  ;;  %v1882_v7 = vrot.slane %v1880_v54, 5  ;;  %2271 = vmatpush.bf16.msra.mxu2 %v4544_v59  ;;  %v2168_v19 = vsel %vm5736_vm13, %v2166_v26, %v2167_v23  ;;  %v5377_v26 = vld [vmem:[%s7294_s5 + $0x80] sm:$0xff] }
 0x255   :  { %v2177_v27 = vunpack.c.l.b16 %v2168_v19  ;;  %v4540_v12 = vrot.slane %v2157_v31, 9  ;;  %v5405_v23 = vld [vmem:[%s7290_s1 + $0x1e0] sm:$0xff]  ;;  %v5416_v19 = vld [vmem:[%s7290_s1 + $0x238] sm:$0xff] }
 0x256   :  { %v1904_v58 = vpack.c.b16 %v1901_v55, %v1900_v4  ;;  %v1883_v2 = vor.u32 %v1882_v7, %v1879_v62  ;;  %v5382_v62 = vld [vmem:[%s7294_s5 + $0xa8] sm:$0xff]  ;;  %v5397_v33 = vld [vmem:[%s7290_s1 + $0x1a0] sm:$0xff] }
 0x257   :  { %v2180_v29 = vpack.c.b16 %v2177_v27, %v2176_v28  ;;  %v5390_v7 = vld [vmem:[%s7294_s5 + $0xe8] sm:$0xff]  ;;  %v5396_v27 = vld [vmem:[%s7290_s1 + $0x198] sm:$0xff] }
 0x258   :  { %1996 = vmatmul.bf16.vlgmr.msrb.gmra.mxu2 %v1904_v58  ;;  %2015 = vmatmul.bf16.vlgmr.msrb.gmra.mxu3 %v1904_v58  ;;  %v1884_v14 = vrot.slane %v1883_v2, 4  ;;  %v5380_v2 = vld [vmem:[%s7294_s5 + $0x98] sm:$0xff] }
 0x259   :  { %v5376_v63 = vld [vmem:[#allocation3 + $0xc] sm:$0xff] }
 0x25a   :  { %v1849_v53 = vld [vmem:[#allocation3 + $0x10] sm:$0xf]  ;;  %v1851_v1 = vld [vmem:[#allocation3 + $0x14] sm:$0x1]  ;;  %2131 = vmatmul.bf16.gmra.mxu0 %v5376_v63  ;;  %2150 = vmatmul.bf16.gmra.mxu1 %v5376_v63  ;;  %v5389_v63 = vld [vmem:[%s7294_s5 + $0xe0] sm:$0xff] }
 0x25b   :  { %v1886_v3 = vshll.u32 %v1849_v53, 16  ;;  %v1890_v5 = vshrl.u32 %v1849_v53, 16  ;;  %v1896_v13 = vshll.u32 %v1851_v1, 16  ;;  %v2171_v8 = vrot.slane %v1849_v53, 5 }
 0x25c   :  { %v2174_v34 = vrot.slane %v1851_v1, 5 }
 0x25d   :  { %v1888_v9 = vrot.slane %v1886_v3, 5  ;;  %v1892_v10 = vrot.slane %v1890_v5, 4  ;;  %v1898_v17 = vrot.slane %v1896_v13, 5  ;;  %v2173_v6 = vrot.slane %v2171_v8, 4  ;;  %v5388_v3 = vld [vmem:[%s7294_s5 + $0xd8] sm:$0xff]  ;;  %v5387_v13 = vld [vmem:[%s7294_s5 + $0xd0] sm:$0xff] }
 0x25e   :  { %v2172_v37 = vsel %vm5736_vm13, %v4540_v12, %v2171_v8  ;;  %v5408_v5 = vld [vmem:[%s7290_s1 + $0x1f8] sm:$0xff]  ;;  %v5415_v8 = vld [vmem:[%s7290_s1 + $0x230] sm:$0xff] }
 0x25f   :  { %v1893_v16 = vor.u32 %v1892_v10, %v1888_v9  ;;  %v1889_v21 = vsel %vm5742_vm14, %v1884_v14, %v1888_v9  ;;  %v2175_v48 = vsel %vm5736_vm13, %v2173_v6, %v2174_v34  ;;  %v2178_v39 = vunpack.c.l.b16 %v2172_v37  ;;  %v5400_v9 = vld [vmem:[%s7290_s1 + $0x1b8] sm:$0xff]  ;;  %v5379_v10 = vld [vmem:[%s7294_s5 + $0x90] sm:$0xff]  ;;  %2777 = vmatpush.bf16.msrb.mxu2 %v5408_v5  ;;  %v6792_v37 = vld [vmem:[#allocation2 + $0x4] sm:$0xf] }
 0x260   :  { %v1902_v36 = vunpack.c.l.b16 %v1889_v21  ;;  %v2179_v38 = vunpack.c.l.b16 %v2175_v48  ;;  %2856 = vmatpush.bf16.msrb.mxu3 %v5400_v9  ;;  %v5407_v21 = vld [vmem:[%s7290_s1 + $0x1f0] sm:$0xff]  ;;  %v2667_v48 = vld [vmem:[#allocation2] sm:$0xf]  ;;  %v2669_v5 = vld [vmem:[#allocation2 + $0xc] sm:$0xf] }
 0x261   :  { %v1894_v57 = vrot.slane %v1893_v16, 4  ;;  %v5403_v34 = vld [vmem:[%s7290_s1 + $0x1d0] sm:$0xff] }
 0x262   :  { %v2181_v40 = vpack.c.b16 %v2179_v38, %v2178_v39  ;;  %v5395_v12 = vld [vmem:[%s7290_s1 + $0x190] sm:$0xff]  ;;  %v2674_v38 = vshrl.u32 %v2667_v48, 16  ;;  %v2677_v39 = vshll.u32 %v2667_v48, 16 }
 0x263   :  { %v1899_v0 = vsel %vm5742_vm14, %v1894_v57, %v1898_v17  ;;  %v5399_v57 = vld [vmem:[%s7290_s1 + $0x1b0] sm:$0xff]  ;;  %2778 = vmatpush.bf16.msrb.mxu2 %v5407_v21  ;;  %v5378_v17 = vld [vmem:[%s7294_s5 + $0x88] sm:$0xff]  ;;  %v2698_v21 = vshrl.u32 %v2669_v5, 16 }
 0x264   :  { %v1903_v20 = vunpack.c.l.b16 %v1899_v0  ;;  %2857 = vmatpush.bf16.msrb.mxu3 %v5399_v57  ;;  %v5386_v0 = vld [vmem:[%s7294_s5 + $0xc8] sm:$0xff] }
 0x266   :  { %v1905_v22 = vpack.c.b16 %v1903_v20, %v1902_v36  ;;  %v5406_v36 = vld [vmem:[%s7290_s1 + $0x1e8] sm:$0xff] }
 0x267   :  { %2779 = vmatpush.bf16.msrb.mxu2 %v5406_v36 }
 0x268   :  { %2001 = vmatmul.bf16.gmra.mxu2 %v1905_v22  ;;  %2020 = vmatmul.bf16.gmra.mxu3 %v1905_v22 }
 0x269   :  { %2858 = vmatpush.bf16.msrb.mxu3 %v5398_v24 }
 0x26b   :  { %2780 = vmatpush.bf16.msrb.mxu2 %v5405_v23 }
 0x26d   :  { %2859 = vmatpush.bf16.msrb.mxu3 %v5397_v33 }
 0x26f   :  { %2781 = vmatpush.bf16.msrb.mxu2 %v5404_v25 }
 0x271   :  { %2860 = vmatpush.bf16.msrb.mxu3 %v5396_v27  ;;  %v2700_v27 = vrot.slane %v2698_v21, 4 }
 0x273   :  { %2782 = vmatpush.bf16.msrb.mxu2 %v5403_v34 }
 0x275   :  { %2861 = vmatpush.bf16.msrb.mxu3 %v5395_v12  ;;  %v5411_v12 = vld [vmem:[%s7290_s1 + $0x210] sm:$0xff] }
 0x278   :  { %2272 = vmatmul.bf16.vlgmr.msra.gmra.mxu2 %v2180_v29  ;;  %2291 = vmatmul.bf16.vlgmr.msra.gmra.mxu3 %v2180_v29 }
 0x288   :  { %2277 = vmatmul.bf16.gmra.mxu2 %v2181_v40  ;;  %2296 = vmatmul.bf16.gmra.mxu3 %v2181_v40  ;;  %v2683_v40 = vshll.u32 %v6792_v37, 16 }
 0x2ae   :  { %v1285_v41 = vpop.xlane.xlu0 %1284 }
 0x2af   :  { %v1286_v42 = vadd.f32 1e-12, %v1285_v41  ;;  %v2687_v41 = vshrl.u32 %v6792_v37, 16 }
 0x2b1   :  { %5502 = vrsqrt.f32 %v1286_v42  ;;  %vm1293_vm2 = vweird.f32 %v1286_v42 }
 0x2b7   :  { %v5503_v44 = vpop.eup %5502 }
 0x2b8   :  { %v1288_v46 = vmul.f32 %v5503_v44, %v1286_v42  ;;  %vm1294_vm1 = vweird.f32 %v5503_v44  ;;  %v5414_v42 = vld [vmem:[%s7290_s1 + $0x228] sm:$0xff] }
 0x2b9   :  { %vm1295_vm4 = vmor %vm1293_vm2, %vm1294_vm1 }
 0x2ba   :  { %v1289_v49 = vmul.f32 %v5503_v44, %v1288_v46  ;;  %v5394_v46 = vld [vmem:[%s7290_s1 + $0x188] sm:$0xff] }
 0x2bb   :  { %2862 = vmatpush.bf16.msrb.mxu3 %v5394_v46 }
 0x2bc   :  { %v1290_v50 = vmul.f32 0.5, %v1289_v49  ;;  %v2676_v49 = vrot.slane %v2674_v38, 4 }
 0x2be   :  { %v1291_v51 = vsub.f32 1.5, %v1290_v50  ;;  %v2679_v50 = vrot.slane %v2677_v39, 5 }
 0x2c0   :  { %v1292_v54 = vmul.f32 %v5503_v44, %v1291_v51  ;;  %v2685_v51 = vrot.slane %v2683_v40, 5 }
 0x2c2   :  { %v1296_v52 = vsel %vm1295_vm4, %v5503_v44, %v1292_v54  ;;  %v5402_v44 = vld [vmem:[%s7290_s1 + $0x1c8] sm:$0xff]  ;;  %v5413_v54 = vld [vmem:[%s7290_s1 + $0x220] sm:$0xff] }
 0x2c3   :  { %v1298_v4 = vrot.slane %v1296_v52, 1  ;;  %v1301_v56 = vmul.f32 %v1296_v52, %v6509_v30  ;;  %v5391_v30 = vld [vmem:[%s7294_s5 + $0xf0] sm:$0xff]  ;;  %v6808_v52 = vld [vmem:[#allocation2 + $0x8] sm:$0x1]  ;;  %2783 = vmatpush.bf16.msrb.mxu2 %v5402_v44 }
 0x2c4   :  { %2484 = vmatpush.bf16.msrb.mxu1 %v5391_v30  ;;  %v2693_v35 = vshll.u32 %v6808_v52, 16 }
 0x2c5   :  { %v1302_v55 = vmul.f32 %v1298_v4, %v6511_v15  ;;  %v5383_v15 = vld [vmem:[%s7294_s5 + $0xb0] sm:$0xff]  ;;  %v2689_v4 = vrot.slane %v2687_v41, 4 }
 0x2c6   :  { %2465 = vmatpush.bf16.msrb.mxu0 %v5383_v15 }
 0x2c7   :  { %v1305_v58 = vrot.slane %v1302_v55, 7  ;;  %v2127_v28 = vpop.f32.mrf.mxu0  ;;  %v2146_v29 = vpop.f32.mrf.mxu1  ;;  %v4402_v55 = vld [vmem:[%s7293_s4 + $0x2] sm:$0x3]  ;;  %v2690_v15 = vor.u32 %v2689_v4, %v2685_v51  ;;  %v5410_v4 = vld [vmem:[%s7290_s1 + $0x208] sm:$0xff] }
 0x2c8   :  { %2485 = vmatpush.bf16.msrb.mxu1 %v5390_v7 }
 0x2c9   :  { %v1306_v59 = vsel %vm1279_vm15, %v1305_v58, %v1301_v56 }
 0x2ca   :  { %1308 = vst [vmem:[#allocation4] sm:$0x3] %v1306_v59  ;;  %2466 = vmatpush.bf16.msrb.mxu0 %v5382_v62  ;;  %v2680_v59 = vor.u32 %v2679_v50, %v2676_v49 }
 0x2cc   :  { %2486 = vmatpush.bf16.msrb.mxu1 %v5389_v63  ;;  %v5393_v63 = vld [vmem:[%s7290_s1 + $0x180] sm:$0xff] }
 0x2cd   :  { %2863 = vmatpush.bf16.msrb.mxu3 %v5393_v63 }
 0x2ce   :  { %2467 = vmatpush.bf16.msrb.mxu0 %v5381_v18  ;;  %v5401_v18 = vld [vmem:[%s7290_s1 + $0x1c0] sm:$0xff] }
 0x2cf   :  { %v2129_v30 = vpop.f32.mrf.mxu0  ;;  %v2148_v62 = vpop.f32.mrf.mxu1  ;;  %2784 = vmatpush.bf16.msrb.mxu2 %v5401_v18  ;;  %v5409_v18 = vld [vmem:[%s7290_s1 + $0x200] sm:$0xff] }
 0x2d0   :  { %2487 = vmatpush.bf16.msrb.mxu1 %v5388_v3  ;;  %v2695_v3 = vrot.slane %v2693_v35, 5 }
 0x2d2   :  { %2468 = vmatpush.bf16.msrb.mxu0 %v5380_v2  ;;  %v2681_v2 = vrot.slane %v2680_v59, 4 }
 0x2d4   :  { %2488 = vmatpush.bf16.msrb.mxu1 %v5387_v13  ;;  %v6827_v13 = vld [vmem:[#allocation2 + $0x10] sm:$0xf]  ;;  %v2686_v57 = vsel %vm5742_vm14, %v2681_v2, %v2685_v51 }
 0x2d5   :  { %v2707_v36 = vshll.u32 %v6827_v13, 16  ;;  %v2711_v24 = vshrl.u32 %v6827_v13, 16  ;;  %v2721_v33 = vunpack.c.l.b16 %v2686_v57 }
 0x2d6   :  { %2469 = vmatpush.bf16.msrb.mxu0 %v5379_v10  ;;  %v2691_v10 = vrot.slane %v2690_v15, 4 }
 0x2d7   :  { %v2713_v48 = vrot.slane %v2711_v24, 4  ;;  %v2151_v59 = vpop.f32.mrf.mxu1 }
 0x2d8   :  { %2489 = vmatpush.bf16.msrb.mxu1 %v5386_v0  ;;  %v2701_v0 = vshll.u32 %v2669_v5, 16  ;;  %v2696_v23 = vsel %vm5742_vm14, %v2691_v10, %v2695_v3 }
 0x2d9   :  { %v2722_v25 = vunpack.c.l.b16 %v2696_v23 }
 0x2da   :  { %2470 = vmatpush.bf16.msrb.mxu0 %v5378_v17  ;;  %v6831_v17 = vld [vmem:[#allocation2 + $0x14] sm:$0x1] }
 0x2db   :  { %v6710_v53 = vpop.f32.mrf.mxu2  ;;  %v6712_v1 = vpop.f32.mrf.mxu3  ;;  %v2717_v38 = vshll.u32 %v6831_v17, 16 }
 0x2dc   :  { %2490 = vmatpush.bf16.msrb.mxu1 %v5385_v61  ;;  %v2128_v60 = vadd.f32 %v2127_v28, %v6710_v53  ;;  %v2147_v7 = vadd.f32 %v2146_v29, %v6712_v1  ;;  %v6822_v53 = vperm.slane %v4402_v55, 0  ;;  %v5412_v1 = vld [vmem:[%s7290_s1 + $0x218] sm:$0xff]  ;;  %v6835_v61 = vperm.slane %v4402_v55, 1  ;;  %s3811_s1 = sshll.u32 %s7296_s7, 4  ;;  %s3812_s1 = int_to_ptr.hbm [resolvable:$true] %s3811_s1 }
 0x2dd   :  { %v2703_v28 = vrot.slane %v2701_v0, 5  ;;  %v2709_v29 = vrot.slane %v2707_v36, 5  ;;  %v2719_v50 = vrot.slane %v2717_v38, 5  ;;  %v5418_v36 = vld [vmem:[#allocation2 + $0xc] sm:$0xff] }
 0x2de   :  { %2471 = vmatpush.bf16.msrb.mxu0 %v5377_v26 }
 0x2df   :  { %v2704_v44 = vor.u32 %v2703_v28, %v2700_v27 }
 0x2e1   :  { %v2705_v55 = vrot.slane %v2704_v44, 4 }
 0x2e2   :  { %2951 = vmatpush.bf16.msra.mxu0 %v5416_v19  ;;  %v5417_v19 = vld [vmem:[#allocation2] sm:$0xff] }
 0x2e3   :  { %v6732_v14 = vpop.f32.mrf.mxu2  ;;  %v6734_v16 = vpop.f32.mrf.mxu3  ;;  %2864 = vmatmul.bf16.vlgmr.msrb.gmra.mxu3 %v5417_v19  ;;  %v2710_v63 = vsel %vm5742_vm14, %v2705_v55, %v2709_v29 }
 0x2e4   :  { %v2149_v34 = vadd.f32 %v2148_v62, %v6734_v16  ;;  %v2714_v16 = vor.u32 %v2713_v48, %v2709_v29 }
 0x2e6   :  { %2952 = vmatpush.bf16.msra.mxu0 %v5415_v8  ;;  %v2130_v8 = vadd.f32 %v2129_v30, %v6732_v14 }
 0x2ea   :  { %2953 = vmatpush.bf16.msra.mxu0 %v5414_v42  ;;  %v2725_v42 = vpack.c.b16 %v2722_v25, %v2721_v33 }
 0x2eb   :  { %v6751_v20 = vpop.f32.mrf.mxu2  ;;  %v6753_v22 = vpop.f32.mrf.mxu3 }
 0x2ec   :  { %2785 = vmatmul.bf16.vlgmr.msrb.gmra.mxu2 %v2725_v42  ;;  %v2152_v21 = vadd.f32 %v2151_v59, %v6753_v22  ;;  %v2886_v42 = vrot.slane %v6808_v52, 5 }
 0x2ee   :  { %2954 = vmatpush.bf16.msra.mxu0 %v5413_v54 }
 0x2f2   :  { %2955 = vmatpush.bf16.msra.mxu0 %v5412_v1 }
 0x2f3   :  { %v6782_v6 = vpop.f32.mrf.mxu2  ;;  %v6784_v31 = vpop.f32.mrf.mxu3  ;;  %2869 = vmatmul.bf16.gmra.mxu3 %v5418_v36 }
 0x2f6   :  { %2956 = vmatpush.bf16.msra.mxu0 %v5411_v12 }
 0x2fa   :  { %2957 = vmatpush.bf16.msra.mxu0 %v5410_v4  ;;  %v2893_v4 = vrot.slane %v6831_v17, 5  ;;  %v5434_v17 = vld [vmem:[%s7292_s3 + $0x374] sm:$0xf0] }
 0x2fb   :  { %v2273_v56 = vpop.f32.mrf.mxu2  ;;  %v2292_v58 = vpop.f32.mrf.mxu3 }
 0x2fc   :  { %v2302_v9 = vadd.f32 %v2273_v56, %v2128_v60  ;;  %v2303_v26 = vadd.f32 %v2292_v58, %v2147_v7  ;;  %v2715_v56 = vrot.slane %v2714_v16, 4  ;;  %v2132_v58 = vpop.f32.mrf.mxu0 }
 0x2fd   :  { %v2133_v1 = vadd.f32 %v2132_v58, %v6751_v20 }
 0x2fe   :  { %v2315_v39 = vadd.f32 %v6822_v53, %v2302_v9  ;;  %v2316_v46 = vadd.f32 %v6835_v61, %v2303_v26  ;;  %v2720_v2 = vsel %vm5742_vm14, %v2715_v56, %v2719_v50  ;;  %v2723_v9 = vunpack.c.l.b16 %v2710_v63  ;;  %2958 = vmatpush.bf16.msra.mxu0 %v5409_v18  ;;  %v2153_v26 = vpop.f32.mrf.mxu1  ;;  %v2876_v50 = vld [vmem:[#allocation2 + $0xc] sm:$0xe]  ;;  %v5042_v18 = vld [vmem:[%s7292_s3 + $0x378] sm:$0xf0] }
 0x2ff   :  { %v2724_v10 = vunpack.c.l.b16 %v2720_v2  ;;  %v2154_v19 = vadd.f32 %v2153_v26, %v6784_v31  ;;  %v2883_v31 = vrot.slane %v6792_v37, 5  ;;  %v2890_v37 = vrot.slane %v6827_v13, 5  ;;  %v5040_v13 = vld [vmem:[%s7292_s3 + $0x370] sm:$0xf]  ;;  %v5430_v26 = vld [vmem:[%s7292_s3 + $0x354] sm:$0xf0] }
 0x300   :  { %v2323_v35 = vmax.f32 %v2315_v39, 0.0  ;;  %v2324_v60 = vmax.f32 %v2316_v46, 0.0 }
 0x301   :  { %v2726_v23 = vpack.c.b16 %v2724_v10, %v2723_v9  ;;  %v2885_v46 = vrot.slane %v2883_v31, 4  ;;  %v5032_v9 = vld [vmem:[%s7292_s3 + $0x360] sm:$0xf]  ;;  %v5432_v10 = vld [vmem:[%s7292_s3 + $0x364] sm:$0xf0] }
 0x303   :  { %v2275_v40 = vpop.f32.mrf.mxu2  ;;  %v2294_v41 = vpop.f32.mrf.mxu3  ;;  %2790 = vmatmul.bf16.gmra.mxu2 %v2726_v23  ;;  %v5429_v23 = vld [vmem:[%s7292_s3 + $0x354] sm:$0xf] }
 0x304   :  { %v2304_v49 = vadd.f32 %v2275_v40, %v2130_v8  ;;  %v2305_v14 = vadd.f32 %v2294_v41, %v2149_v34  ;;  %v2134_v24 = vpop.f32.mrf.mxu0  ;;  %v2875_v41 = vld [vmem:[#allocation2] sm:$0xe] }
 0x305   :  { %v2135_v33 = vadd.f32 %v2134_v24, %v6782_v6  ;;  %v4827_v44 = vrot.slane %v2875_v41, 9  ;;  %v5024_v24 = vld [vmem:[%s7292_s3 + $0x350] sm:$0xf]  ;;  %v5427_v41 = vld [vmem:[%s7292_s3 + $0x344] sm:$0xf] }
 0x306   :  { %v2317_v51 = vadd.f32 %v6822_v53, %v2304_v49  ;;  %v2318_v54 = vadd.f32 %v6835_v61, %v2305_v14 }
 0x308   :  { %v2325_v15 = vmax.f32 %v2317_v51, 0.0  ;;  %v2326_v30 = vmax.f32 %v2318_v54, 0.0  ;;  %v4828_v51 = vrot.slane %v2876_v50, 9  ;;  %v2892_v54 = vrot.slane %v2890_v37, 4  ;;  %v4962_v50 = vld [vmem:[%s7292_s3 + $0x3e8] sm:$0xf0] }
 0x30a   :  { %v2331_v62 = vpack.c.bf16 %v2325_v15, %v2323_v35  ;;  %v2332_v7 = vpack.c.bf16 %v2326_v30, %v2324_v60  ;;  %v2891_v52 = vsel %vm5736_vm13, %v4828_v51, %v2890_v37  ;;  %v2894_v55 = vsel %vm5736_vm13, %v2892_v54, %v2893_v4  ;;  %v5008_v51 = vld [vmem:[%s7292_s3 + $0x330] sm:$0xf]  ;;  %v5426_v54 = vld [vmem:[%s7292_s3 + $0x334] sm:$0xf0] }
 0x30b   :  { %v2278_v3 = vpop.f32.mrf.mxu2  ;;  %v2297_v5 = vpop.f32.mrf.mxu3  ;;  %v2897_v56 = vunpack.c.l.b16 %v2891_v52  ;;  %v2898_v58 = vunpack.c.l.b16 %v2894_v55 }
 0x30c   :  { %2472 = vmatmul.bf16.vlgmr.msrb.gmra.mxu0 %v2331_v62  ;;  %2491 = vmatmul.bf16.vlgmr.msrb.gmra.mxu1 %v2332_v7  ;;  %v2306_v57 = vadd.f32 %v2278_v3, %v2133_v1  ;;  %v2307_v0 = vadd.f32 %v2297_v5, %v2152_v21  ;;  %v5041_v62 = vor.u32 %v5434_v17, %v5040_v13  ;;  %v5433_v7 = vld [vmem:[%s7292_s3 + $0x374] sm:$0xf]  ;;  %v5431_v1 = vld [vmem:[%s7292_s3 + $0x364] sm:$0xf]  ;;  %v4952_v17 = vld [vmem:[%s7292_s3 + $0x3d0] sm:$0xf] }
 0x30d   :  { %v2900_v59 = vpack.c.b16 %v2898_v58, %v2897_v56  ;;  %v5045_v3 = vor.u32 %v5433_v7, %v5042_v18  ;;  %v5033_v21 = vor.u32 %v5432_v10, %v5032_v9  ;;  %v5009_v56 = vor.u32 %v5426_v54, %v5008_v51  ;;  %v5425_v58 = vld [vmem:[%s7292_s3 + $0x334] sm:$0xf]  ;;  %v4954_v7 = vld [vmem:[%s7292_s3 + $0x3d8] sm:$0xf0]  ;;  %v5000_v18 = vld [vmem:[%s7292_s3 + $0x320] sm:$0xf] }
 0x30e   :  { %v2319_v28 = vadd.f32 %v6822_v53, %v2306_v57  ;;  %v2320_v29 = vadd.f32 %v6835_v61, %v2307_v0  ;;  %3366 = vmatpush.bf16.msra.mxu3 %v5041_v62  ;;  %v5034_v57 = vld [vmem:[%s7292_s3 + $0x368] sm:$0xf0]  ;;  %v5423_v10 = vld [vmem:[%s7292_s3 + $0x324] sm:$0xf] }
 0x30f   :  { %3385 = vmatpush.bf16.msrb.mxu0 %v5045_v3  ;;  %v5037_v0 = vor.u32 %v5431_v1, %v5034_v57  ;;  %v5002_v1 = vld [vmem:[%s7292_s3 + $0x328] sm:$0xf0]  ;;  %v6990_v57 = vld [vmem:[%s7291_s2 + $0x2] ss:$0 sm:$0xff]  ;;  %v5419_v54 = vld [vmem:[%s7292_s3 + $0x304] sm:$0xf] }
 0x310   :  { %v2327_v12 = vmax.f32 %v2319_v28, 0.0  ;;  %v2328_v48 = vmax.f32 %v2320_v29, 0.0 }
 0x312   :  { %3367 = vmatpush.bf16.msra.mxu3 %v5033_v21 }
 0x313   :  { %v2280_v25 = vpop.f32.mrf.mxu2  ;;  %v2299_v27 = vpop.f32.mrf.mxu3  ;;  %3386 = vmatpush.bf16.msrb.mxu0 %v5037_v0  ;;  %v5005_v0 = vor.u32 %v5423_v10, %v5002_v1  ;;  %v5437_v1 = vld [vmem:[%s7292_s3 + $0x394] sm:$0xf] }
 0x314   :  { %v2308_v20 = vadd.f32 %v2280_v25, %v2135_v33  ;;  %v2309_v8 = vadd.f32 %v2299_v27, %v2154_v19  ;;  %v5025_v25 = vor.u32 %v5430_v26, %v5024_v24  ;;  %v5026_v27 = vld [vmem:[%s7292_s3 + $0x358] sm:$0xf0] }
 0x315   :  { %v5029_v28 = vor.u32 %v5429_v23, %v5026_v27  ;;  %v4944_v23 = vld [vmem:[%s7292_s3 + $0x3c0] sm:$0xf] }
 0x316   :  { %v2321_v22 = vadd.f32 %v6822_v53, %v2308_v20  ;;  %v2322_v34 = vadd.f32 %v6835_v61, %v2309_v8  ;;  %v2884_v53 = vsel %vm5736_vm13, %v4827_v44, %v2883_v31  ;;  %v2887_v61 = vsel %vm5736_vm13, %v2885_v46, %v2886_v42  ;;  %3368 = vmatpush.bf16.msra.mxu3 %v5025_v25  ;;  %v4968_v20 = vld [vmem:[%s7292_s3 + $0x3f0] sm:$0xf]  ;;  %v5450_v8 = vld [vmem:[%s7292_s3 + $0x3f4] sm:$0xf0]  ;;  %v5018_v42 = vld [vmem:[%s7292_s3 + $0x348] sm:$0xf0] }
 0x317   :  { %v2895_v49 = vunpack.c.l.b16 %v2884_v53  ;;  %v2896_v14 = vunpack.c.l.b16 %v2887_v61  ;;  %3387 = vmatpush.bf16.msrb.mxu0 %v5029_v28  ;;  %v5021_v46 = vor.u32 %v5427_v41, %v5018_v42  ;;  %v4960_v53 = vld [vmem:[%s7292_s3 + $0x3e0] sm:$0xf]  ;;  %v5448_v61 = vld [vmem:[%s7292_s3 + $0x3e4] sm:$0xf0]  ;;  %v4946_v28 = vld [vmem:[%s7292_s3 + $0x3c8] sm:$0xf0] }
 0x318   :  { %v2329_v38 = vmax.f32 %v2321_v22, 0.0  ;;  %v2330_v6 = vmax.f32 %v2322_v34, 0.0  ;;  %v5449_v22 = vld [vmem:[%s7292_s3 + $0x3f4] sm:$0xf]  ;;  %v4969_v34 = vor.u32 %v5450_v8, %v4968_v20  ;;  %v4961_v37 = vor.u32 %v5448_v61, %v4960_v53  ;;  %v5422_v20 = vld [vmem:[%s7292_s3 + $0x314] sm:$0xf0] }
 0x319   :  { %v2899_v16 = vpack.c.b16 %v2896_v14, %v2895_v49  ;;  %v5447_v49 = vld [vmem:[%s7292_s3 + $0x3e4] sm:$0xf]  ;;  %v4936_v41 = vld [vmem:[%s7292_s3 + $0x3b0] sm:$0xf]  ;;  %v5442_v42 = vld [vmem:[%s7292_s3 + $0x3b4] sm:$0xf0] }
 0x31a   :  { %v2333_v39 = vpack.c.bf16 %v2329_v38, %v2327_v12  ;;  %v2334_v40 = vpack.c.bf16 %v2330_v6, %v2328_v48  ;;  %v4970_v12 = vld [vmem:[%s7292_s3 + $0x3f8] sm:$0xf0]  ;;  %v5016_v48 = vld [vmem:[%s7292_s3 + $0x340] sm:$0xf]  ;;  %v5428_v38 = vld [vmem:[%s7292_s3 + $0x344] sm:$0xf0]  ;;  %3236 = vmatpush.bf16.msra.mxu1 %v4969_v34  ;;  %v4965_v55 = vor.u32 %v5447_v49, %v4962_v50  ;;  %v4937_v53 = vor.u32 %v5442_v42, %v4936_v41 }
 0x31b   :  { %3388 = vmatpush.bf16.msrb.mxu0 %v5021_v46  ;;  %v4938_v61 = vld [vmem:[%s7292_s3 + $0x3b8] sm:$0xf0]  ;;  %v4984_v49 = vld [vmem:[%s7292_s3 + $0x300] sm:$0xf] }
 0x31c   :  { %2477 = vmatmul.bf16.gmra.mxu0 %v2333_v39  ;;  %2496 = vmatmul.bf16.gmra.mxu1 %v2334_v40  ;;  %v4973_v39 = vor.u32 %v5449_v22, %v4970_v12  ;;  %v5017_v40 = vor.u32 %v5428_v38, %v5016_v48  ;;  %v5421_v48 = vld [vmem:[%s7292_s3 + $0x314] sm:$0xf]  ;;  %v4994_v38 = vld [vmem:[%s7292_s3 + $0x318] sm:$0xf0] }
 0x31e   :  { %3255 = vmatpush.bf16.msra.mxu2 %v4973_v39  ;;  %3369 = vmatpush.bf16.msra.mxu3 %v5017_v40  ;;  %v5500_v40 = vld [vmem:[%s7295_s6 + $0x1] ss:$0 sm:$0xff] }
 0x31f   :  { %3237 = vmatpush.bf16.msra.mxu1 %v4961_v37 }
 0x322   :  { %3256 = vmatpush.bf16.msra.mxu2 %v4965_v55  ;;  %3370 = vmatpush.bf16.msra.mxu3 %v5009_v56 }
 0x32c   :  { %2959 = vmatmul.bf16.vlgmr.msra.gmra.mxu0 %v2899_v16 }
 0x33c   :  { %2964 = vmatmul.bf16.gmra.mxu0 %v2900_v59  ;;  %v5010_v59 = vld [vmem:[%s7292_s3 + $0x338] sm:$0xf0] }
 0x366   :  { %v2865_v31 = vpop.f32.mrf.mxu3 }
 0x36e   :  { %v2867_v26 = vpop.f32.mrf.mxu3 }
 0x36f   :  { %v2786_v6 = vpop.f32.mrf.mxu2 }
 0x377   :  { %v2788_v24 = vpop.f32.mrf.mxu2 }
 0x378   :  { %v2868_v56 = vadd.f32 %v2867_v26, %v2788_v24 }
 0x389   :  { %v2473_v35 = vpop.f32.mrf.mxu0  ;;  %v2492_v60 = vpop.f32.mrf.mxu1 }
 0x38a   :  { %v2493_v63 = vadd.f32 %v2492_v60, %v2473_v35  ;;  %v5013_v60 = vor.u32 %v5425_v58, %v5010_v59  ;;  %v4928_v59 = vld [vmem:[%s7292_s3 + $0x3a0] sm:$0xf] }
 0x38c   :  { %3389 = vmatpush.bf16.msrb.mxu0 %v5013_v60  ;;  %v5439_v60 = vld [vmem:[%s7292_s3 + $0x3a4] sm:$0xf] }
 0x390   :  { %3390 = vmatpush.bf16.msrb.mxu0 %v5005_v0 }
 0x391   :  { %v2475_v15 = vpop.f32.mrf.mxu0  ;;  %v2494_v30 = vpop.f32.mrf.mxu1 }
 0x392   :  { %v2495_v2 = vadd.f32 %v2494_v30, %v2475_v15  ;;  %v5446_v15 = vld [vmem:[%s7292_s3 + $0x3d4] sm:$0xf0]  ;;  %v5445_v30 = vld [vmem:[%s7292_s3 + $0x3d4] sm:$0xf] }
 0x393   :  { %v4953_v62 = vor.u32 %v5446_v15, %v4952_v17  ;;  %v4930_v15 = vld [vmem:[%s7292_s3 + $0x3a8] sm:$0xf0] }
 0x394   :  { %v2502_v5 = vadd.f32 %v2495_v2, %v2493_v63  ;;  %v5424_v63 = vld [vmem:[%s7292_s3 + $0x324] sm:$0xf0]  ;;  %v2866_v2 = vadd.f32 %v2865_v31, %v2786_v6  ;;  %v4997_v6 = vor.u32 %v5421_v48, %v4994_v38  ;;  %v5466_v38 = vld [vmem:[%s7292_s3 + $0x474] sm:$0xf0] }
 0x395   :  { %v5001_v9 = vor.u32 %v5424_v63, %v5000_v18  ;;  %3238 = vmatpush.bf16.msra.mxu1 %v4953_v62  ;;  %v2791_v62 = vpop.f32.mrf.mxu2 }
 0x396   :  { %v2503_v36 = vrot.slane %v2502_v5, 4  ;;  %3391 = vmatpush.bf16.msrb.mxu0 %v4997_v6  ;;  %v5465_v6 = vld [vmem:[%s7292_s3 + $0x474] sm:$0xf] }
 0x397   :  { %3371 = vmatpush.bf16.msra.mxu3 %v5001_v9  ;;  %v4933_v9 = vor.u32 %v5439_v60, %v4930_v15  ;;  %v5462_v60 = vld [vmem:[%s7292_s3 + $0x454] sm:$0xf0] }
 0x398   :  { %v2504_v29 = vadd.f32 %v2503_v36, %v2502_v5  ;;  %v4957_v5 = vor.u32 %v5445_v30, %v4954_v7  ;;  %v2870_v7 = vpop.f32.mrf.mxu3 }
 0x399   :  { %v2478_v33 = vpop.f32.mrf.mxu0  ;;  %v2497_v19 = vpop.f32.mrf.mxu1 }
 0x39a   :  { %v2505_v44 = vrot.slane %v2504_v29, 2  ;;  %v2498_v4 = vadd.f32 %v2497_v19, %v2478_v33  ;;  %3257 = vmatpush.bf16.msra.mxu2 %v4957_v5  ;;  %v5444_v33 = vld [vmem:[%s7292_s3 + $0x3c4] sm:$0xf0]  ;;  %v5443_v19 = vld [vmem:[%s7292_s3 + $0x3c4] sm:$0xf] }
 0x39b   :  { %v4945_v27 = vor.u32 %v5444_v33, %v4944_v23  ;;  %v4949_v34 = vor.u32 %v5443_v19, %v4946_v28  ;;  %v5438_v5 = vld [vmem:[%s7292_s3 + $0x394] sm:$0xf0]  ;;  %v4912_v23 = vld [vmem:[%s7292_s3 + $0x380] sm:$0xf]  ;;  %v5436_v33 = vld [vmem:[%s7292_s3 + $0x384] sm:$0xf0] }
 0x39c   :  { %v2506_v35 = vadd.f32 %v2505_v44, %v2504_v29  ;;  %v4992_v29 = vld [vmem:[%s7292_s3 + $0x310] sm:$0xf]  ;;  %v5441_v44 = vld [vmem:[%s7292_s3 + $0x3b4] sm:$0xf]  ;;  %v3029_v19 = vld [vmem:[#allocation3] sm:$0xf]  ;;  %v4913_v48 = vor.u32 %v5436_v33, %v4912_v23 }
 0x39d   :  { %v4993_v12 = vor.u32 %v5422_v20, %v4992_v29  ;;  %3239 = vmatpush.bf16.msra.mxu1 %v4945_v27  ;;  %v4941_v50 = vor.u32 %v5441_v44, %v4938_v61  ;;  %v5435_v28 = vld [vmem:[%s7292_s3 + $0x384] sm:$0xf]  ;;  %v5098_v44 = vld [vmem:[%s7292_s3 + $0x460] sm:$0xf]  ;;  %v5460_v23 = vld [vmem:[%s7292_s3 + $0x444] sm:$0xf0] }
 0x39e   :  { %v2507_v21 = vrot.slane %v2506_v35, 1  ;;  %3258 = vmatpush.bf16.msra.mxu2 %v4949_v34  ;;  %v4914_v34 = vld [vmem:[%s7292_s3 + $0x388] sm:$0xf0] }
 0x39f   :  { %3372 = vmatpush.bf16.msra.mxu3 %v4993_v12  ;;  %v5106_v12 = vld [vmem:[%s7292_s3 + $0x470] sm:$0xf]  ;;  %v4917_v61 = vor.u32 %v5435_v28, %v4914_v34 }
 0x3a0   :  { %v2508_v46 = vadd.f32 %v2507_v21, %v2506_v35  ;;  %v5440_v35 = vld [vmem:[%s7292_s3 + $0x3a4] sm:$0xf0]  ;;  %v4922_v21 = vld [vmem:[%s7292_s3 + $0x398] sm:$0xf0]  ;;  %v5107_v42 = vor.u32 %v5466_v38, %v5106_v12 }
 0x3a1   :  { %v2480_v14 = vpop.f32.mrf.mxu0  ;;  %v2499_v16 = vpop.f32.mrf.mxu1  ;;  %3240 = vmatpush.bf16.msra.mxu1 %v4937_v53  ;;  %v4929_v17 = vor.u32 %v5440_v35, %v4928_v59  ;;  %v4925_v27 = vor.u32 %v5437_v1, %v4922_v21  ;;  %v5090_v35 = vld [vmem:[%s7292_s3 + $0x450] sm:$0xf] }
 0x3a2   :  { %v2500_v52 = vadd.f32 %v2499_v16, %v2480_v14  ;;  %v5420_v14 = vld [vmem:[%s7292_s3 + $0x304] sm:$0xf0]  ;;  %3259 = vmatpush.bf16.msra.mxu2 %v4941_v50  ;;  %v7056_v63 = vadd.f32 %v5500_v40, %v2508_v46  ;;  %v5463_v50 = vld [vmem:[%s7292_s3 + $0x464] sm:$0xf]  ;;  %v5091_v21 = vor.u32 %v5462_v60, %v5090_v35  ;;  %v5068_v60 = vld [vmem:[%s7292_s3 + $0x428] sm:$0xf0] }
 0x3a3   :  { %v4985_v51 = vor.u32 %v5420_v14, %v4984_v49  ;;  %v5464_v49 = vld [vmem:[%s7292_s3 + $0x464] sm:$0xf0]  ;;  %v5455_v35 = vld [vmem:[%s7292_s3 + $0x424] sm:$0xf] }
 0x3a4   :  { %v2509_v13 = vadd.f32 %v2500_v52, %v2498_v4  ;;  %v4986_v4 = vld [vmem:[%s7292_s3 + $0x308] sm:$0xf0] }
 0x3a5   :  { %v4989_v52 = vor.u32 %v5419_v54, %v4986_v4  ;;  %3373 = vmatpush.bf16.msra.mxu3 %v4985_v51  ;;  %3241 = vmatpush.bf16.msra.mxu1 %v4929_v17  ;;  %v5100_v51 = vld [vmem:[%s7292_s3 + $0x468] sm:$0xf0] }
 0x3a6   :  { %v2510_v3 = vrot.slane %v2509_v13, 4  ;;  %3260 = vmatpush.bf16.msra.mxu2 %v4933_v9 }
 0x3a7   :  { %3392 = vmatpush.bf16.msrb.mxu0 %v4989_v52  ;;  %v2793_v52 = vpop.f32.mrf.mxu2 }
 0x3a8   :  { %v2511_v36 = vadd.f32 %v2510_v3, %v2509_v13  ;;  %v4920_v3 = vld [vmem:[%s7292_s3 + $0x390] sm:$0xf] }
 0x3a9   :  { %v2960_v25 = vpop.f32.mrf.mxu0  ;;  %v4921_v10 = vor.u32 %v5438_v5, %v4920_v3  ;;  %v5092_v3 = vld [vmem:[%s7292_s3 + $0x458] sm:$0xf0] }
 0x3aa   :  { %v2512_v8 = vrot.slane %v2511_v36, 2  ;;  %v2970_v22 = vadd.f32 %v2960_v25, %v2866_v2  ;;  %v2871_v25 = vadd.f32 %v2870_v7, %v2791_v62  ;;  %3261 = vmatpush.bf16.msra.mxu2 %v4925_v27  ;;  %v3033_v62 = vld [vmem:[#allocation3 + $0x8] sm:$0x1] }
 0x3ab   :  { %3242 = vmatpush.bf16.msra.mxu1 %v4921_v10 }
 0x3ac   :  { %v2513_v31 = vadd.f32 %v2512_v8, %v2511_v36  ;;  %v2977_v39 = vadd.f32 %v6990_v57, %v2970_v22  ;;  %v2523_v8 = vmul.f32 %v7056_v63, %v7056_v63 }
 0x3ae   :  { %v2514_v16 = vrot.slane %v2513_v31, 1  ;;  %v2981_v37 = vmax.f32 %v2977_v39, 0.0  ;;  %3262 = vmatpush.bf16.msra.mxu2 %v4917_v61 }
 0x3af   :  { %3243 = vmatpush.bf16.msra.mxu1 %v4913_v48 }
 0x3b0   :  { %v2515_v55 = vadd.f32 %v2514_v16, %v2513_v31  ;;  %v2985_v58 = vpack.c.bf16 %v2981_v37, %v2981_v37  ;;  %v5108_v31 = vld [vmem:[%s7292_s3 + $0x478] sm:$0xf0] }
 0x3b1   :  { %v2962_v13 = vpop.f32.mrf.mxu0  ;;  %v5111_v37 = vor.u32 %v5465_v6, %v5108_v31  ;;  %v5074_v6 = vld [vmem:[%s7292_s3 + $0x430] sm:$0xf]  ;;  %v3036_v31 = vld [vmem:[#allocation3 + $0xc] sm:$0xf] }
 0x3b2   :  { %v2990_v30 = vshrl.u32 %v2985_v58, 16  ;;  %v2971_v18 = vadd.f32 %v2962_v13, %v2868_v56  ;;  %v7058_v2 = vadd.f32 %v5500_v40, %v2515_v55  ;;  %v2993_v36 = vshll.u32 %v2985_v58, 16  ;;  %v2872_v55 = vpop.f32.mrf.mxu3 }
 0x3b3   :  { %3512 = vmatpush.bf16.msrb.mxu1 %v5107_v42  ;;  %v5099_v58 = vor.u32 %v5464_v49, %v5098_v44  ;;  %3531 = vmatpush.bf16.msrb.mxu2 %v5111_v37  ;;  %v2873_v7 = vadd.f32 %v2872_v55, %v2793_v52  ;;  %v5066_v49 = vld [vmem:[%s7292_s3 + $0x420] sm:$0xf] }
 0x3b4   :  { %v2992_v0 = vrot.slane %v2990_v30, 7  ;;  %v2978_v24 = vadd.f32 %v6990_v57, %v2971_v18  ;;  %v2524_v26 = vmul.f32 %v7058_v2, %v7058_v2  ;;  %v5103_v30 = vor.u32 %v5463_v50, %v5100_v51  ;;  %v5461_v18 = vld [vmem:[%s7292_s3 + $0x454] sm:$0xf]  ;;  %v5456_v51 = vld [vmem:[%s7292_s3 + $0x424] sm:$0xf0] }
 0x3b6   :  { %v2995_v29 = vor.u32 %v2993_v36, %v2992_v0  ;;  %v2982_v20 = vmax.f32 %v2978_v24, 0.0  ;;  %v2527_v22 = vrot.slane %v2524_v26, 7  ;;  %v2996_v59 = vrot.slane %v2992_v0, 4  ;;  %v5082_v0 = vld [vmem:[%s7292_s3 + $0x440] sm:$0xf] }
 0x3b7   :  { %3513 = vmatpush.bf16.msrb.mxu1 %v5099_v58  ;;  %3532 = vmatpush.bf16.msrb.mxu2 %v5103_v30  ;;  %v5454_v30 = vld [vmem:[%s7292_s3 + $0x414] sm:$0xf0] }
 0x3b8   :  { %v3030_v39 = vsel %vm5667_vm8, %v2995_v29, %v3029_v19  ;;  %v2986_v40 = vpack.c.bf16 %v2982_v20, %v2982_v20  ;;  %v2528_v41 = vsel %vm1279_vm15, %v2527_v22, %v2523_v8  ;;  %v5083_v20 = vor.u32 %v5460_v23, %v5082_v0  ;;  %v5459_v8 = vld [vmem:[%s7292_s3 + $0x444] sm:$0xf]  ;;  %v5084_v22 = vld [vmem:[%s7292_s3 + $0x448] sm:$0xf0]  ;;  %v5060_v23 = vld [vmem:[%s7292_s3 + $0x418] sm:$0xf0] }
 0x3b9   :  { %3031 = vst [vmem:[#allocation3] sm:$0xf] %v3030_v39  ;;  %v2965_v46 = vpop.f32.mrf.mxu0  ;;  %v2530_v53 = vsel %vm1282_vm0, %v2528_v41, 0.0  ;;  %v5087_v39 = vor.u32 %v5459_v8, %v5084_v22  ;;  %v5076_v41 = vld [vmem:[%s7292_s3 + $0x438] sm:$0xf0] }
 0x3ba   :  { %v2998_v14 = vshrl.u32 %v2986_v40, 16  ;;  %v2972_v16 = vadd.f32 %v2965_v46, %v2871_v25  ;;  %2531 = vadd.xlane.f32.xlu0 %v2530_v53  ;;  %v3001_v4 = vshll.u32 %v2986_v40, 16  ;;  %v5095_v25 = vor.u32 %v5461_v18, %v5092_v3  ;;  %v5457_v40 = vld [vmem:[%s7292_s3 + $0x434] sm:$0xf]  ;;  %v3040_v3 = vld [vmem:[#allocation3 + $0x14] sm:$0x1] }
 0x3bb   :  { %3514 = vmatpush.bf16.msrb.mxu1 %v5091_v21  ;;  %v5079_v55 = vor.u32 %v5457_v40, %v5076_v41  ;;  %v5453_v21 = vld [vmem:[%s7292_s3 + $0x414] sm:$0xf]  ;;  %v5451_v22 = vld [vmem:[%s7292_s3 + $0x404] sm:$0xf] }
 0x3bc   :  { %v3000_v54 = vrot.slane %v2998_v14, 7  ;;  %v2979_v56 = vadd.f32 %v6990_v57, %v2972_v16  ;;  %3533 = vmatpush.bf16.msrb.mxu2 %v5095_v25 }
 0x3be   :  { %v3003_v13 = vor.u32 %v3001_v4, %v3000_v54  ;;  %v3005_v17 = vrot.slane %v3000_v54, 4  ;;  %v2983_v15 = vmax.f32 %v2979_v56, 0.0 }
 0x3bf   :  { %3515 = vmatpush.bf16.msrb.mxu1 %v5083_v20 }
 0x3c0   :  { %v3004_v5 = vsel %vm5655_vm7, %v2996_v59, %v3003_v13  ;;  %v3034_v9 = vsel %vm5612_vm3, %v3005_v17, %v3033_v62  ;;  %v2987_v10 = vpack.c.bf16 %v2983_v15, %v2983_v15  ;;  %v3094_v1 = vld [vmem:[#allocation3] sm:$0xf]  ;;  %3534 = vmatpush.bf16.msrb.mxu2 %v5087_v39  ;;  %v5067_v59 = vor.u32 %v5456_v51, %v5066_v49  ;;  %v5058_v15 = vld [vmem:[%s7292_s3 + $0x410] sm:$0xf] }
 0x3c1   :  { %3032 = vst [vmem:[#allocation3 + $0x4] sm:$0xf] %v3004_v5  ;;  %v2967_v36 = vpop.f32.mrf.mxu0  ;;  %v3101_v24 = vshrl.u32 %v3094_v1, 16  ;;  %v3104_v26 = vshll.u32 %v3094_v1, 16  ;;  %v5071_v1 = vor.u32 %v5455_v35, %v5068_v60 }
 0x3c2   :  { %3035 = vst [vmem:[#allocation3 + $0x8] sm:$0x1] %v3034_v9  ;;  %v3007_v33 = vshrl.u32 %v2987_v10, 16  ;;  %v2973_v19 = vadd.f32 %v2967_v36, %v2873_v7  ;;  %v3010_v28 = vshll.u32 %v2987_v10, 16 }
 0x3c3   :  { %v3103_v34 = vrot.slane %v3101_v24, 4  ;;  %v3106_v12 = vrot.slane %v3104_v26, 5  ;;  %v5059_v26 = vor.u32 %v5454_v30, %v5058_v15 }
 0x3c4   :  { %v3009_v27 = vrot.slane %v3007_v33, 7  ;;  %v2980_v29 = vadd.f32 %v6990_v57, %v2973_v19  ;;  %v5458_v57 = vld [vmem:[%s7292_s3 + $0x434] sm:$0xf0]  ;;  %3535 = vmatpush.bf16.msrb.mxu2 %v5079_v55  ;;  %v5050_v33 = vld [vmem:[%s7292_s3 + $0x400] sm:$0xf] }
 0x3c5   :  { %v5075_v61 = vor.u32 %v5458_v57, %v5074_v6  ;;  %v3107_v16 = vor.u32 %v3106_v12, %v3103_v34  ;;  %v5051_v8 = vor.u32 %v5452_v11, %v5050_v33  ;;  %v5052_v34 = vld [vmem:[%s7292_s3 + $0x408] sm:$0xf0] }
 0x3c6   :  { %v3012_v48 = vor.u32 %v3010_v28, %v3009_v27  ;;  %v2984_v38 = vmax.f32 %v2980_v29, 0.0  ;;  %v3013_v62 = vrot.slane %v3009_v27, 4  ;;  %v5063_v29 = vor.u32 %v5453_v21, %v5060_v23 }
 0x3c7   :  { %3516 = vmatpush.bf16.msrb.mxu1 %v5075_v61  ;;  %v3108_v13 = vrot.slane %v3107_v16, 4 }
 0x3c8   :  { %v3037_v42 = vsel %vm5667_vm8, %v3012_v48, %v3036_v31  ;;  %v2988_v44 = vpack.c.bf16 %v2984_v38, %v2984_v38  ;;  %v5467_v46 = vld [vmem:[#allocation3] sm:$0xff]  ;;  %3536 = vmatpush.bf16.msrb.mxu2 %v5071_v1  ;;  %v5055_v38 = vor.u32 %v5451_v22, %v5052_v34  ;;  %v5482_v22 = vld [vmem:[%s7294_s5 + $0x168] sm:$0xff] }
 0x3c9   :  { %v7161_v53 = vld [vmem:[#allocation3 + $0x4] sm:$0xf]  ;;  %3038 = vst [vmem:[#allocation3 + $0xc] sm:$0xf] %v3037_v42  ;;  %v7166_v14 = vld [vmem:[#allocation3 + $0x8] sm:$0x1]  ;;  %3374 = vmatmul.bf16.vlgmr.msra.gmra.mxu3 %v5467_v46  ;;  %3393 = vmatmul.bf16.vlgmr.msrb.gmra.mxu0 %v5467_v46 }
 0x3ca   :  { %v3110_v37 = vshll.u32 %v7161_v53, 16  ;;  %v3114_v50 = vshrl.u32 %v7161_v53, 16  ;;  %v3015_v43 = vshrl.u32 %v2988_v44, 16  ;;  %v3120_v52 = vshll.u32 %v7166_v14, 16  ;;  %v5472_v34 = vld [vmem:[%s7294_s5 + $0x118] sm:$0xff] }
 0x3cb   :  { %v3018_v58 = vshll.u32 %v2988_v44, 16  ;;  %3517 = vmatpush.bf16.msrb.mxu1 %v5067_v59 }
 0x3cc   :  { %v3112_v54 = vrot.slane %v3110_v37, 5  ;;  %v3116_v4 = vrot.slane %v3114_v50, 4  ;;  %v3017_v56 = vrot.slane %v3015_v43, 7  ;;  %v3122_v10 = vrot.slane %v3120_v52, 5  ;;  %3537 = vmatpush.bf16.msrb.mxu2 %v5063_v29  ;;  %v5474_v29 = vld [vmem:[%s7294_s5 + $0x128] sm:$0xff] }
 0x3cd   :  { %v3412_v52 = vrot.slane %v7161_v53, 5 }
 0x3ce   :  { %v3117_v17 = vor.u32 %v3116_v4, %v3112_v54  ;;  %v3020_v7 = vor.u32 %v3018_v58, %v3017_v56  ;;  %v3022_v18 = vrot.slane %v3017_v56, 4  ;;  %v3113_v5 = vsel %vm5742_vm14, %v3108_v13, %v3112_v54  ;;  %v3404_v56 = vld [vmem:[#allocation3] sm:$0xe] }
 0x3cf   :  { %v3148_v27 = vunpack.c.l.b16 %v3113_v5  ;;  %3518 = vmatpush.bf16.msrb.mxu1 %v5059_v26  ;;  %v3414_v55 = vrot.slane %v3412_v52, 4  ;;  %v3415_v58 = vrot.slane %v7166_v14, 5  ;;  %v5046_v59 = vrot.slane %v3404_v56, 9 }
 0x3d0   :  { %v3118_v9 = vrot.slane %v3117_v17, 4  ;;  %v3021_v0 = vsel %vm5655_vm7, %v3013_v62, %v3020_v7  ;;  %v3041_v36 = vsel %vm5612_vm3, %v3022_v18, %v3040_v3  ;;  %v3096_v24 = vld [vmem:[#allocation3 + $0xc] sm:$0xf]  ;;  %3538 = vmatpush.bf16.msrb.mxu2 %v5055_v38  ;;  %v5471_v38 = vld [vmem:[%s7294_s5 + $0x110] sm:$0xff] }
 0x3d1   :  { %3039 = vst [vmem:[#allocation3 + $0x10] sm:$0xf] %v3021_v0  ;;  %v3125_v32 = vshrl.u32 %v3096_v24, 16  ;;  %v3128_v25 = vshll.u32 %v3096_v24, 16  ;;  %v3416_v35 = vsel %vm5736_vm13, %v3414_v55, %v3415_v58  ;;  %v3413_v60 = vsel %vm5736_vm13, %v5046_v59, %v3412_v52  ;;  %v3405_v30 = vld [vmem:[#allocation3 + $0xc] sm:$0xe] }
 0x3d2   :  { %v3123_v19 = vsel %vm5742_vm14, %v3118_v9, %v3122_v10  ;;  %3042 = vst [vmem:[#allocation3 + $0x14] sm:$0x1] %v3041_v36  ;;  %v3425_v47 = vunpack.c.l.b16 %v3416_v35  ;;  %v3424_v13 = vunpack.c.l.b16 %v3413_v60  ;;  %v5047_v7 = vrot.slane %v3405_v30, 9 }
 0x3d3   :  { %v3149_v28 = vunpack.c.l.b16 %v3123_v19  ;;  %v3127_v12 = vrot.slane %v3125_v32, 4  ;;  %v3130_v48 = vrot.slane %v3128_v25, 5  ;;  %3519 = vmatpush.bf16.msrb.mxu1 %v5051_v8  ;;  %v5476_v32 = vld [vmem:[%s7294_s5 + $0x138] sm:$0xff] }
 0x3d4   :  { %v3428_v17 = vpack.c.b16 %v3425_v47, %v3424_v13  ;;  %3712 = vmatpush.bf16.msrb.mxu3 %v5476_v32 }
 0x3d5   :  { %v3152_v20 = vpack.c.b16 %v3149_v28, %v3148_v27  ;;  %v3131_v39 = vor.u32 %v3130_v48, %v3127_v12  ;;  %v5475_v27 = vld [vmem:[%s7294_s5 + $0x130] sm:$0xff]  ;;  %v5481_v48 = vld [vmem:[%s7294_s5 + $0x160] sm:$0xff] }
 0x3d7   :  { %3244 = vmatmul.bf16.vlgmr.msra.gmra.mxu1 %v3152_v20  ;;  %3263 = vmatmul.bf16.vlgmr.msra.gmra.mxu2 %v3152_v20  ;;  %v3132_v61 = vrot.slane %v3131_v39, 4  ;;  %v5473_v20 = vld [vmem:[%s7294_s5 + $0x120] sm:$0xff]  ;;  %v5470_v39 = vld [vmem:[%s7294_s5 + $0x108] sm:$0xff] }
 0x3d8   :  { %v5468_v6 = vld [vmem:[#allocation3 + $0xc] sm:$0xff]  ;;  %3713 = vmatpush.bf16.msrb.mxu3 %v5475_v27 }
 0x3d9   :  { %v3097_v57 = vld [vmem:[#allocation3 + $0x10] sm:$0xf]  ;;  %v3099_v31 = vld [vmem:[#allocation3 + $0x14] sm:$0x1]  ;;  %3379 = vmatmul.bf16.gmra.mxu3 %v5468_v6  ;;  %3398 = vmatmul.bf16.gmra.mxu0 %v5468_v6 }
 0x3da   :  { %v3134_v40 = vshll.u32 %v3097_v57, 16  ;;  %v3138_v41 = vshrl.u32 %v3097_v57, 16  ;;  %v3144_v46 = vshll.u32 %v3099_v31, 16  ;;  %v3419_v15 = vrot.slane %v3097_v57, 5 }
 0x3db   :  { %v3422_v62 = vrot.slane %v3099_v31, 5  ;;  %v5480_v31 = vld [vmem:[%s7294_s5 + $0x158] sm:$0xff] }
 0x3dc   :  { %v3136_v42 = vrot.slane %v3134_v40, 5  ;;  %v3140_v44 = vrot.slane %v3138_v41, 4  ;;  %v3146_v50 = vrot.slane %v3144_v46, 5  ;;  %v3421_v53 = vrot.slane %v3419_v15, 4  ;;  %3714 = vmatpush.bf16.msrb.mxu3 %v5474_v29  ;;  %v5479_v41 = vld [vmem:[%s7294_s5 + $0x150] sm:$0xff] }
 0x3dd   :  { %v3420_v18 = vsel %vm5736_vm13, %v5047_v7, %v3419_v15 }
 0x3de   :  { %v3141_v49 = vor.u32 %v3140_v44, %v3136_v42  ;;  %v3137_v16 = vsel %vm5742_vm14, %v3132_v61, %v3136_v42  ;;  %v3423_v14 = vsel %vm5736_vm13, %v3421_v53, %v3422_v62  ;;  %v3426_v5 = vunpack.c.l.b16 %v3420_v18  ;;  %v5469_v42 = vld [vmem:[%s7294_s5 + $0x100] sm:$0xff]  ;;  %v5478_v44 = vld [vmem:[%s7294_s5 + $0x148] sm:$0xff] }
 0x3df   :  { %v3150_v51 = vunpack.c.l.b16 %v3137_v16  ;;  %v3427_v3 = vunpack.c.l.b16 %v3423_v14  ;;  %v5477_v16 = vld [vmem:[%s7294_s5 + $0x140] sm:$0xff] }
 0x3e0   :  { %v3142_v37 = vrot.slane %v3141_v49, 4  ;;  %3715 = vmatpush.bf16.msrb.mxu3 %v5473_v20 }
 0x3e1   :  { %v3429_v9 = vpack.c.b16 %v3427_v3, %v3426_v5 }
 0x3e2   :  { %v3147_v43 = vsel %vm5742_vm14, %v3142_v37, %v3146_v50 }
 0x3e3   :  { %v3151_v54 = vunpack.c.l.b16 %v3147_v43 }
 0x3e4   :  { %3716 = vmatpush.bf16.msrb.mxu3 %v5472_v34 }
 0x3e5   :  { %v3153_v4 = vpack.c.b16 %v3151_v54, %v3150_v51  ;;  %v4909_v54 = vld [vmem:[%s7293_s4 + $0x4] sm:$0x3] }
 0x3e6   :  { %v3559_v55 = vperm.slane %v4909_v54, 0  ;;  %v3560_v15 = vperm.slane %v4909_v54, 1 }
 0x3e7   :  { %3249 = vmatmul.bf16.gmra.mxu1 %v3153_v4  ;;  %3268 = vmatmul.bf16.gmra.mxu2 %v3153_v4 }
 0x3e8   :  { %3717 = vmatpush.bf16.msrb.mxu3 %v5471_v38 }
 0x3ec   :  { %3718 = vmatpush.bf16.msrb.mxu3 %v5470_v39 }
 0x3f0   :  { %3719 = vmatpush.bf16.msrb.mxu3 %v5469_v42 }
 0x3f7   :  { %3520 = vmatmul.bf16.vlgmr.msrb.gmra.mxu1 %v3428_v17  ;;  %3539 = vmatmul.bf16.vlgmr.msrb.gmra.mxu2 %v3428_v17 }
 0x407   :  { %3525 = vmatmul.bf16.gmra.mxu1 %v3429_v9  ;;  %3544 = vmatmul.bf16.gmra.mxu2 %v3429_v9 }
 0x42d   :  { %v2532_v10 = vpop.xlane.xlu0 %2531 }
 0x42e   :  { %v2533_v1 = vadd.f32 1e-12, %v2532_v10 }
 0x430   :  { %5504 = vrsqrt.f32 %v2533_v1  ;;  %vm2540_vm5 = vweird.f32 %v2533_v1 }
 0x436   :  { %v5505_v21 = vpop.eup %5504 }
 0x437   :  { %v2535_v0 = vmul.f32 %v5505_v21, %v2533_v1  ;;  %vm2541_vm3 = vweird.f32 %v5505_v21 }
 0x438   :  { %vm2542_vm6 = vmor %vm2540_vm5, %vm2541_vm3 }
 0x439   :  { %v2536_v36 = vmul.f32 %v5505_v21, %v2535_v0 }
 0x43b   :  { %v2537_v24 = vmul.f32 0.5, %v2536_v36 }
 0x43d   :  { %v2538_v26 = vsub.f32 1.5, %v2537_v24 }
 0x43f   :  { %v2539_v23 = vmul.f32 %v5505_v21, %v2538_v26 }
 0x441   :  { %v2543_v33 = vsel %vm2542_vm6, %v5505_v21, %v2539_v23 }
 0x442   :  { %v2545_v45 = vrot.slane %v2543_v33, 1  ;;  %v2548_v25 = vmul.f32 %v2543_v33, %v7056_v63  ;;  %v5483_v63 = vld [vmem:[%s7294_s5 + $0x170] sm:$0xff] }
 0x444   :  { %v2549_v19 = vmul.f32 %v2545_v45, %v7058_v2  ;;  %v5484_v2 = vld [vmem:[%s7294_s5 + $0x178] sm:$0xff] }
 0x445   :  { %3731 = vmatpush.bf16.msra.mxu0 %v5484_v2  ;;  %5485 = vmatpush.bf16.msra.mxu1 %v5484_v2 }
 0x446   :  { %v2552_v11 = vrot.slane %v2549_v19, 7  ;;  %v3394_v37 = vpop.f32.mrf.mxu0 }
 0x448   :  { %v2553_v28 = vsel %vm1279_vm15, %v2552_v11, %v2548_v25 }
 0x449   :  { %2556 = vst [vmem:[#allocation4 + $0x2] sm:$0x3] %v2553_v28  ;;  %3732 = vmatpush.bf16.msra.mxu0 %v5483_v63  ;;  %5486 = vmatpush.bf16.msra.mxu1 %v5483_v63 }
 0x44c   :  { %v3375_v61 = vpop.f32.mrf.mxu3 }
 0x44d   :  { %3733 = vmatpush.bf16.msra.mxu0 %v5482_v22  ;;  %5487 = vmatpush.bf16.msra.mxu1 %v5482_v22 }
 0x44e   :  { %v3396_v59 = vpop.f32.mrf.mxu0 }
 0x451   :  { %3734 = vmatpush.bf16.msra.mxu0 %v5481_v48  ;;  %5488 = vmatpush.bf16.msra.mxu1 %v5481_v48 }
 0x454   :  { %v3245_v8 = vpop.f32.mrf.mxu1  ;;  %v3377_v51 = vpop.f32.mrf.mxu3 }
 0x455   :  { %3735 = vmatpush.bf16.msra.mxu0 %v5480_v31  ;;  %5489 = vmatpush.bf16.msra.mxu1 %v5480_v31  ;;  %v3376_v4 = vadd.f32 %v3375_v61, %v3245_v8 }
 0x456   :  { %v3399_v21 = vpop.f32.mrf.mxu0 }
 0x459   :  { %3736 = vmatpush.bf16.msra.mxu0 %v5479_v41  ;;  %5490 = vmatpush.bf16.msra.mxu1 %v5479_v41 }
 0x45a   :  { %v3264_v12 = vpop.f32.mrf.mxu2 }
 0x45b   :  { %v3395_v60 = vadd.f32 %v3394_v37, %v3264_v12 }
 0x45c   :  { %v3247_v6 = vpop.f32.mrf.mxu1  ;;  %v3380_v30 = vpop.f32.mrf.mxu3 }
 0x45d   :  { %3737 = vmatpush.bf16.msra.mxu0 %v5478_v44  ;;  %5491 = vmatpush.bf16.msra.mxu1 %v5478_v44  ;;  %v3378_v58 = vadd.f32 %v3377_v51, %v3247_v6 }
 0x45e   :  { %v3401_v29 = vpop.f32.mrf.mxu0 }
 0x461   :  { %3738 = vmatpush.bf16.msra.mxu0 %v5477_v16  ;;  %5492 = vmatpush.bf16.msra.mxu1 %v5477_v16 }
 0x462   :  { %v3266_v57 = vpop.f32.mrf.mxu2 }
 0x463   :  { %v3397_v62 = vadd.f32 %v3396_v59, %v3266_v57 }
 0x464   :  { %v3250_v40 = vpop.f32.mrf.mxu1  ;;  %v3382_v33 = vpop.f32.mrf.mxu3 }
 0x465   :  { %v3381_v0 = vadd.f32 %v3380_v30, %v3250_v40 }
 0x46a   :  { %v3269_v46 = vpop.f32.mrf.mxu2 }
 0x46b   :  { %v3400_v25 = vadd.f32 %v3399_v21, %v3269_v46 }
 0x46c   :  { %v3252_v49 = vpop.f32.mrf.mxu1 }
 0x46d   :  { %v3383_v19 = vadd.f32 %v3382_v33, %v3252_v49 }
 0x472   :  { %v3271_v50 = vpop.f32.mrf.mxu2 }
 0x473   :  { %v3402_v63 = vadd.f32 %v3401_v29, %v3271_v50 }
 0x474   :  { %v3521_v43 = vpop.f32.mrf.mxu1 }
 0x475   :  { %v3550_v52 = vadd.f32 %v3521_v43, %v3376_v4 }
 0x477   :  { %v3563_v47 = vadd.f32 %v3559_v55, %v3550_v52 }
 0x479   :  { %v3571_v7 = vmax.f32 %v3563_v47, 0.0 }
 0x47a   :  { %v3540_v56 = vpop.f32.mrf.mxu2 }
 0x47b   :  { %v3551_v17 = vadd.f32 %v3540_v56, %v3395_v60 }
 0x47c   :  { %v3523_v35 = vpop.f32.mrf.mxu1 }
 0x47d   :  { %v3552_v13 = vadd.f32 %v3523_v35, %v3378_v58  ;;  %v3564_v3 = vadd.f32 %v3560_v15, %v3551_v17 }
 0x47f   :  { %v3565_v53 = vadd.f32 %v3559_v55, %v3552_v13  ;;  %v3572_v36 = vmax.f32 %v3564_v3, 0.0 }
 0x481   :  { %v3573_v14 = vmax.f32 %v3565_v53, 0.0 }
 0x482   :  { %v3542_v18 = vpop.f32.mrf.mxu2 }
 0x483   :  { %v3579_v5 = vpack.c.bf16 %v3573_v14, %v3571_v7  ;;  %v3553_v9 = vadd.f32 %v3542_v18, %v3397_v62 }
 0x484   :  { %v3526_v10 = vpop.f32.mrf.mxu1 }
 0x485   :  { %v3566_v1 = vadd.f32 %v3560_v15, %v3553_v9  ;;  %3720 = vmatmul.bf16.vlgmr.msrb.gmra.mxu3 %v3579_v5  ;;  %v3554_v23 = vadd.f32 %v3526_v10, %v3381_v0 }
 0x487   :  { %v3574_v24 = vmax.f32 %v3566_v1, 0.0  ;;  %v3567_v11 = vadd.f32 %v3559_v55, %v3554_v23 }
 0x489   :  { %v3580_v26 = vpack.c.bf16 %v3574_v24, %v3572_v36  ;;  %v3575_v20 = vmax.f32 %v3567_v11, 0.0 }
 0x48a   :  { %v3545_v45 = vpop.f32.mrf.mxu2 }
 0x48b   :  { %3739 = vmatmul.bf16.vlgmr.msra.gmra.mxu0 %v3580_v26  ;;  %v3555_v28 = vadd.f32 %v3545_v45, %v3400_v25 }
 0x48c   :  { %v3528_v32 = vpop.f32.mrf.mxu1 }
 0x48d   :  { %v3556_v27 = vadd.f32 %v3528_v32, %v3383_v19  ;;  %v3568_v34 = vadd.f32 %v3560_v15, %v3555_v28 }
 0x48f   :  { %v3569_v2 = vadd.f32 %v3559_v55, %v3556_v27  ;;  %v3576_v6 = vmax.f32 %v3568_v34, 0.0 }
 0x491   :  { %v3577_v8 = vmax.f32 %v3569_v2, 0.0 }
 0x492   :  { %v3547_v22 = vpop.f32.mrf.mxu2 }
 0x493   :  { %v3557_v12 = vadd.f32 %v3547_v22, %v3402_v63  ;;  %v3581_v48 = vpack.c.bf16 %v3577_v8, %v3575_v20 }
 0x495   :  { %v3570_v38 = vadd.f32 %v3560_v15, %v3557_v12  ;;  %3725 = vmatmul.bf16.gmra.mxu3 %v3581_v48  ;;  %v5501_v15 = vld [vmem:[%s7295_s6 + $0x2] ss:$0 sm:$0xff]  ;;  %s5534_s6 = smov [#allocation4]  }
 0x496   :  { %s3809_s14 = sshll.u32 %s5534_s6, 4  ;;  %s3810_s14 = int_to_ptr.vmem [resolvable:$true] %s3809_s14 }
 0x497   :  { %v3578_v57 = vmax.f32 %v3570_v38, 0.0 }
 0x499   :  { %v3582_v31 = vpack.c.bf16 %v3578_v57, %v3576_v6 }
 0x49b   :  { %3744 = vmatmul.bf16.vlgmr.msra.gmra.mxu1 %v3582_v31 }
 0x508   :  { %v3721_v39 = vpop.f32.mrf.mxu3  ;;  %v3740_v40 = vpop.f32.mrf.mxu0 }
 0x509   :  { %v3741_v46 = vadd.f32 %v3740_v40, %v3721_v39 }
 0x510   :  { %v3723_v41 = vpop.f32.mrf.mxu3  ;;  %v3742_v42 = vpop.f32.mrf.mxu0 }
 0x511   :  { %v3743_v44 = vadd.f32 %v3742_v42, %v3723_v41 }
 0x513   :  { %v3750_v61 = vadd.f32 %v3743_v44, %v3741_v46 }
 0x515   :  { %v3751_v37 = vrot.slane %v3750_v61, 4 }
 0x517   :  { %v3752_v50 = vadd.f32 %v3751_v37, %v3750_v61 }
 0x518   :  { %v3726_v49 = vpop.f32.mrf.mxu3  ;;  %v3745_v16 = vpop.f32.mrf.mxu1 }
 0x519   :  { %v3753_v54 = vrot.slane %v3752_v50, 2  ;;  %v3746_v4 = vadd.f32 %v3745_v16, %v3726_v49 }
 0x51b   :  { %v3754_v56 = vadd.f32 %v3753_v54, %v3752_v50 }
 0x51d   :  { %v3755_v35 = vrot.slane %v3754_v56, 1 }
 0x51f   :  { %v3756_v13 = vadd.f32 %v3755_v35, %v3754_v56 }
 0x520   :  { %v3728_v43 = vpop.f32.mrf.mxu3  ;;  %v3747_v51 = vpop.f32.mrf.mxu1 }
 0x521   :  { %v3748_v52 = vadd.f32 %v3747_v51, %v3728_v43  ;;  %v3769_v30 = vadd.f32 %v5501_v15, %v3756_v13 }
 0x523   :  { %v3757_v55 = vadd.f32 %v3748_v52, %v3746_v4  ;;  %v3771_v14 = vmul.f32 %v3769_v30, %v3769_v30 }
 0x525   :  { %v3758_v58 = vrot.slane %v3757_v55, 4 }
 0x527   :  { %v3759_v59 = vadd.f32 %v3758_v58, %v3757_v55 }
 0x529   :  { %v3760_v60 = vrot.slane %v3759_v59, 2 }
 0x52b   :  { %v3761_v47 = vadd.f32 %v3760_v60, %v3759_v59 }
 0x52d   :  { %v3762_v17 = vrot.slane %v3761_v47, 1 }
 0x52f   :  { %v3763_v53 = vadd.f32 %v3762_v17, %v3761_v47 }
 0x531   :  { %v3770_v62 = vadd.f32 %v5501_v15, %v3763_v53 }
 0x533   :  { %v3772_v7 = vmul.f32 %v3770_v62, %v3770_v62 }
 0x535   :  { %v3775_v18 = vrot.slane %v3772_v7, 7 }
 0x537   :  { %v3776_v3 = vsel %vm1279_vm15, %v3775_v18, %v3771_v14 }
 0x538   :  { %v3778_v5 = vsel %vm1282_vm0, %v3776_v3, 0.0 }
 0x539   :  { %3779 = vadd.xlane.f32.xlu1 %v3778_v5 }
 0x5ac   :  { %v3780_v9 = vpop.xlane.xlu1 %3779 }
 0x5ad   :  { %v3781_v10 = vadd.f32 1e-12, %v3780_v9 }
 0x5af   :  { %5506 = vrsqrt.f32 %v3781_v10  ;;  %vm3788_vm8 = vweird.f32 %v3781_v10 }
 0x5b5   :  { %v5507_v1 = vpop.eup %5506 }
 0x5b6   :  { %v3783_v21 = vmul.f32 %v5507_v1, %v3781_v10  ;;  %vm3789_vm7 = vweird.f32 %v5507_v1 }
 0x5b7   :  { %vm3790_vm9 = vmor %vm3788_vm8, %vm3789_vm7 }
 0x5b8   :  { %v3784_v0 = vmul.f32 %v5507_v1, %v3783_v21 }
 0x5ba   :  { %v3785_v36 = vmul.f32 0.5, %v3784_v0 }
 0x5bc   :  { %v3786_v24 = vsub.f32 1.5, %v3785_v36 }
 0x5be   :  { %v3787_v26 = vmul.f32 %v5507_v1, %v3786_v24 }
 0x5c0   :  { %v3791_v23 = vsel %vm3790_vm9, %v5507_v1, %v3787_v26 }
 0x5c1   :  { %v3793_v33 = vrot.slane %v3791_v23, 1  ;;  %v3796_v19 = vmul.f32 %v3791_v23, %v3769_v30 }
 0x5c3   :  { %v3797_v45 = vmul.f32 %v3793_v33, %v3770_v62 }
 0x5c5   :  { %v3800_v32 = vrot.slane %v3797_v45, 7 }
 0x5c7   :  { %v3801_v25 = vsel %vm1279_vm15, %v3800_v32, %v3796_v19 }
 0x5c8   :  { %3804 = vst [vmem:[#allocation4 + $0x4] sm:$0x3] %v3801_v25 }
 0x5c9   :  { %3817 = dma.vmem_to_hbm [thread:$0]  %s3810_s14, 96, %s3812_s1, [#allocation5], %s5535_s17, %s5535_s17, %s5536_s18  }
 0x5ca   :  { %5532 = dma.done.wait [#allocation5], 96  }
 0x5cb   :  { %5533 = vsyncadd [#allocation5], 4294967200 }
 0x5cc   :  { %3822 = vsyncpa [#allocation5], 1 }

</bundles_post_ra>
